<compile_context>
chip_gen: v7x
topology: tpu7x:2x2x1
jax: 0.10.0
libtpu: 0.0.40
codegen_flags: <defaults>
</compile_context>

<pallas_src>
import math
from functools import partial

import jax
import jax.numpy as jnp
from jax import lax
from jax.experimental import pallas as pl
from jax.experimental.pallas import tpu as pltpu

# ---------------- config (small, consistent with the module) ----------------
EMBED_DIM = 32
IMG_SIZE = 16
PATCH_SIZE = 4
NUM_CLASSES = 10
CHANNELS = 3
NUM_HEADS = 2
NUM_ENCODERS = 2
MLP_RATIO = 4
NUM_IMG_TYPES = 4
HEAD_STRATEGY = 1            # allowed [1,3]; exact CorruptDeitOutputHead not provided
LN_EPS = 1e-5

NUM_SPECIAL = 3                                   # cls + distill + corrupt
NUM_PATCHES = (IMG_SIZE // PATCH_SIZE) ** 2       # 16
SEQ_LEN = NUM_PATCHES + NUM_SPECIAL               # 19
S_PAD = 24                                        # padded to sublane multiple of 8
PATCH_DIM = CHANNELS * PATCH_SIZE * PATCH_SIZE    # 48
MLP_DIM = MLP_RATIO * EMBED_DIM                   # 128
OUT_ROWS = 8                                      # padded output slab rows
OUT_LANES = 128                                   # lane-dense output slab width
CORR_OFF = 64                                     # corrupt logits live at cols 64..

# ---- row layout of the packed per-layer weight slab (L, LAYER_ROWS, 128) ----
R_WFUSED = 0                      # 32 rows: [wq | wk | wv@wo_h0 | wv@wo_h1]
R_W1 = 32                         # 32 rows: w1 (E, MLP_DIM)
R_W2T = 64                        # 32 rows: w2^T (E, MLP_DIM)
R_LN1G, R_LN1B = 96, 97
R_BFUSED = 98                     # [bq | bk | bv@wo_h0 | bv@wo_h1]
R_BO = 99
R_LN2G, R_LN2B = 100, 101
R_B1 = 102
R_B2 = 103
LAYER_ROWS = 104

# ---- row layout of the packed head slab (HEAD_ROWS, 128) ----
R_HW = 0                          # 96 rows: [0.5*wc_pad ; 0.5*wd_pad ; wr_pad]
R_HB = 96                         # combined head bias row
HEAD_ROWS = 104


def _layernorm(x, g, b):
    mu = jnp.mean(x, axis=-1, keepdims=True)
    xc = x - mu
    var = jnp.mean(xc * xc, axis=-1, keepdims=True)
    return xc * lax.rsqrt(var + LN_EPS) * g + b


# ---------------- the single fused Pallas kernel ----------------
def _fused_vit_kernel(pslab_ref, emb_ref, layers_ref, heads_ref, o_ref, *,
                      num_heads, num_layers, batch, s_pad, s_valid):
    E = EMBED_DIM
    hd = E // num_heads
    scale = 1.0 / math.sqrt(hd)
    n_rows = batch * s_pad

    # ---- patch embedding + special tokens + positional encoding ----
    patch_w = emb_ref[0:PATCH_DIM, :]                         # (PD, E)
    add_seq = emb_ref[PATCH_DIM:PATCH_DIM + s_pad, :]         # (S_pad, E)
    addit = jnp.concatenate([add_seq] * batch, axis=0)        # (B*S_pad, E)
    x = (jnp.dot(pslab_ref[...], patch_w, preferred_element_type=jnp.float32)
         + addit)                                             # (B*S_pad, E)

    # ---- hoisted constants (built once, reused across layers/heads) ----
    lane_e = lax.broadcasted_iota(jnp.int32, (1, E), 1)
    head_masks = [jnp.logical_and(lane_e >= hh * hd, lane_e < (hh + 1) * hd)
                  .astype(jnp.float32) for hh in range(num_heads)]
    # block-diagonal attention bias: same batch AND valid (non-padded) key
    row_ids = lax.broadcasted_iota(jnp.int32, (n_rows, 1), 0)
    col_ids = lax.broadcasted_iota(jnp.int32, (1, n_rows), 1)
    ok = jnp.zeros((n_rows, n_rows), jnp.bool_)
    for b in range(batch):
        r_in = jnp.logical_and(row_ids >= b * s_pad, row_ids < (b + 1) * s_pad)
        c_in = jnp.logical_and(col_ids >= b * s_pad, col_ids < b * s_pad + s_valid)
        ok = jnp.logical_or(ok, jnp.logical_and(r_in, c_in))
    attn_bias = jnp.where(ok, 0.0, -1e30).astype(jnp.float32)

    # ---- encoder layers (fully unrolled, L = 2) ----
    for l in range(num_layers):
        # -- multi-head self-attention (pre-norm) --
        ln1g = layers_ref[l, R_LN1G:R_LN1G + 1, 0:E]
        ln1b = layers_ref[l, R_LN1B:R_LN1B + 1, 0:E]
        h = _layernorm(x, ln1g, ln1b)

        # one 128-lane matmul: lanes [0,E)=q, [E,2E)=k, [2E,4E)=v@wo per head
        qkvo = (jnp.dot(h, layers_ref[l, R_WFUSED:R_WFUSED + E, :],
                        preferred_element_type=jnp.float32)
                + layers_ref[l, R_BFUSED:R_BFUSED + 1, :])     # (B*S_pad, 128)
        q = qkvo[:, 0:E]
        k = qkvo[:, E:2 * E]

        acc = jnp.zeros((n_rows, E), jnp.float32)
        for hh in range(num_heads):                            # static loop, H = 2
            # q . (k * mask_h) contracts only head-h lanes; no explicit transpose
            k_h = k * head_masks[hh]
            s = lax.dot_general(q, k_h, (((1,), (1,)), ((), ())),
                                preferred_element_type=jnp.float32) * scale
            s = s + attn_bias                                  # block-diag + pad mask
            s = s - jnp.max(s, axis=-1, keepdims=True)
            p = jnp.exp(s)
            p = p * pl.reciprocal(jnp.sum(p, axis=-1, keepdims=True), approx=True)
            vwo_h = qkvo[:, 2 * E + hh * E: 2 * E + (hh + 1) * E]
            acc = acc + jnp.dot(p, vwo_h, preferred_element_type=jnp.float32)
        x = x + acc + layers_ref[l, R_BO:R_BO + 1, 0:E]

        # -- MLP (pre-norm) --
        ln2g = layers_ref[l, R_LN2G:R_LN2G + 1, 0:E]
        ln2b = layers_ref[l, R_LN2B:R_LN2B + 1, 0:E]
        h2 = _layernorm(x, ln2g, ln2b)
        # TODO(synk): PyTorch nn.GELU defaults to exact erf; tanh approximation used here.
        m = jax.nn.gelu(jnp.dot(h2, layers_ref[l, R_W1:R_W1 + E, :],
                                preferred_element_type=jnp.float32)
                        + layers_ref[l, R_B1:R_B1 + 1, :])     # (B*S_pad, MLP)
        x = (x + lax.dot_general(m, layers_ref[l, R_W2T:R_W2T + E, :],
                                 (((1,), (1,)), ((), ())),
                                 preferred_element_type=jnp.float32)
             + layers_ref[l, R_B2:R_B2 + 1, 0:E])

    # ---- readout: token rows 0/1/2 of each batch element ----
    eps2 = 1e-16                      # == (torch cosine_similarity eps)^2

    def _cs(a, b):
        num = jnp.sum(a * b, axis=-1, keepdims=True)
        sa = jnp.sum(a * a, axis=-1, keepdims=True)
        sb = jnp.sum(b * b, axis=-1, keepdims=True)
        return (num * lax.rsqrt(jnp.maximum(sa, eps2))
                * lax.rsqrt(jnp.maximum(sb, eps2)))

    u_rows = []
    sim_cd = jnp.zeros((1, 1), jnp.float32)
    sim_cr = jnp.zeros((1, 1), jnp.float32)
    for b in range(batch):                                     # static loop, B = 2
        base = b * s_pad
        cb = x[base:base + 1, :]
        db = x[base + 1:base + 2, :]
        ctb = x[base + 2:base + 3, :]
        sim_cd = sim_cd + _cs(cb, db)
        sim_cr = sim_cr + _cs(cb, ctb)
        u_rows.append(jnp.concatenate([cb, db, ctb], axis=1))  # (1, 3E)
    u = jnp.concatenate(u_rows, axis=0)                        # (B, 3E)
    sim_cd = sim_cd * (1.0 / batch)
    sim_cr = sim_cr * (1.0 / batch)

    # one fused head matmul: lanes [0,K)=(cls+distill)/2, [CORR_OFF,..)=corrupt
    # TODO(synk): CorruptDeitOutputHead definition not provided; eval-style fusion
    # ((cls_head + distill_head)/2, corrupt logits alongside) is assumed.
    logits = (jnp.dot(u, heads_ref[R_HW:R_HW + 3 * E, :],
                      preferred_element_type=jnp.float32)
              + heads_ref[R_HB:R_HB + 1, :])                   # (B, 128)

    lane_o = lax.broadcasted_iota(jnp.int32, (1, OUT_LANES), 1)
    sim_row = (jnp.where(lane_o == 0, sim_cd, 0.0)
               + jnp.where(lane_o == 1, sim_cr, 0.0))          # (1, 128)
    slab = jnp.concatenate(
        [logits, sim_row,
         jnp.zeros((OUT_ROWS - batch - 1, OUT_LANES), jnp.float32)], axis=0)
    o_ref[...] = slab                                          # single full-tile store


# ---------------- host-side glue ----------------
def _to_patches(x_nchw):
    B, C, Himg, Wimg = x_nchw.shape
    P = PATCH_SIZE
    nH, nW = Himg // P, Wimg // P
    p = x_nchw.reshape(B, C, nH, P, nW, P)
    p = jnp.transpose(p, (0, 2, 4, 1, 3, 5))
    return p.reshape(B, nH * nW, C * P * P)


def pack_params(params):
    """Pack all weights into 3 lane-dense slabs. Call ONCE, outside the jitted fwd."""
    E, L, H = EMBED_DIM, NUM_ENCODERS, NUM_HEADS
    hd = E // H
    K, T = NUM_CLASSES, NUM_IMG_TYPES
    lp = params["layers"]

    # ---- embed slab: patch projection weight + (tokens + pos + patch bias) rows ----
    tok = jnp.stack([params["cls"], params["dist"], params["corrupt"]], axis=0)
    add_seq = jnp.concatenate(
        [tok + params["pos"][:NUM_SPECIAL],
         params["pos"][NUM_SPECIAL:] + params["patch_b"][None, :],
         jnp.zeros((S_PAD - SEQ_LEN, E), jnp.float32)], axis=0)       # (S_PAD, E)
    emb_slab = jnp.concatenate([params["patch_w"], add_seq], axis=0)  # (PD+S_PAD, E)

    # ---- per-layer slab ----
    def pad128(a):
        return jnp.pad(a, ((0, 0), (0, OUT_LANES - a.shape[1])))

    head_row_masks = [((jnp.arange(E) >= hh * hd) & (jnp.arange(E) < (hh + 1) * hd))
                      .astype(jnp.float32) for hh in range(H)]
    layer_rows = []
    for l in range(L):
        wq, wk, wv, wo = lp["wq"][l], lp["wk"][l], lp["wv"][l], lp["wo"][l]
        bq, bk, bv = lp["bq"][l], lp["bk"][l], lp["bv"][l]
        # fold per-head value->output projection into the QKV matmul:
        # (v * mask_h) @ wo == h @ (wv @ (wo * mask_h[:,None])) + bv @ (wo * mask_h[:,None])
        w_vo = jnp.concatenate([wv @ (wo * m[:, None]) for m in head_row_masks], axis=1)
        b_vo = jnp.concatenate([bv @ (wo * m[:, None]) for m in head_row_masks], axis=1)
        w_fused = jnp.concatenate([wq, wk, w_vo], axis=1)     # (E, 4E) = (32, 128)
        b_fused = jnp.concatenate([bq, bk, b_vo], axis=1)     # (1, 128)
        rows = jnp.concatenate([
            w_fused,                       # R_WFUSED
            lp["w1"][l],                   # R_W1
            lp["w2"][l].T,                 # R_W2T  (stored lane-dense, contracted on lanes)
            pad128(lp["ln1_g"][l]),        # R_LN1G
            pad128(lp["ln1_b"][l]),        # R_LN1B
            b_fused,                       # R_BFUSED
            pad128(lp["bo"][l]),           # R_BO
            pad128(lp["ln2_g"][l]),        # R_LN2G
            pad128(lp["ln2_b"][l]),        # R_LN2B
            lp["b1"][l],                   # R_B1
            pad128(lp["b2"][l]),           # R_B2
        ], axis=0)                                            # (LAYER_ROWS, 128)
        layer_rows.append(rows)
    layer_slab = jnp.stack(layer_rows, axis=0)                # (L, LAYER_ROWS, 128)

    # ---- head slab: [0.5*wc ; 0.5*wd ; wr] packed lane-dense, fused bias row ----
    def padw_lane(w, off):
        return jnp.zeros((E, OUT_LANES), jnp.float32).at[:, off:off + w.shape[1]].set(w)

    w_heads = jnp.concatenate([0.5 * padw_lane(params["wc"], 0),
                               0.5 * padw_lane(params["wd"], 0),
                               padw_lane(params["wr"], CORR_OFF)], axis=0)   # (3E, 128)
    b_heads = jnp.zeros((1, OUT_LANES), jnp.float32)
    b_heads = b_heads.at[0, :K].set(0.5 * (params["bc"] + params["bd"]))
    b_heads = b_heads.at[0, CORR_OFF:CORR_OFF + T].set(params["br"])
    head_slab = jnp.concatenate(
        [w_heads, b_heads,
         jnp.zeros((HEAD_ROWS - 3 * E - 1, OUT_LANES), jnp.float32)], axis=0)

    return {"emb": emb_slab, "layers": layer_slab, "heads": head_slab}


@jax.jit
def corrupt_distill_vit_forward(x_nchw, packed):
    B = x_nchw.shape[0]
    K, T = NUM_CLASSES, NUM_IMG_TYPES
    assert B + 1 <= OUT_ROWS

    patches = _to_patches(x_nchw)                              # (B, N, PD)
    N = patches.shape[1]
    # patches placed at their sequence rows; token/pad rows are zero
    pslab = jnp.pad(patches, ((0, 0), (NUM_SPECIAL, S_PAD - NUM_SPECIAL - N), (0, 0)))
    pslab = pslab.reshape(B * S_PAD, PATCH_DIM)                # (B*S_pad, PD)

    slab = pl.pallas_call(
        partial(_fused_vit_kernel, num_heads=NUM_HEADS, num_layers=NUM_ENCODERS,
                batch=B, s_pad=S_PAD, s_valid=SEQ_LEN),
        out_shape=jax.ShapeDtypeStruct((OUT_ROWS, OUT_LANES), jnp.float32),
        in_specs=[pl.BlockSpec(memory_space=pltpu.MemorySpace.VMEM)] * 4,
        out_specs=pl.BlockSpec(memory_space=pltpu.MemorySpace.VMEM),
    )(pslab, packed["emb"], packed["layers"], packed["heads"])

    class_logits = slab[:B, :K]
    corrupt_logits = slab[:B, CORR_OFF:CORR_OFF + T]
    sim_cls_distill = slab[B, 0]
    sim_cls_corrupt = slab[B, 1]
    return class_logits, corrupt_logits, sim_cls_distill, sim_cls_corrupt


# ---------------- parameter init (deterministic, synthetic) ----------------
def init_params(key):
    E, K, T, L, H = EMBED_DIM, NUM_CLASSES, NUM_IMG_TYPES, NUM_ENCODERS, MLP_DIM
    keys = iter(jax.random.split(key, 48))

    def nrm(shape, scale=0.02):
        return (scale * jax.random.normal(next(keys), shape)).astype(jnp.float32)

    params = {
        "patch_w": nrm((PATCH_DIM, E)),          # flattened Conv2d(C,E,P,P) weight
        "patch_b": nrm((E,)),
        "cls": nrm((E,)), "dist": nrm((E,)), "corrupt": nrm((E,)),
        "pos": nrm((SEQ_LEN, E)),
        "wc": nrm((E, K)), "bc": nrm((K,)),      # cls_head
        "wd": nrm((E, K)), "bd": nrm((K,)),      # distill_head
        "wr": nrm((E, T)), "br": nrm((T,)),      # corrupt_head
        "layers": {
            "ln1_g": jnp.ones((L, 1, E), jnp.float32) + nrm((L, 1, E)),
            "ln1_b": nrm((L, 1, E)),
            "wq": nrm((L, E, E)), "bq": nrm((L, 1, E)),
            "wk": nrm((L, E, E)), "bk": nrm((L, 1, E)),
            "wv": nrm((L, E, E)), "bv": nrm((L, 1, E)),
            "wo": nrm((L, E, E)), "bo": nrm((L, 1, E)),
            "ln2_g": jnp.ones((L, 1, E), jnp.float32) + nrm((L, 1, E)),
            "ln2_b": nrm((L, 1, E)),
            "w1": nrm((L, E, H)), "b1": nrm((L, 1, H)),
            "w2": nrm((L, H, E)), "b2": nrm((L, 1, E)),
        },
    }
    return params


# ---------------- pure-JAX reference (same math, unpadded) ----------------
def _cos_sim_ref(a, b):
    eps = 1e-8
    num = jnp.sum(a * b, axis=-1, keepdims=True)
    na = jnp.maximum(jnp.sqrt(jnp.sum(a * a, axis=-1, keepdims=True)), eps)
    nb = jnp.maximum(jnp.sqrt(jnp.sum(b * b, axis=-1, keepdims=True)), eps)
    return num / (na * nb)


def reference_forward(x_nchw, params):
    B = x_nchw.shape[0]
    patches = _to_patches(x_nchw)
    emb = jnp.einsum("bnp,pe->bne", patches, params["patch_w"]) + params["patch_b"]
    tok = jnp.stack([params["cls"], params["dist"], params["corrupt"]], axis=0)
    tok_b = jnp.broadcast_to(tok[None], (B, NUM_SPECIAL, EMBED_DIM))
    x = jnp.concatenate([tok_b, emb], axis=1) + params["pos"][None]

    lp = params["layers"]
    hd = EMBED_DIM // NUM_HEADS
    scale = 1.0 / math.sqrt(hd)
    for l in range(NUM_ENCODERS):
        h = _layernorm(x, lp["ln1_g"][l], lp["ln1_b"][l])
        q = h @ lp["wq"][l] + lp["bq"][l]
        k = h @ lp["wk"][l] + lp["bk"][l]
        v = h @ lp["wv"][l] + lp["bv"][l]
        acc = jnp.zeros_like(x)
        for hh in range(NUM_HEADS):
            sl = slice(hh * hd, (hh + 1) * hd)
            s = jnp.einsum("bqd,bkd->bqk", q[..., sl], k[..., sl]) * scale
            s = s - jnp.max(s, axis=-1, keepdims=True)
            p = jnp.exp(s)
            p = p / jnp.sum(p, axis=-1, keepdims=True)
            oh = jnp.einsum("bqk,bkd->bqd", p, v[..., sl])
            acc = acc + oh @ lp["wo"][l][sl, :]
        x = x + acc + lp["bo"][l]
        h2 = _layernorm(x, lp["ln2_g"][l], lp["ln2_b"][l])
        m = jax.nn.gelu(h2 @ lp["w1"][l] + lp["b1"][l]) @ lp["w2"][l] + lp["b2"][l]
        x = x + m

    c, d, ct = x[:, 0, :], x[:, 1, :], x[:, 2, :]
    sim_cd = jnp.mean(_cos_sim_ref(c, d))
    sim_cr = jnp.mean(_cos_sim_ref(c, ct))
    out_c = c @ params["wc"] + params["bc"]
    out_d = d @ params["wd"] + params["bd"]
    out_r = ct @ params["wr"] + params["br"]
    return (out_c + out_d) * 0.5, out_r, sim_cd, sim_cr


if __name__ == "__main__":
    key = jax.random.PRNGKey(0)
    pkey, xkey = jax.random.split(key)
    params = init_params(pkey)
    packed = pack_params(params)          # weight packing precomputed outside the jit
    x = jax.random.normal(xkey, (2, CHANNELS, IMG_SIZE, IMG_SIZE), dtype=jnp.float32)

    out, corr, sim_cd, sim_cr = corrupt_distill_vit_forward(x, packed)
    out = jax.block_until_ready(out)
    corr = jax.block_until_ready(corr)
    sim_cd = jax.block_until_ready(sim_cd)
    sim_cr = jax.block_until_ready(sim_cr)

    ref_out, ref_corr, ref_cd, ref_cr = reference_forward(x, params)

    assert out.shape == (2, NUM_CLASSES), out.shape
    assert corr.shape == (2, NUM_IMG_TYPES), corr.shape
    assert jnp.allclose(out, ref_out, atol=2e-3, rtol=2e-3), "class logits mismatch"
    assert jnp.allclose(corr, ref_corr, atol=2e-3, rtol=2e-3), "corrupt logits mismatch"
    assert jnp.allclose(sim_cd, ref_cd, atol=5e-3), "sim_cls_distill mismatch"
    assert jnp.allclose(sim_cr, ref_cr, atol=5e-3), "sim_cls_corrupt mismatch"
    print("KERNEL_OK")
</pallas_src>

<mosaic_0001>
module attributes {stable_mosaic.version = 11 : i64} {
  func.func @_fused_vit_kernel(%arg0: memref<48x48xf32, #tpu.memory_space<vmem>>, %arg1: memref<72x32xf32, #tpu.memory_space<vmem>>, %arg2: memref<2x104x128xf32, #tpu.memory_space<vmem>>, %arg3: memref<104x128xf32, #tpu.memory_space<vmem>>, %arg4: memref<8x128xf32, #tpu.memory_space<vmem>>) attributes {dimension_semantics = [], scalar_prefetch = 0 : i64, scratch_operands = 0 : i64, tpu.core_type = #tpu.core_type<tc>} {
    %c0 = arith.constant 0 : index
    %c0_0 = arith.constant 0 : index
    %0 = vector.load %arg1[%c0, %c0_0] : memref<72x32xf32, #tpu.memory_space<vmem>>, vector<48x32xf32>
    %c48 = arith.constant 48 : index
    %c0_1 = arith.constant 0 : index
    %1 = vector.load %arg1[%c48, %c0_1] : memref<72x32xf32, #tpu.memory_space<vmem>>, vector<24x32xf32>
    %2 = tpu.concatenate %1, %1 in 0 : vector<24x32xf32>, vector<24x32xf32> -> vector<48x32xf32>
    %c0_2 = arith.constant 0 : index
    %c0_3 = arith.constant 0 : index
    %3 = vector.load %arg0[%c0_2, %c0_3] : memref<48x48xf32, #tpu.memory_space<vmem>>, vector<48x48xf32>
    %cst = arith.constant dense<0.000000e+00> : vector<48x32xf32>
    %4 = tpu.matmul %3, %0, %cst {dimension_numbers = #tpu.dot_dimension_numbers<[1], [0], [0], [1], [0, 0, 1, 1], [], []>} : vector<48x48xf32>, vector<48x32xf32>, vector<48x32xf32> -> vector<48x32xf32>
    %5 = arith.addf %4, %2 : vector<48x32xf32>
    %6 = tpu.iota {dimensions = array<i32: 1>} : vector<1x32xi32>
    %c0_i32 = arith.constant 0 : i32
    %7 = vector.broadcast %c0_i32 : i32 to vector<1x32xi32>
    %8 = arith.cmpi sge, %6, %7 : vector<1x32xi32>
    %c16_i32 = arith.constant 16 : i32
    %9 = vector.broadcast %c16_i32 : i32 to vector<1x32xi32>
    %10 = arith.cmpi slt, %6, %9 : vector<1x32xi32>
    %11 = arith.andi %8, %10 : vector<1x32xi1>
    %12 = arith.extui %11 : vector<1x32xi1> to vector<1x32xi32>
    %13 = arith.sitofp %12 : vector<1x32xi32> to vector<1x32xf32>
    %c16_i32_4 = arith.constant 16 : i32
    %14 = vector.broadcast %c16_i32_4 : i32 to vector<1x32xi32>
    %15 = arith.cmpi sge, %6, %14 : vector<1x32xi32>
    %c32_i32 = arith.constant 32 : i32
    %16 = vector.broadcast %c32_i32 : i32 to vector<1x32xi32>
    %17 = arith.cmpi slt, %6, %16 : vector<1x32xi32>
    %18 = arith.andi %15, %17 : vector<1x32xi1>
    %19 = arith.extui %18 : vector<1x32xi1> to vector<1x32xi32>
    %20 = arith.sitofp %19 : vector<1x32xi32> to vector<1x32xf32>
    %21 = tpu.iota {dimensions = array<i32: 0>} : vector<48x1xi32>
    %22 = tpu.iota {dimensions = array<i32: 1>} : vector<1x48xi32>
    %false = arith.constant false
    %23 = vector.broadcast %false : i1 to vector<48x48xi1>
    %c0_i32_5 = arith.constant 0 : i32
    %24 = vector.broadcast %c0_i32_5 : i32 to vector<48x1xi32>
    %25 = arith.cmpi sge, %21, %24 : vector<48x1xi32>
    %c24_i32 = arith.constant 24 : i32
    %26 = vector.broadcast %c24_i32 : i32 to vector<48x1xi32>
    %27 = arith.cmpi slt, %21, %26 : vector<48x1xi32>
    %28 = arith.andi %25, %27 : vector<48x1xi1>
    %c0_i32_6 = arith.constant 0 : i32
    %29 = vector.broadcast %c0_i32_6 : i32 to vector<1x48xi32>
    %30 = arith.cmpi sge, %22, %29 : vector<1x48xi32>
    %c19_i32 = arith.constant 19 : i32
    %31 = vector.broadcast %c19_i32 : i32 to vector<1x48xi32>
    %32 = arith.cmpi slt, %22, %31 : vector<1x48xi32>
    %33 = arith.andi %30, %32 : vector<1x48xi1>
    %34 = vector.broadcast %28 : vector<48x1xi1> to vector<48x48xi1>
    %35 = vector.broadcast %33 : vector<1x48xi1> to vector<48x48xi1>
    %36 = arith.andi %34, %35 : vector<48x48xi1>
    %37 = arith.ori %23, %36 : vector<48x48xi1>
    %c24_i32_7 = arith.constant 24 : i32
    %38 = vector.broadcast %c24_i32_7 : i32 to vector<48x1xi32>
    %39 = arith.cmpi sge, %21, %38 : vector<48x1xi32>
    %c48_i32 = arith.constant 48 : i32
    %40 = vector.broadcast %c48_i32 : i32 to vector<48x1xi32>
    %41 = arith.cmpi slt, %21, %40 : vector<48x1xi32>
    %42 = arith.andi %39, %41 : vector<48x1xi1>
    %c24_i32_8 = arith.constant 24 : i32
    %43 = vector.broadcast %c24_i32_8 : i32 to vector<1x48xi32>
    %44 = arith.cmpi sge, %22, %43 : vector<1x48xi32>
    %c43_i32 = arith.constant 43 : i32
    %45 = vector.broadcast %c43_i32 : i32 to vector<1x48xi32>
    %46 = arith.cmpi slt, %22, %45 : vector<1x48xi32>
    %47 = arith.andi %44, %46 : vector<1x48xi1>
    %48 = vector.broadcast %42 : vector<48x1xi1> to vector<48x48xi1>
    %49 = vector.broadcast %47 : vector<1x48xi1> to vector<48x48xi1>
    %50 = arith.andi %48, %49 : vector<48x48xi1>
    %51 = arith.ori %37, %50 : vector<48x48xi1>
    %cst_9 = arith.constant 0.000000e+00 : f32
    %cst_10 = arith.constant -1.000000e+30 : f32
    %52 = vector.broadcast %cst_9 : f32 to vector<48x48xf32>
    %53 = vector.broadcast %cst_10 : f32 to vector<48x48xf32>
    %54 = arith.select %51, %52, %53 : vector<48x48xi1>, vector<48x48xf32>
    %c0_11 = arith.constant 0 : index
    %c96 = arith.constant 96 : index
    %c0_12 = arith.constant 0 : index
    %55 = vector.load %arg2[%c0_11, %c96, %c0_12] : memref<2x104x128xf32, #tpu.memory_space<vmem>>, vector<1x1x32xf32>
    %56 = vector.shape_cast %55 : vector<1x1x32xf32> to vector<1x32xf32>
    %c0_13 = arith.constant 0 : index
    %c97 = arith.constant 97 : index
    %c0_14 = arith.constant 0 : index
    %57 = vector.load %arg2[%c0_13, %c97, %c0_14] : memref<2x104x128xf32, #tpu.memory_space<vmem>>, vector<1x1x32xf32>
    %58 = vector.shape_cast %57 : vector<1x1x32xf32> to vector<1x32xf32>
    %cst_15 = arith.constant dense<0.000000e+00> : vector<48xf32>
    %59 = vector.multi_reduction <add>, %5, %cst_15 [1] : vector<48x32xf32> to vector<48xf32>
    %60 = vector.shape_cast %59 : vector<48xf32> to vector<48x1xf32>
    %cst_16 = arith.constant 3.200000e+01 : f32
    %61 = vector.broadcast %cst_16 : f32 to vector<48x1xf32>
    %62 = arith.divf %60, %61 : vector<48x1xf32>
    %63 = vector.broadcast %62 : vector<48x1xf32> to vector<48x32xf32>
    %64 = arith.subf %5, %63 : vector<48x32xf32>
    %65 = arith.mulf %64, %64 : vector<48x32xf32>
    %cst_17 = arith.constant dense<0.000000e+00> : vector<48xf32>
    %66 = vector.multi_reduction <add>, %65, %cst_17 [1] : vector<48x32xf32> to vector<48xf32>
    %67 = vector.shape_cast %66 : vector<48xf32> to vector<48x1xf32>
    %cst_18 = arith.constant 3.200000e+01 : f32
    %68 = vector.broadcast %cst_18 : f32 to vector<48x1xf32>
    %69 = arith.divf %67, %68 : vector<48x1xf32>
    %cst_19 = arith.constant 9.99999974E-6 : f32
    %70 = vector.broadcast %cst_19 : f32 to vector<48x1xf32>
    %71 = arith.addf %69, %70 : vector<48x1xf32>
    %72 = math.rsqrt %71 : vector<48x1xf32>
    %73 = vector.broadcast %72 : vector<48x1xf32> to vector<48x32xf32>
    %74 = arith.mulf %64, %73 : vector<48x32xf32>
    %75 = vector.broadcast %56 : vector<1x32xf32> to vector<48x32xf32>
    %76 = arith.mulf %74, %75 : vector<48x32xf32>
    %77 = vector.broadcast %58 : vector<1x32xf32> to vector<48x32xf32>
    %78 = arith.addf %76, %77 : vector<48x32xf32>
    %c0_20 = arith.constant 0 : index
    %c0_21 = arith.constant 0 : index
    %c0_22 = arith.constant 0 : index
    %79 = vector.load %arg2[%c0_20, %c0_21, %c0_22] : memref<2x104x128xf32, #tpu.memory_space<vmem>>, vector<1x32x128xf32>
    %80 = vector.shape_cast %79 : vector<1x32x128xf32> to vector<32x128xf32>
    %cst_23 = arith.constant dense<0.000000e+00> : vector<48x128xf32>
    %81 = tpu.matmul %78, %80, %cst_23 {dimension_numbers = #tpu.dot_dimension_numbers<[1], [0], [0], [1], [0, 0, 1, 1], [], []>} : vector<48x32xf32>, vector<32x128xf32>, vector<48x128xf32> -> vector<48x128xf32>
    %c0_24 = arith.constant 0 : index
    %c98 = arith.constant 98 : index
    %c0_25 = arith.constant 0 : index
    %82 = vector.load %arg2[%c0_24, %c98, %c0_25] : memref<2x104x128xf32, #tpu.memory_space<vmem>>, vector<1x1x128xf32>
    %83 = vector.shape_cast %82 : vector<1x1x128xf32> to vector<1x128xf32>
    %84 = vector.broadcast %83 : vector<1x128xf32> to vector<48x128xf32>
    %85 = arith.addf %81, %84 : vector<48x128xf32>
    %86 = vector.extract_strided_slice %85 {offsets = [0, 0], sizes = [48, 32], strides = [1, 1]} : vector<48x128xf32> to vector<48x32xf32>
    %87 = vector.extract_strided_slice %85 {offsets = [0, 32], sizes = [48, 32], strides = [1, 1]} : vector<48x128xf32> to vector<48x32xf32>
    %cst_26 = arith.constant 0.000000e+00 : f32
    %88 = vector.broadcast %cst_26 : f32 to vector<48x32xf32>
    %89 = vector.broadcast %13 : vector<1x32xf32> to vector<48x32xf32>
    %90 = arith.mulf %87, %89 : vector<48x32xf32>
    %cst_27 = arith.constant dense<0.000000e+00> : vector<48x48xf32>
    %91 = tpu.matmul %86, %90, %cst_27 {dimension_numbers = #tpu.dot_dimension_numbers<[1], [1], [0], [0], [0, 0, 1, 0], [], []>} : vector<48x32xf32>, vector<48x32xf32>, vector<48x48xf32> -> vector<48x48xf32>
    %cst_28 = arith.constant 2.500000e-01 : f32
    %92 = vector.broadcast %cst_28 : f32 to vector<48x48xf32>
    %93 = arith.mulf %91, %92 : vector<48x48xf32>
    %94 = arith.addf %93, %54 : vector<48x48xf32>
    %cst_29 = arith.constant dense<0xFF800000> : vector<48xf32>
    %95 = vector.multi_reduction <maximumf>, %94, %cst_29 [1] : vector<48x48xf32> to vector<48xf32>
    %96 = vector.shape_cast %95 : vector<48xf32> to vector<48x1xf32>
    %97 = vector.broadcast %96 : vector<48x1xf32> to vector<48x48xf32>
    %98 = arith.subf %94, %97 : vector<48x48xf32>
    %99 = math.exp %98 : vector<48x48xf32>
    %cst_30 = arith.constant dense<0.000000e+00> : vector<48xf32>
    %100 = vector.multi_reduction <add>, %99, %cst_30 [1] : vector<48x48xf32> to vector<48xf32>
    %101 = vector.shape_cast %100 : vector<48xf32> to vector<48x1xf32>
    %102 = tpu.reciprocal %101 {approx = true} : vector<48x1xf32> -> vector<48x1xf32>
    %103 = vector.broadcast %102 : vector<48x1xf32> to vector<48x48xf32>
    %104 = arith.mulf %99, %103 : vector<48x48xf32>
    %105 = vector.extract_strided_slice %85 {offsets = [0, 64], sizes = [48, 32], strides = [1, 1]} : vector<48x128xf32> to vector<48x32xf32>
    %cst_31 = arith.constant dense<0.000000e+00> : vector<48x32xf32>
    %106 = tpu.matmul %104, %105, %cst_31 {dimension_numbers = #tpu.dot_dimension_numbers<[1], [0], [0], [1], [0, 0, 1, 1], [], []>} : vector<48x48xf32>, vector<48x32xf32>, vector<48x32xf32> -> vector<48x32xf32>
    %107 = arith.addf %88, %106 : vector<48x32xf32>
    %108 = vector.broadcast %20 : vector<1x32xf32> to vector<48x32xf32>
    %109 = arith.mulf %87, %108 : vector<48x32xf32>
    %cst_32 = arith.constant dense<0.000000e+00> : vector<48x48xf32>
    %110 = tpu.matmul %86, %109, %cst_32 {dimension_numbers = #tpu.dot_dimension_numbers<[1], [1], [0], [0], [0, 0, 1, 0], [], []>} : vector<48x32xf32>, vector<48x32xf32>, vector<48x48xf32> -> vector<48x48xf32>
    %cst_33 = arith.constant 2.500000e-01 : f32
    %111 = vector.broadcast %cst_33 : f32 to vector<48x48xf32>
    %112 = arith.mulf %110, %111 : vector<48x48xf32>
    %113 = arith.addf %112, %54 : vector<48x48xf32>
    %cst_34 = arith.constant dense<0xFF800000> : vector<48xf32>
    %114 = vector.multi_reduction <maximumf>, %113, %cst_34 [1] : vector<48x48xf32> to vector<48xf32>
    %115 = vector.shape_cast %114 : vector<48xf32> to vector<48x1xf32>
    %116 = vector.broadcast %115 : vector<48x1xf32> to vector<48x48xf32>
    %117 = arith.subf %113, %116 : vector<48x48xf32>
    %118 = math.exp %117 : vector<48x48xf32>
    %cst_35 = arith.constant dense<0.000000e+00> : vector<48xf32>
    %119 = vector.multi_reduction <add>, %118, %cst_35 [1] : vector<48x48xf32> to vector<48xf32>
    %120 = vector.shape_cast %119 : vector<48xf32> to vector<48x1xf32>
    %121 = tpu.reciprocal %120 {approx = true} : vector<48x1xf32> -> vector<48x1xf32>
    %122 = vector.broadcast %121 : vector<48x1xf32> to vector<48x48xf32>
    %123 = arith.mulf %118, %122 : vector<48x48xf32>
    %124 = vector.extract_strided_slice %85 {offsets = [0, 96], sizes = [48, 32], strides = [1, 1]} : vector<48x128xf32> to vector<48x32xf32>
    %cst_36 = arith.constant dense<0.000000e+00> : vector<48x32xf32>
    %125 = tpu.matmul %123, %124, %cst_36 {dimension_numbers = #tpu.dot_dimension_numbers<[1], [0], [0], [1], [0, 0, 1, 1], [], []>} : vector<48x48xf32>, vector<48x32xf32>, vector<48x32xf32> -> vector<48x32xf32>
    %126 = arith.addf %107, %125 : vector<48x32xf32>
    %127 = arith.addf %5, %126 : vector<48x32xf32>
    %c0_37 = arith.constant 0 : index
    %c99 = arith.constant 99 : index
    %c0_38 = arith.constant 0 : index
    %128 = vector.load %arg2[%c0_37, %c99, %c0_38] : memref<2x104x128xf32, #tpu.memory_space<vmem>>, vector<1x1x32xf32>
    %129 = vector.shape_cast %128 : vector<1x1x32xf32> to vector<1x32xf32>
    %130 = vector.broadcast %129 : vector<1x32xf32> to vector<48x32xf32>
    %131 = arith.addf %127, %130 : vector<48x32xf32>
    %c0_39 = arith.constant 0 : index
    %c100 = arith.constant 100 : index
    %c0_40 = arith.constant 0 : index
    %132 = vector.load %arg2[%c0_39, %c100, %c0_40] : memref<2x104x128xf32, #tpu.memory_space<vmem>>, vector<1x1x32xf32>
    %133 = vector.shape_cast %132 : vector<1x1x32xf32> to vector<1x32xf32>
    %c0_41 = arith.constant 0 : index
    %c101 = arith.constant 101 : index
    %c0_42 = arith.constant 0 : index
    %134 = vector.load %arg2[%c0_41, %c101, %c0_42] : memref<2x104x128xf32, #tpu.memory_space<vmem>>, vector<1x1x32xf32>
    %135 = vector.shape_cast %134 : vector<1x1x32xf32> to vector<1x32xf32>
    %cst_43 = arith.constant dense<0.000000e+00> : vector<48xf32>
    %136 = vector.multi_reduction <add>, %131, %cst_43 [1] : vector<48x32xf32> to vector<48xf32>
    %137 = vector.shape_cast %136 : vector<48xf32> to vector<48x1xf32>
    %cst_44 = arith.constant 3.200000e+01 : f32
    %138 = vector.broadcast %cst_44 : f32 to vector<48x1xf32>
    %139 = arith.divf %137, %138 : vector<48x1xf32>
    %140 = vector.broadcast %139 : vector<48x1xf32> to vector<48x32xf32>
    %141 = arith.subf %131, %140 : vector<48x32xf32>
    %142 = arith.mulf %141, %141 : vector<48x32xf32>
    %cst_45 = arith.constant dense<0.000000e+00> : vector<48xf32>
    %143 = vector.multi_reduction <add>, %142, %cst_45 [1] : vector<48x32xf32> to vector<48xf32>
    %144 = vector.shape_cast %143 : vector<48xf32> to vector<48x1xf32>
    %cst_46 = arith.constant 3.200000e+01 : f32
    %145 = vector.broadcast %cst_46 : f32 to vector<48x1xf32>
    %146 = arith.divf %144, %145 : vector<48x1xf32>
    %cst_47 = arith.constant 9.99999974E-6 : f32
    %147 = vector.broadcast %cst_47 : f32 to vector<48x1xf32>
    %148 = arith.addf %146, %147 : vector<48x1xf32>
    %149 = math.rsqrt %148 : vector<48x1xf32>
    %150 = vector.broadcast %149 : vector<48x1xf32> to vector<48x32xf32>
    %151 = arith.mulf %141, %150 : vector<48x32xf32>
    %152 = vector.broadcast %133 : vector<1x32xf32> to vector<48x32xf32>
    %153 = arith.mulf %151, %152 : vector<48x32xf32>
    %154 = vector.broadcast %135 : vector<1x32xf32> to vector<48x32xf32>
    %155 = arith.addf %153, %154 : vector<48x32xf32>
    %c0_48 = arith.constant 0 : index
    %c32 = arith.constant 32 : index
    %c0_49 = arith.constant 0 : index
    %156 = vector.load %arg2[%c0_48, %c32, %c0_49] : memref<2x104x128xf32, #tpu.memory_space<vmem>>, vector<1x32x128xf32>
    %157 = vector.shape_cast %156 : vector<1x32x128xf32> to vector<32x128xf32>
    %cst_50 = arith.constant dense<0.000000e+00> : vector<48x128xf32>
    %158 = tpu.matmul %155, %157, %cst_50 {dimension_numbers = #tpu.dot_dimension_numbers<[1], [0], [0], [1], [0, 0, 1, 1], [], []>} : vector<48x32xf32>, vector<32x128xf32>, vector<48x128xf32> -> vector<48x128xf32>
    %c0_51 = arith.constant 0 : index
    %c102 = arith.constant 102 : index
    %c0_52 = arith.constant 0 : index
    %159 = vector.load %arg2[%c0_51, %c102, %c0_52] : memref<2x104x128xf32, #tpu.memory_space<vmem>>, vector<1x1x128xf32>
    %160 = vector.shape_cast %159 : vector<1x1x128xf32> to vector<1x128xf32>
    %161 = vector.broadcast %160 : vector<1x128xf32> to vector<48x128xf32>
    %162 = arith.addf %158, %161 : vector<48x128xf32>
    %163 = arith.mulf %162, %162 : vector<48x128xf32>
    %164 = arith.mulf %162, %163 : vector<48x128xf32>
    %cst_53 = arith.constant 4.471500e-02 : f32
    %165 = vector.broadcast %cst_53 : f32 to vector<48x128xf32>
    %166 = arith.mulf %165, %164 : vector<48x128xf32>
    %167 = arith.addf %162, %166 : vector<48x128xf32>
    %cst_54 = arith.constant 0.797884583 : f32
    %168 = vector.broadcast %cst_54 : f32 to vector<48x128xf32>
    %169 = arith.mulf %168, %167 : vector<48x128xf32>
    %170 = math.tanh %169 : vector<48x128xf32>
    %cst_55 = arith.constant 1.000000e+00 : f32
    %171 = vector.broadcast %cst_55 : f32 to vector<48x128xf32>
    %172 = arith.addf %171, %170 : vector<48x128xf32>
    %cst_56 = arith.constant 5.000000e-01 : f32
    %173 = vector.broadcast %cst_56 : f32 to vector<48x128xf32>
    %174 = arith.mulf %173, %172 : vector<48x128xf32>
    %175 = arith.mulf %162, %174 : vector<48x128xf32>
    %c0_57 = arith.constant 0 : index
    %c64 = arith.constant 64 : index
    %c0_58 = arith.constant 0 : index
    %176 = vector.load %arg2[%c0_57, %c64, %c0_58] : memref<2x104x128xf32, #tpu.memory_space<vmem>>, vector<1x32x128xf32>
    %177 = vector.shape_cast %176 : vector<1x32x128xf32> to vector<32x128xf32>
    %cst_59 = arith.constant dense<0.000000e+00> : vector<48x32xf32>
    %178 = tpu.matmul %175, %177, %cst_59 {dimension_numbers = #tpu.dot_dimension_numbers<[1], [1], [0], [0], [0, 0, 1, 0], [], []>} : vector<48x128xf32>, vector<32x128xf32>, vector<48x32xf32> -> vector<48x32xf32>
    %179 = arith.addf %131, %178 : vector<48x32xf32>
    %c0_60 = arith.constant 0 : index
    %c103 = arith.constant 103 : index
    %c0_61 = arith.constant 0 : index
    %180 = vector.load %arg2[%c0_60, %c103, %c0_61] : memref<2x104x128xf32, #tpu.memory_space<vmem>>, vector<1x1x32xf32>
    %181 = vector.shape_cast %180 : vector<1x1x32xf32> to vector<1x32xf32>
    %182 = vector.broadcast %181 : vector<1x32xf32> to vector<48x32xf32>
    %183 = arith.addf %179, %182 : vector<48x32xf32>
    %c1 = arith.constant 1 : index
    %c96_62 = arith.constant 96 : index
    %c0_63 = arith.constant 0 : index
    %184 = vector.load %arg2[%c1, %c96_62, %c0_63] : memref<2x104x128xf32, #tpu.memory_space<vmem>>, vector<1x1x32xf32>
    %185 = vector.shape_cast %184 : vector<1x1x32xf32> to vector<1x32xf32>
    %c1_64 = arith.constant 1 : index
    %c97_65 = arith.constant 97 : index
    %c0_66 = arith.constant 0 : index
    %186 = vector.load %arg2[%c1_64, %c97_65, %c0_66] : memref<2x104x128xf32, #tpu.memory_space<vmem>>, vector<1x1x32xf32>
    %187 = vector.shape_cast %186 : vector<1x1x32xf32> to vector<1x32xf32>
    %cst_67 = arith.constant dense<0.000000e+00> : vector<48xf32>
    %188 = vector.multi_reduction <add>, %183, %cst_67 [1] : vector<48x32xf32> to vector<48xf32>
    %189 = vector.shape_cast %188 : vector<48xf32> to vector<48x1xf32>
    %cst_68 = arith.constant 3.200000e+01 : f32
    %190 = vector.broadcast %cst_68 : f32 to vector<48x1xf32>
    %191 = arith.divf %189, %190 : vector<48x1xf32>
    %192 = vector.broadcast %191 : vector<48x1xf32> to vector<48x32xf32>
    %193 = arith.subf %183, %192 : vector<48x32xf32>
    %194 = arith.mulf %193, %193 : vector<48x32xf32>
    %cst_69 = arith.constant dense<0.000000e+00> : vector<48xf32>
    %195 = vector.multi_reduction <add>, %194, %cst_69 [1] : vector<48x32xf32> to vector<48xf32>
    %196 = vector.shape_cast %195 : vector<48xf32> to vector<48x1xf32>
    %cst_70 = arith.constant 3.200000e+01 : f32
    %197 = vector.broadcast %cst_70 : f32 to vector<48x1xf32>
    %198 = arith.divf %196, %197 : vector<48x1xf32>
    %cst_71 = arith.constant 9.99999974E-6 : f32
    %199 = vector.broadcast %cst_71 : f32 to vector<48x1xf32>
    %200 = arith.addf %198, %199 : vector<48x1xf32>
    %201 = math.rsqrt %200 : vector<48x1xf32>
    %202 = vector.broadcast %201 : vector<48x1xf32> to vector<48x32xf32>
    %203 = arith.mulf %193, %202 : vector<48x32xf32>
    %204 = vector.broadcast %185 : vector<1x32xf32> to vector<48x32xf32>
    %205 = arith.mulf %203, %204 : vector<48x32xf32>
    %206 = vector.broadcast %187 : vector<1x32xf32> to vector<48x32xf32>
    %207 = arith.addf %205, %206 : vector<48x32xf32>
    %c1_72 = arith.constant 1 : index
    %c0_73 = arith.constant 0 : index
    %c0_74 = arith.constant 0 : index
    %208 = vector.load %arg2[%c1_72, %c0_73, %c0_74] : memref<2x104x128xf32, #tpu.memory_space<vmem>>, vector<1x32x128xf32>
    %209 = vector.shape_cast %208 : vector<1x32x128xf32> to vector<32x128xf32>
    %cst_75 = arith.constant dense<0.000000e+00> : vector<48x128xf32>
    %210 = tpu.matmul %207, %209, %cst_75 {dimension_numbers = #tpu.dot_dimension_numbers<[1], [0], [0], [1], [0, 0, 1, 1], [], []>} : vector<48x32xf32>, vector<32x128xf32>, vector<48x128xf32> -> vector<48x128xf32>
    %c1_76 = arith.constant 1 : index
    %c98_77 = arith.constant 98 : index
    %c0_78 = arith.constant 0 : index
    %211 = vector.load %arg2[%c1_76, %c98_77, %c0_78] : memref<2x104x128xf32, #tpu.memory_space<vmem>>, vector<1x1x128xf32>
    %212 = vector.shape_cast %211 : vector<1x1x128xf32> to vector<1x128xf32>
    %213 = vector.broadcast %212 : vector<1x128xf32> to vector<48x128xf32>
    %214 = arith.addf %210, %213 : vector<48x128xf32>
    %215 = vector.extract_strided_slice %214 {offsets = [0, 0], sizes = [48, 32], strides = [1, 1]} : vector<48x128xf32> to vector<48x32xf32>
    %216 = vector.extract_strided_slice %214 {offsets = [0, 32], sizes = [48, 32], strides = [1, 1]} : vector<48x128xf32> to vector<48x32xf32>
    %cst_79 = arith.constant 0.000000e+00 : f32
    %217 = vector.broadcast %cst_79 : f32 to vector<48x32xf32>
    %218 = vector.broadcast %13 : vector<1x32xf32> to vector<48x32xf32>
    %219 = arith.mulf %216, %218 : vector<48x32xf32>
    %cst_80 = arith.constant dense<0.000000e+00> : vector<48x48xf32>
    %220 = tpu.matmul %215, %219, %cst_80 {dimension_numbers = #tpu.dot_dimension_numbers<[1], [1], [0], [0], [0, 0, 1, 0], [], []>} : vector<48x32xf32>, vector<48x32xf32>, vector<48x48xf32> -> vector<48x48xf32>
    %cst_81 = arith.constant 2.500000e-01 : f32
    %221 = vector.broadcast %cst_81 : f32 to vector<48x48xf32>
    %222 = arith.mulf %220, %221 : vector<48x48xf32>
    %223 = arith.addf %222, %54 : vector<48x48xf32>
    %cst_82 = arith.constant dense<0xFF800000> : vector<48xf32>
    %224 = vector.multi_reduction <maximumf>, %223, %cst_82 [1] : vector<48x48xf32> to vector<48xf32>
    %225 = vector.shape_cast %224 : vector<48xf32> to vector<48x1xf32>
    %226 = vector.broadcast %225 : vector<48x1xf32> to vector<48x48xf32>
    %227 = arith.subf %223, %226 : vector<48x48xf32>
    %228 = math.exp %227 : vector<48x48xf32>
    %cst_83 = arith.constant dense<0.000000e+00> : vector<48xf32>
    %229 = vector.multi_reduction <add>, %228, %cst_83 [1] : vector<48x48xf32> to vector<48xf32>
    %230 = vector.shape_cast %229 : vector<48xf32> to vector<48x1xf32>
    %231 = tpu.reciprocal %230 {approx = true} : vector<48x1xf32> -> vector<48x1xf32>
    %232 = vector.broadcast %231 : vector<48x1xf32> to vector<48x48xf32>
    %233 = arith.mulf %228, %232 : vector<48x48xf32>
    %234 = vector.extract_strided_slice %214 {offsets = [0, 64], sizes = [48, 32], strides = [1, 1]} : vector<48x128xf32> to vector<48x32xf32>
    %cst_84 = arith.constant dense<0.000000e+00> : vector<48x32xf32>
    %235 = tpu.matmul %233, %234, %cst_84 {dimension_numbers = #tpu.dot_dimension_numbers<[1], [0], [0], [1], [0, 0, 1, 1], [], []>} : vector<48x48xf32>, vector<48x32xf32>, vector<48x32xf32> -> vector<48x32xf32>
    %236 = arith.addf %217, %235 : vector<48x32xf32>
    %237 = vector.broadcast %20 : vector<1x32xf32> to vector<48x32xf32>
    %238 = arith.mulf %216, %237 : vector<48x32xf32>
    %cst_85 = arith.constant dense<0.000000e+00> : vector<48x48xf32>
    %239 = tpu.matmul %215, %238, %cst_85 {dimension_numbers = #tpu.dot_dimension_numbers<[1], [1], [0], [0], [0, 0, 1, 0], [], []>} : vector<48x32xf32>, vector<48x32xf32>, vector<48x48xf32> -> vector<48x48xf32>
    %cst_86 = arith.constant 2.500000e-01 : f32
    %240 = vector.broadcast %cst_86 : f32 to vector<48x48xf32>
    %241 = arith.mulf %239, %240 : vector<48x48xf32>
    %242 = arith.addf %241, %54 : vector<48x48xf32>
    %cst_87 = arith.constant dense<0xFF800000> : vector<48xf32>
    %243 = vector.multi_reduction <maximumf>, %242, %cst_87 [1] : vector<48x48xf32> to vector<48xf32>
    %244 = vector.shape_cast %243 : vector<48xf32> to vector<48x1xf32>
    %245 = vector.broadcast %244 : vector<48x1xf32> to vector<48x48xf32>
    %246 = arith.subf %242, %245 : vector<48x48xf32>
    %247 = math.exp %246 : vector<48x48xf32>
    %cst_88 = arith.constant dense<0.000000e+00> : vector<48xf32>
    %248 = vector.multi_reduction <add>, %247, %cst_88 [1] : vector<48x48xf32> to vector<48xf32>
    %249 = vector.shape_cast %248 : vector<48xf32> to vector<48x1xf32>
    %250 = tpu.reciprocal %249 {approx = true} : vector<48x1xf32> -> vector<48x1xf32>
    %251 = vector.broadcast %250 : vector<48x1xf32> to vector<48x48xf32>
    %252 = arith.mulf %247, %251 : vector<48x48xf32>
    %253 = vector.extract_strided_slice %214 {offsets = [0, 96], sizes = [48, 32], strides = [1, 1]} : vector<48x128xf32> to vector<48x32xf32>
    %cst_89 = arith.constant dense<0.000000e+00> : vector<48x32xf32>
    %254 = tpu.matmul %252, %253, %cst_89 {dimension_numbers = #tpu.dot_dimension_numbers<[1], [0], [0], [1], [0, 0, 1, 1], [], []>} : vector<48x48xf32>, vector<48x32xf32>, vector<48x32xf32> -> vector<48x32xf32>
    %255 = arith.addf %236, %254 : vector<48x32xf32>
    %256 = arith.addf %183, %255 : vector<48x32xf32>
    %c1_90 = arith.constant 1 : index
    %c99_91 = arith.constant 99 : index
    %c0_92 = arith.constant 0 : index
    %257 = vector.load %arg2[%c1_90, %c99_91, %c0_92] : memref<2x104x128xf32, #tpu.memory_space<vmem>>, vector<1x1x32xf32>
    %258 = vector.shape_cast %257 : vector<1x1x32xf32> to vector<1x32xf32>
    %259 = vector.broadcast %258 : vector<1x32xf32> to vector<48x32xf32>
    %260 = arith.addf %256, %259 : vector<48x32xf32>
    %c1_93 = arith.constant 1 : index
    %c100_94 = arith.constant 100 : index
    %c0_95 = arith.constant 0 : index
    %261 = vector.load %arg2[%c1_93, %c100_94, %c0_95] : memref<2x104x128xf32, #tpu.memory_space<vmem>>, vector<1x1x32xf32>
    %262 = vector.shape_cast %261 : vector<1x1x32xf32> to vector<1x32xf32>
    %c1_96 = arith.constant 1 : index
    %c101_97 = arith.constant 101 : index
    %c0_98 = arith.constant 0 : index
    %263 = vector.load %arg2[%c1_96, %c101_97, %c0_98] : memref<2x104x128xf32, #tpu.memory_space<vmem>>, vector<1x1x32xf32>
    %264 = vector.shape_cast %263 : vector<1x1x32xf32> to vector<1x32xf32>
    %cst_99 = arith.constant dense<0.000000e+00> : vector<48xf32>
    %265 = vector.multi_reduction <add>, %260, %cst_99 [1] : vector<48x32xf32> to vector<48xf32>
    %266 = vector.shape_cast %265 : vector<48xf32> to vector<48x1xf32>
    %cst_100 = arith.constant 3.200000e+01 : f32
    %267 = vector.broadcast %cst_100 : f32 to vector<48x1xf32>
    %268 = arith.divf %266, %267 : vector<48x1xf32>
    %269 = vector.broadcast %268 : vector<48x1xf32> to vector<48x32xf32>
    %270 = arith.subf %260, %269 : vector<48x32xf32>
    %271 = arith.mulf %270, %270 : vector<48x32xf32>
    %cst_101 = arith.constant dense<0.000000e+00> : vector<48xf32>
    %272 = vector.multi_reduction <add>, %271, %cst_101 [1] : vector<48x32xf32> to vector<48xf32>
    %273 = vector.shape_cast %272 : vector<48xf32> to vector<48x1xf32>
    %cst_102 = arith.constant 3.200000e+01 : f32
    %274 = vector.broadcast %cst_102 : f32 to vector<48x1xf32>
    %275 = arith.divf %273, %274 : vector<48x1xf32>
    %cst_103 = arith.constant 9.99999974E-6 : f32
    %276 = vector.broadcast %cst_103 : f32 to vector<48x1xf32>
    %277 = arith.addf %275, %276 : vector<48x1xf32>
    %278 = math.rsqrt %277 : vector<48x1xf32>
    %279 = vector.broadcast %278 : vector<48x1xf32> to vector<48x32xf32>
    %280 = arith.mulf %270, %279 : vector<48x32xf32>
    %281 = vector.broadcast %262 : vector<1x32xf32> to vector<48x32xf32>
    %282 = arith.mulf %280, %281 : vector<48x32xf32>
    %283 = vector.broadcast %264 : vector<1x32xf32> to vector<48x32xf32>
    %284 = arith.addf %282, %283 : vector<48x32xf32>
    %c1_104 = arith.constant 1 : index
    %c32_105 = arith.constant 32 : index
    %c0_106 = arith.constant 0 : index
    %285 = vector.load %arg2[%c1_104, %c32_105, %c0_106] : memref<2x104x128xf32, #tpu.memory_space<vmem>>, vector<1x32x128xf32>
    %286 = vector.shape_cast %285 : vector<1x32x128xf32> to vector<32x128xf32>
    %cst_107 = arith.constant dense<0.000000e+00> : vector<48x128xf32>
    %287 = tpu.matmul %284, %286, %cst_107 {dimension_numbers = #tpu.dot_dimension_numbers<[1], [0], [0], [1], [0, 0, 1, 1], [], []>} : vector<48x32xf32>, vector<32x128xf32>, vector<48x128xf32> -> vector<48x128xf32>
    %c1_108 = arith.constant 1 : index
    %c102_109 = arith.constant 102 : index
    %c0_110 = arith.constant 0 : index
    %288 = vector.load %arg2[%c1_108, %c102_109, %c0_110] : memref<2x104x128xf32, #tpu.memory_space<vmem>>, vector<1x1x128xf32>
    %289 = vector.shape_cast %288 : vector<1x1x128xf32> to vector<1x128xf32>
    %290 = vector.broadcast %289 : vector<1x128xf32> to vector<48x128xf32>
    %291 = arith.addf %287, %290 : vector<48x128xf32>
    %292 = arith.mulf %291, %291 : vector<48x128xf32>
    %293 = arith.mulf %291, %292 : vector<48x128xf32>
    %cst_111 = arith.constant 4.471500e-02 : f32
    %294 = vector.broadcast %cst_111 : f32 to vector<48x128xf32>
    %295 = arith.mulf %294, %293 : vector<48x128xf32>
    %296 = arith.addf %291, %295 : vector<48x128xf32>
    %cst_112 = arith.constant 0.797884583 : f32
    %297 = vector.broadcast %cst_112 : f32 to vector<48x128xf32>
    %298 = arith.mulf %297, %296 : vector<48x128xf32>
    %299 = math.tanh %298 : vector<48x128xf32>
    %cst_113 = arith.constant 1.000000e+00 : f32
    %300 = vector.broadcast %cst_113 : f32 to vector<48x128xf32>
    %301 = arith.addf %300, %299 : vector<48x128xf32>
    %cst_114 = arith.constant 5.000000e-01 : f32
    %302 = vector.broadcast %cst_114 : f32 to vector<48x128xf32>
    %303 = arith.mulf %302, %301 : vector<48x128xf32>
    %304 = arith.mulf %291, %303 : vector<48x128xf32>
    %c1_115 = arith.constant 1 : index
    %c64_116 = arith.constant 64 : index
    %c0_117 = arith.constant 0 : index
    %305 = vector.load %arg2[%c1_115, %c64_116, %c0_117] : memref<2x104x128xf32, #tpu.memory_space<vmem>>, vector<1x32x128xf32>
    %306 = vector.shape_cast %305 : vector<1x32x128xf32> to vector<32x128xf32>
    %cst_118 = arith.constant dense<0.000000e+00> : vector<48x32xf32>
    %307 = tpu.matmul %304, %306, %cst_118 {dimension_numbers = #tpu.dot_dimension_numbers<[1], [1], [0], [0], [0, 0, 1, 0], [], []>} : vector<48x128xf32>, vector<32x128xf32>, vector<48x32xf32> -> vector<48x32xf32>
    %308 = arith.addf %260, %307 : vector<48x32xf32>
    %c1_119 = arith.constant 1 : index
    %c103_120 = arith.constant 103 : index
    %c0_121 = arith.constant 0 : index
    %309 = vector.load %arg2[%c1_119, %c103_120, %c0_121] : memref<2x104x128xf32, #tpu.memory_space<vmem>>, vector<1x1x32xf32>
    %310 = vector.shape_cast %309 : vector<1x1x32xf32> to vector<1x32xf32>
    %311 = vector.broadcast %310 : vector<1x32xf32> to vector<48x32xf32>
    %312 = arith.addf %308, %311 : vector<48x32xf32>
    %cst_122 = arith.constant 0.000000e+00 : f32
    %313 = vector.broadcast %cst_122 : f32 to vector<1x1xf32>
    %cst_123 = arith.constant 0.000000e+00 : f32
    %314 = vector.broadcast %cst_123 : f32 to vector<1x1xf32>
    %315 = vector.extract_strided_slice %312 {offsets = [0, 0], sizes = [1, 32], strides = [1, 1]} : vector<48x32xf32> to vector<1x32xf32>
    %316 = vector.extract_strided_slice %312 {offsets = [1, 0], sizes = [1, 32], strides = [1, 1]} : vector<48x32xf32> to vector<1x32xf32>
    %317 = vector.extract_strided_slice %312 {offsets = [2, 0], sizes = [1, 32], strides = [1, 1]} : vector<48x32xf32> to vector<1x32xf32>
    %318 = arith.mulf %315, %316 : vector<1x32xf32>
    %cst_124 = arith.constant dense<0.000000e+00> : vector<1xf32>
    %319 = vector.multi_reduction <add>, %318, %cst_124 [1] : vector<1x32xf32> to vector<1xf32>
    %320 = vector.shape_cast %319 : vector<1xf32> to vector<1x1xf32>
    %321 = arith.mulf %315, %315 : vector<1x32xf32>
    %cst_125 = arith.constant dense<0.000000e+00> : vector<1xf32>
    %322 = vector.multi_reduction <add>, %321, %cst_125 [1] : vector<1x32xf32> to vector<1xf32>
    %323 = vector.shape_cast %322 : vector<1xf32> to vector<1x1xf32>
    %324 = arith.mulf %316, %316 : vector<1x32xf32>
    %cst_126 = arith.constant dense<0.000000e+00> : vector<1xf32>
    %325 = vector.multi_reduction <add>, %324, %cst_126 [1] : vector<1x32xf32> to vector<1xf32>
    %326 = vector.shape_cast %325 : vector<1xf32> to vector<1x1xf32>
    %cst_127 = arith.constant 1.000000e-16 : f32
    %327 = vector.broadcast %cst_127 : f32 to vector<1x1xf32>
    %328 = arith.maximumf %323, %327 : vector<1x1xf32>
    %329 = math.rsqrt %328 : vector<1x1xf32>
    %330 = arith.mulf %320, %329 : vector<1x1xf32>
    %cst_128 = arith.constant 1.000000e-16 : f32
    %331 = vector.broadcast %cst_128 : f32 to vector<1x1xf32>
    %332 = arith.maximumf %326, %331 : vector<1x1xf32>
    %333 = math.rsqrt %332 : vector<1x1xf32>
    %334 = arith.mulf %330, %333 : vector<1x1xf32>
    %335 = arith.addf %313, %334 : vector<1x1xf32>
    %336 = arith.mulf %315, %317 : vector<1x32xf32>
    %cst_129 = arith.constant dense<0.000000e+00> : vector<1xf32>
    %337 = vector.multi_reduction <add>, %336, %cst_129 [1] : vector<1x32xf32> to vector<1xf32>
    %338 = vector.shape_cast %337 : vector<1xf32> to vector<1x1xf32>
    %339 = arith.mulf %315, %315 : vector<1x32xf32>
    %cst_130 = arith.constant dense<0.000000e+00> : vector<1xf32>
    %340 = vector.multi_reduction <add>, %339, %cst_130 [1] : vector<1x32xf32> to vector<1xf32>
    %341 = vector.shape_cast %340 : vector<1xf32> to vector<1x1xf32>
    %342 = arith.mulf %317, %317 : vector<1x32xf32>
    %cst_131 = arith.constant dense<0.000000e+00> : vector<1xf32>
    %343 = vector.multi_reduction <add>, %342, %cst_131 [1] : vector<1x32xf32> to vector<1xf32>
    %344 = vector.shape_cast %343 : vector<1xf32> to vector<1x1xf32>
    %cst_132 = arith.constant 1.000000e-16 : f32
    %345 = vector.broadcast %cst_132 : f32 to vector<1x1xf32>
    %346 = arith.maximumf %341, %345 : vector<1x1xf32>
    %347 = math.rsqrt %346 : vector<1x1xf32>
    %348 = arith.mulf %338, %347 : vector<1x1xf32>
    %cst_133 = arith.constant 1.000000e-16 : f32
    %349 = vector.broadcast %cst_133 : f32 to vector<1x1xf32>
    %350 = arith.maximumf %344, %349 : vector<1x1xf32>
    %351 = math.rsqrt %350 : vector<1x1xf32>
    %352 = arith.mulf %348, %351 : vector<1x1xf32>
    %353 = arith.addf %314, %352 : vector<1x1xf32>
    %354 = tpu.concatenate %315, %316, %317 in 1 : vector<1x32xf32>, vector<1x32xf32>, vector<1x32xf32> -> vector<1x96xf32>
    %355 = vector.extract_strided_slice %312 {offsets = [24, 0], sizes = [1, 32], strides = [1, 1]} : vector<48x32xf32> to vector<1x32xf32>
    %356 = vector.extract_strided_slice %312 {offsets = [25, 0], sizes = [1, 32], strides = [1, 1]} : vector<48x32xf32> to vector<1x32xf32>
    %357 = vector.extract_strided_slice %312 {offsets = [26, 0], sizes = [1, 32], strides = [1, 1]} : vector<48x32xf32> to vector<1x32xf32>
    %358 = arith.mulf %355, %356 : vector<1x32xf32>
    %cst_134 = arith.constant dense<0.000000e+00> : vector<1xf32>
    %359 = vector.multi_reduction <add>, %358, %cst_134 [1] : vector<1x32xf32> to vector<1xf32>
    %360 = vector.shape_cast %359 : vector<1xf32> to vector<1x1xf32>
    %361 = arith.mulf %355, %355 : vector<1x32xf32>
    %cst_135 = arith.constant dense<0.000000e+00> : vector<1xf32>
    %362 = vector.multi_reduction <add>, %361, %cst_135 [1] : vector<1x32xf32> to vector<1xf32>
    %363 = vector.shape_cast %362 : vector<1xf32> to vector<1x1xf32>
    %364 = arith.mulf %356, %356 : vector<1x32xf32>
    %cst_136 = arith.constant dense<0.000000e+00> : vector<1xf32>
    %365 = vector.multi_reduction <add>, %364, %cst_136 [1] : vector<1x32xf32> to vector<1xf32>
    %366 = vector.shape_cast %365 : vector<1xf32> to vector<1x1xf32>
    %cst_137 = arith.constant 1.000000e-16 : f32
    %367 = vector.broadcast %cst_137 : f32 to vector<1x1xf32>
    %368 = arith.maximumf %363, %367 : vector<1x1xf32>
    %369 = math.rsqrt %368 : vector<1x1xf32>
    %370 = arith.mulf %360, %369 : vector<1x1xf32>
    %cst_138 = arith.constant 1.000000e-16 : f32
    %371 = vector.broadcast %cst_138 : f32 to vector<1x1xf32>
    %372 = arith.maximumf %366, %371 : vector<1x1xf32>
    %373 = math.rsqrt %372 : vector<1x1xf32>
    %374 = arith.mulf %370, %373 : vector<1x1xf32>
    %375 = arith.addf %335, %374 : vector<1x1xf32>
    %376 = arith.mulf %355, %357 : vector<1x32xf32>
    %cst_139 = arith.constant dense<0.000000e+00> : vector<1xf32>
    %377 = vector.multi_reduction <add>, %376, %cst_139 [1] : vector<1x32xf32> to vector<1xf32>
    %378 = vector.shape_cast %377 : vector<1xf32> to vector<1x1xf32>
    %379 = arith.mulf %355, %355 : vector<1x32xf32>
    %cst_140 = arith.constant dense<0.000000e+00> : vector<1xf32>
    %380 = vector.multi_reduction <add>, %379, %cst_140 [1] : vector<1x32xf32> to vector<1xf32>
    %381 = vector.shape_cast %380 : vector<1xf32> to vector<1x1xf32>
    %382 = arith.mulf %357, %357 : vector<1x32xf32>
    %cst_141 = arith.constant dense<0.000000e+00> : vector<1xf32>
    %383 = vector.multi_reduction <add>, %382, %cst_141 [1] : vector<1x32xf32> to vector<1xf32>
    %384 = vector.shape_cast %383 : vector<1xf32> to vector<1x1xf32>
    %cst_142 = arith.constant 1.000000e-16 : f32
    %385 = vector.broadcast %cst_142 : f32 to vector<1x1xf32>
    %386 = arith.maximumf %381, %385 : vector<1x1xf32>
    %387 = math.rsqrt %386 : vector<1x1xf32>
    %388 = arith.mulf %378, %387 : vector<1x1xf32>
    %cst_143 = arith.constant 1.000000e-16 : f32
    %389 = vector.broadcast %cst_143 : f32 to vector<1x1xf32>
    %390 = arith.maximumf %384, %389 : vector<1x1xf32>
    %391 = math.rsqrt %390 : vector<1x1xf32>
    %392 = arith.mulf %388, %391 : vector<1x1xf32>
    %393 = arith.addf %353, %392 : vector<1x1xf32>
    %394 = tpu.concatenate %355, %356, %357 in 1 : vector<1x32xf32>, vector<1x32xf32>, vector<1x32xf32> -> vector<1x96xf32>
    %395 = tpu.concatenate %354, %394 in 0 : vector<1x96xf32>, vector<1x96xf32> -> vector<2x96xf32>
    %cst_144 = arith.constant 5.000000e-01 : f32
    %396 = vector.broadcast %cst_144 : f32 to vector<1x1xf32>
    %397 = arith.mulf %375, %396 : vector<1x1xf32>
    %cst_145 = arith.constant 5.000000e-01 : f32
    %398 = vector.broadcast %cst_145 : f32 to vector<1x1xf32>
    %399 = arith.mulf %393, %398 : vector<1x1xf32>
    %c0_146 = arith.constant 0 : index
    %c0_147 = arith.constant 0 : index
    %400 = vector.load %arg3[%c0_146, %c0_147] : memref<104x128xf32, #tpu.memory_space<vmem>>, vector<96x128xf32>
    %cst_148 = arith.constant dense<0.000000e+00> : vector<2x128xf32>
    %401 = tpu.matmul %395, %400, %cst_148 {dimension_numbers = #tpu.dot_dimension_numbers<[1], [0], [0], [1], [0, 0, 1, 1], [], []>} : vector<2x96xf32>, vector<96x128xf32>, vector<2x128xf32> -> vector<2x128xf32>
    %c96_149 = arith.constant 96 : index
    %c0_150 = arith.constant 0 : index
    %402 = vector.load %arg3[%c96_149, %c0_150] : memref<104x128xf32, #tpu.memory_space<vmem>>, vector<1x128xf32>
    %403 = vector.broadcast %402 : vector<1x128xf32> to vector<2x128xf32>
    %404 = arith.addf %401, %403 : vector<2x128xf32>
    %405 = tpu.iota {dimensions = array<i32: 1>} : vector<1x128xi32>
    %c0_i32_151 = arith.constant 0 : i32
    %406 = vector.broadcast %c0_i32_151 : i32 to vector<1x128xi32>
    %407 = arith.cmpi eq, %405, %406 : vector<1x128xi32>
    %cst_152 = arith.constant 0.000000e+00 : f32
    %408 = vector.shape_cast %397 : vector<1x1xf32> to vector<1x1xf32>
    %409 = vector.broadcast %408 : vector<1x1xf32> to vector<1x128xf32>
    %410 = vector.broadcast %cst_152 : f32 to vector<1x128xf32>
    %411 = arith.select %407, %409, %410 : vector<1x128xi1>, vector<1x128xf32>
    %c1_i32 = arith.constant 1 : i32
    %412 = vector.broadcast %c1_i32 : i32 to vector<1x128xi32>
    %413 = arith.cmpi eq, %405, %412 : vector<1x128xi32>
    %cst_153 = arith.constant 0.000000e+00 : f32
    %414 = vector.shape_cast %399 : vector<1x1xf32> to vector<1x1xf32>
    %415 = vector.broadcast %414 : vector<1x1xf32> to vector<1x128xf32>
    %416 = vector.broadcast %cst_153 : f32 to vector<1x128xf32>
    %417 = arith.select %413, %415, %416 : vector<1x128xi1>, vector<1x128xf32>
    %418 = arith.addf %411, %417 : vector<1x128xf32>
    %cst_154 = arith.constant 0.000000e+00 : f32
    %419 = vector.broadcast %cst_154 : f32 to vector<5x128xf32>
    %420 = tpu.concatenate %404, %418, %419 in 0 : vector<2x128xf32>, vector<1x128xf32>, vector<5x128xf32> -> vector<8x128xf32>
    %c0_155 = arith.constant 0 : index
    %c0_156 = arith.constant 0 : index
    %421 = vector.load %arg4[%c0_155, %c0_156] : memref<8x128xf32, #tpu.memory_space<vmem>>, vector<8x128xf32>
    tpu.vector_store %arg4[%c0_155, %c0_156], %420 {strides = array<i32>} : memref<8x128xf32, #tpu.memory_space<vmem>>, vector<8x128xf32>,
    return
  }
}

</mosaic_0001>

<bundles_post_ra>
// kernel: corrupt_distill_vit_forward.1
= control target key start
LH: loop header
LB: loop body
LE: loop exit
PB: predicated region body
PF: predicated region fallthrough
CT: control target
= control target key end

     0   :  { %vm32_vm0 = vcmask 392192   ;;  %vm260_vm1 = vcmask 261120   ;;  %s4304_s25 = smov 32   ;;  %s4305_s6 = smov 96   ;;  %vm4309_vm11 = vmmov 0   ;;  %vm2919_vm12 = vcmask 253952   ;;  %s5322_s1 = inlined_call_operand.vmem [shape: f32[72,32], index: 1, kind: input, shape index: {}]   ;;  %s5323_s0 = inlined_call_operand.vmem [shape: f32[48,48], index: 0, kind: input, shape index: {}]   ;;  %s5324_s2 = inlined_call_operand.vmem [shape: f32[2,104,128], index: 2, kind: input, shape index: {}]   ;;  %s5325_s3 = inlined_call_operand.vmem [shape: f32[104,128], index: 3, kind: input, shape index: {}]   ;;  %s5326_s4 = inlined_call_operand.vmem [shape: f32[8,128], index: 4, kind: output, shape index: {}]  }
   0x1   :  { %v17_v0 = vld [vmem:[%s5322_s1] sm:$0xff]  ;;  %v18_v1 = vld [vmem:[%s5322_s1 + $0x8] sm:$0xff]  ;;  %v19_v2 = vld [vmem:[%s5322_s1 + $0x10] sm:$0xff]  ;;  %s4307_s7 = smov 64   ;;  %vm2947_vm13 = vcmask 256002   ;;  %vm2927_vm14 = vcmask 254977  }
   0x2   :  { %v3783_v3 = vpack.c.bf16 %v18_v1, %v17_v0  ;;  %v20_v4 = vld [vmem:[%s5322_s1 + $0x18] sm:$0xff]  ;;  %v21_v6 = vld [vmem:[%s5322_s1 + $0x20] sm:$0xff]  ;;  %v22_v7 = vld [vmem:[%s5322_s1 + $0x28] sm:$0xff]  ;;  %vm2966_vm15 = vcmask 523264  }
   0x3   :  { %v3787_v5 = vpack.c.bf16 %v20_v4, %v19_v2  ;;  %v26_v8 = vld [vmem:[%s5323_s0] sm:$0xff]  ;;  %v3791_v9 = vpack.c.bf16 %v22_v7, %v21_v6  ;;  %v27_v10 = vld [vmem:[%s5323_s0 + $0x8] sm:$0xff]  ;;  %v28_v11 = vld [vmem:[%s5323_s0 + $0x10] sm:$0xff] }
   0x4   :  { %3784 = vmatprep.subr.bf16.mxu0 %v3783_v3  ;;  %3477 = vmatprep.mubr.msk.f32.mxu0 %vm32_vm0, %v26_v8  ;;  %v29_v12 = vld [vmem:[%s5323_s0 + $0x18] sm:$0xff]  ;;  %v30_v13 = vld [vmem:[%s5323_s0 + $0x20] sm:$0xff]  ;;  %v31_v14 = vld [vmem:[%s5323_s0 + $0x28] sm:$0xff]  ;;  %v146_v8 = vlaneseq }
   0x5   :  { %3786 = vmatpush3.bf16.msra.mxu0 %v3783_v3  ;;  %v23_v15 = vld [vmem:[%s5322_s1 + $0x30] sm:$0xff]  ;;  %v24_v17 = vld [vmem:[%s5322_s1 + $0x38] sm:$0xff]  ;;  %v25_v20 = vld [vmem:[%s5322_s1 + $0x40] sm:$0xff] }
   0x6   :  { %3788 = vmatprep.subr.bf16.mxu0 %v3787_v5  ;;  %v360_v2 = vld [vmem:[%s5324_s2] sm:$0xff]  ;;  %v361_v3 = vld [vmem:[%s5324_s2 + $0x8] sm:$0xff]  ;;  %v363_v6 = vld [vmem:[%s5324_s2 + $0x18] sm:$0xff] }
   0x7   :  { %v3795_v4 = vpack.c.bf16 %v361_v3, %v360_v2  ;;  %vm4541_vm6 = vmpackc.low %vm260_vm1, %vm260_vm1 }
   0x9   :  { %3790 = vmatpush3.bf16.msra.mxu0 %v3787_v5  ;;  %v362_v5 = vld [vmem:[%s5324_s2 + $0x10] sm:$0xff]  ;;  %3796 = vmatprep.subr.bf16.mxu1 %v3795_v4 }
   0xa   :  { %3792 = vmatprep.subr.bf16.mxu0 %v3791_v9  ;;  %v3799_v7 = vpack.c.bf16 %v363_v6, %v362_v5  ;;  %3798 = vmatpush3.bf16.msra.mxu1 %v3795_v4 }
   0xc   :  { %3800 = vmatprep.subr.bf16.mxu1 %v3799_v7 }
   0xd   :  { %3794 = vmatpush3.bf16.msra.mxu0 %v3791_v9  ;;  %v4459_v9 = vand.u32 127, %v146_v8 }
   0xe   :  { %3802 = vmatpush3.bf16.msra.mxu1 %v3799_v7 }
   0xf   :  { %vm149_vm2 = vcmp.lt.s32.totalorder %v4459_v9, 16  ;;  %vm153_vm3 = vcmp.ge.s32.totalorder %v4459_v9, 16  ;;  %vm154_vm4 = vcmp.lt.s32.totalorder %v4459_v9, 32  ;;  %vm183_vm7 = vcmp.lt.s32.totalorder %v4459_v9, 19 }
  0x10   :  { %3478 = vmatmul.mubr.msk.f32.vlgmr.msra.gmra.mrb[0].mxu0 %vm32_vm0, %v27_v10  ;;  %v4303_v10 = vmov 0.0   ;;  %vm155_vm5 = vmand %vm153_vm3, %vm154_vm4  ;;  %vm223_vm8 = vcmp.ge.s32.totalorder %v4459_v9, 24  ;;  %vm224_vm9 = vcmp.lt.s32.totalorder %v4459_v9, 43  ;;  %vm3122_vm3 = vcmp.eq.s32.totalorder %v4459_v9, 1 }
  0x11   :  { %3480 = vmatprep.mubr.msk.f32.mxu0 %vm32_vm0, %v28_v11  ;;  %v3148_v11 = vsel %vm149_vm2, 1.0, %v4303_v10  ;;  %vm225_vm10 = vmand %vm223_vm8, %vm224_vm9  ;;  %vm3041_vm2 = vcmask 785408   ;;  %vm3133_vm4 = vcmask 1041408  }
  0x14   :  { %3481 = vmatmul.mubr.msk.f32.gmra.mrb[2].mxu0 %vm32_vm0, %v29_v12  ;;  %v3149_v12 = vsel %vm155_vm5, 1.0, %v4303_v10  ;;  %vm3135_vm5 = vcmask 1042432  }
  0x15   :  { %3483 = vmatprep.mubr.msk.f32.mxu0 %vm32_vm0, %v30_v13 }
  0x18   :  { %3484 = vmatmul.mubr.msk.f32.gmra.mrb[4].mxu0 %vm32_vm0, %v31_v14 }
  0xe3   :  { %v3479_v16 = vpop.f32.mrb[0].mxu0 }
  0xe4   :  { %v117_v18 = vpop.f32.mrb[1].mxu0  ;;  %v4389_v21 = vadd.f32 %v3479_v16, %v24_v17 }
  0xe5   :  { %v4384_v19 = vadd.f32 %v117_v18, %v23_v15 }
  0xe6   :  { %v264_v29 = vsel %vm260_vm1, %v4389_v21, 0.0 }
  0xe7   :  { %v3482_v22 = vpop.f32.mrb[2].mxu0  ;;  %v261_v23 = vsel %vm260_vm1, %v4384_v19, 0.0 }
  0xe8   :  { %v127_v24 = vpop.f32.mrb[3].mxu0  ;;  %262 = vadd.xlane.f32.xlu0 %v261_v23  ;;  %v4393_v25 = vadd.f32 %v3482_v22, %v23_v15 }
  0xe9   :  { %v4395_v26 = vadd.f32 %v127_v24, %v25_v20 }
  0xea   :  { %v270_v33 = vsel %vm260_vm1, %v4393_v25, 0.0 }
  0xeb   :  { %v3485_v27 = vpop.f32.mrb[4].mxu0  ;;  %v267_v28 = vsel %vm260_vm1, %v4395_v26, 0.0 }
  0xec   :  { %v137_v30 = vpop.f32.mrb[5].mxu0  ;;  %268 = vadd.xlane.f32.xlu1 %v267_v28  ;;  %265 = vadd.xlane.f32.xlu0 %v264_v29  ;;  %v4401_v31 = vadd.f32 %v3485_v27, %v25_v20 }
  0xed   :  { %v4403_v32 = vadd.f32 %v137_v30, %v24_v17 }
  0xee   :  { %v276_v35 = vsel %vm260_vm1, %v4401_v31, 0.0 }
  0xef   :  { %v273_v34 = vsel %vm260_vm1, %v4403_v32, 0.0 }
  0xf0   :  { %271 = vadd.xlane.f32.xlu1 %v270_v33  ;;  %274 = vadd.xlane.f32.xlu0 %v273_v34 }
  0xf4   :  { %277 = vadd.xlane.f32.xlu1 %v276_v35 }
 0x175   :  { %v263_v36 = vpop.xlane.xlu0 %262 }
 0x176   :  { %v280_v37 = vmul.f32 0.03125, %v263_v36 }
 0x178   :  { %v4412_v38 = vsub.f32 %v4384_v19, %v280_v37 }
 0x179   :  { %v269_v39 = vpop.xlane.xlu1 %268  ;;  %v266_v40 = vpop.xlane.xlu0 %265 }
 0x17a   :  { %v282_v41 = vmul.f32 0.03125, %v269_v39  ;;  %v281_v42 = vmul.f32 0.03125, %v266_v40  ;;  %v292_v43 = vmul.f32 %v4412_v38, %v4412_v38  ;;  %v3150_v39 = vld [vmem:[%s5324_s2 + $0x60] ss:$0 sm:$0xff] }
 0x17c   :  { %v4417_v44 = vsub.f32 %v4395_v26, %v282_v41  ;;  %v4420_v45 = vsub.f32 %v4389_v21, %v281_v42  ;;  %v298_v46 = vsel %vm260_vm1, %v292_v43, 0.0  ;;  %v3151_v41 = vld [vmem:[%s5324_s2 + $0x61] ss:$0 sm:$0xff] }
 0x17d   :  { %v272_v47 = vpop.xlane.xlu1 %271  ;;  %299 = vadd.xlane.f32.xlu0 %v298_v46  ;;  %v275_v48 = vpop.xlane.xlu0 %274 }
 0x17e   :  { %v283_v49 = vmul.f32 0.03125, %v272_v47  ;;  %v284_v50 = vmul.f32 0.03125, %v275_v48  ;;  %v294_v51 = vmul.f32 %v4417_v44, %v4417_v44  ;;  %v293_v52 = vmul.f32 %v4420_v45, %v4420_v45 }
 0x180   :  { %v4428_v53 = vsub.f32 %v4393_v25, %v283_v49  ;;  %v4431_v54 = vsub.f32 %v4403_v32, %v284_v50  ;;  %v304_v55 = vsel %vm260_vm1, %v294_v51, 0.0  ;;  %v301_v56 = vsel %vm260_vm1, %v293_v52, 0.0 }
 0x181   :  { %v278_v57 = vpop.xlane.xlu1 %277  ;;  %305 = vadd.xlane.f32.xlu0 %v304_v55  ;;  %302 = vadd.xlane.f32.xlu1 %v301_v56 }
 0x182   :  { %v285_v58 = vmul.f32 0.03125, %v278_v57  ;;  %v295_v59 = vmul.f32 %v4428_v53, %v4428_v53  ;;  %v296_v60 = vmul.f32 %v4431_v54, %v4431_v54 }
 0x184   :  { %v4440_v61 = vsub.f32 %v4401_v31, %v285_v58  ;;  %v307_v62 = vsel %vm260_vm1, %v295_v59, 0.0  ;;  %v310_v63 = vsel %vm260_vm1, %v296_v60, 0.0 }
 0x185   :  { %308 = vadd.xlane.f32.xlu1 %v307_v62  ;;  %311 = vadd.xlane.f32.xlu0 %v310_v63 }
 0x186   :  { %v297_v0 = vmul.f32 %v4440_v61, %v4440_v61 }
 0x188   :  { %v313_v1 = vsel %vm260_vm1, %v297_v0, 0.0 }
 0x189   :  { %314 = vadd.xlane.f32.xlu1 %v313_v1 }
 0x19a   :  { %483 = vrot.lane.b32.xlu1 %v3148_v11, %s4304_s25 }
 0x19b   :  { %714 = vrot.lane.b32.xlu0 %v3149_v12, %s4304_s25 }
 0x20a   :  { %v300_v13 = vpop.xlane.xlu0 %299 }
 0x20b   :  { %v316_v14 = vmul.f32 0.03125, %v300_v13 }
 0x20d   :  { %v322_v15 = vadd.f32 1e-05, %v316_v14 }
 0x20e   :  { %v303_v16 = vpop.xlane.xlu1 %302  ;;  %v306_v17 = vpop.xlane.xlu0 %305 }
 0x20f   :  { %4123 = vrsqrt.f32 %v322_v15  ;;  %v317_v18 = vmul.f32 0.03125, %v303_v16  ;;  %v318_v20 = vmul.f32 0.03125, %v306_v17 }
 0x211   :  { %v323_v22 = vadd.f32 1e-05, %v317_v18  ;;  %v324_v23 = vadd.f32 1e-05, %v318_v20 }
 0x212   :  { %v309_v24 = vpop.xlane.xlu1 %308  ;;  %v312_v27 = vpop.xlane.xlu0 %311 }
 0x213   :  { %4125 = vrsqrt.f32 %v323_v22  ;;  %v319_v28 = vmul.f32 0.03125, %v309_v24  ;;  %v320_v29 = vmul.f32 0.03125, %v312_v27 }
 0x214   :  { %4127 = vrsqrt.f32 %v324_v23 }
 0x215   :  { %v325_v30 = vadd.f32 1e-05, %v319_v28  ;;  %v326_v33 = vadd.f32 1e-05, %v320_v29 }
 0x216   :  { %v315_v34 = vpop.xlane.xlu1 %314  ;;  %v4491_v3 = vpop.permute.xlu0 %714 }
 0x217   :  { %4129 = vrsqrt.f32 %v325_v30  ;;  %v321_v35 = vmul.f32 0.03125, %v315_v34 }
 0x218   :  { %4131 = vrsqrt.f32 %v326_v33 }
 0x219   :  { %v4124_v36 = vpop.eup %4123  ;;  %v327_v37 = vadd.f32 1e-05, %v321_v35 }
 0x21a   :  { %v334_v40 = vmul.f32 %v4124_v36, %v4412_v38  ;;  %v4489_v1 = vpop.permute.xlu1 %483 }
 0x21b   :  { %4133 = vrsqrt.f32 %v327_v37 }
 0x21c   :  { %v344_v42 = vmul.f32 %v3150_v39, %v334_v40 }
 0x21d   :  { %v4126_v43 = vpop.eup %4125 }
 0x21e   :  { %v4128_v46 = vpop.eup %4127  ;;  %v354_v47 = vadd.f32 %v3151_v41, %v344_v42  ;;  %v335_v48 = vmul.f32 %v4126_v43, %v4420_v45 }
 0x21f   :  { %v336_v49 = vmul.f32 %v4128_v46, %v4417_v44 }
 0x220   :  { %3494 = vmatprep.mubr.msk.f32.mxu1 %vm260_vm1, %v354_v47  ;;  %v345_v50 = vmul.f32 %v3150_v39, %v335_v48 }
 0x221   :  { %v4130_v51 = vpop.eup %4129  ;;  %v346_v52 = vmul.f32 %v3150_v39, %v336_v49 }
 0x222   :  { %v4132_v55 = vpop.eup %4131  ;;  %v355_v38 = vadd.f32 %v3151_v41, %v345_v50  ;;  %v337_v56 = vmul.f32 %v4130_v51, %v4428_v53 }
 0x223   :  { %v356_v57 = vadd.f32 %v3151_v41, %v346_v52  ;;  %v338_v58 = vmul.f32 %v4132_v55, %v4431_v54  ;;  %v3152_v54 = vld [vmem:[%s5324_s2 + $0x62] ss:$0 sm:$0xff] }
 0x224   :  { %3495 = vmatmul.mubr.msk.f32.vlgmr.msra.gmra.mrb[0].mxu1 %vm260_vm1, %v355_v38  ;;  %v347_v59 = vmul.f32 %v3150_v39, %v337_v56 }
 0x225   :  { %v4134_v60 = vpop.eup %4133  ;;  %3497 = vmatprep.mubr.msk.f32.mxu1 %vm260_vm1, %v356_v57  ;;  %v348_v45 = vmul.f32 %v3150_v39, %v338_v58 }
 0x226   :  { %v357_v44 = vadd.f32 %v3151_v41, %v347_v59  ;;  %v339_v62 = vmul.f32 %v4134_v60, %v4440_v61 }
 0x227   :  { %v358_v63 = vadd.f32 %v3151_v41, %v348_v45 }
 0x228   :  { %3498 = vmatmul.mubr.msk.f32.gmra.mrb[2].mxu1 %vm260_vm1, %v357_v44  ;;  %v349_v0 = vmul.f32 %v3150_v39, %v339_v62 }
 0x229   :  { %3500 = vmatprep.mubr.msk.f32.mxu1 %vm260_vm1, %v358_v63 }
 0x22a   :  { %v359_v53 = vadd.f32 %v3151_v41, %v349_v0 }
 0x22c   :  { %3501 = vmatmul.mubr.msk.f32.gmra.mrb[4].mxu1 %vm260_vm1, %v359_v53 }
 0x2f7   :  { %v3496_v2 = vpop.f32.mrb[0].mxu1 }
 0x2f8   :  { %v4493_v4 = vadd.f32 %v3496_v2, %v3152_v54  ;;  %v453_v61 = vpop.f32.mrb[1].mxu1 }
 0x2f9   :  { %v4495_v5 = vadd.f32 %v3152_v54, %v453_v61 }
 0x2fa   :  { %v487_v6 = vmul.f32 %v4489_v1, %v4493_v4  ;;  %v718_v7 = vmul.f32 %v4491_v3, %v4493_v4 }
 0x2fb   :  { %v3499_v8 = vpop.f32.mrb[2].mxu1  ;;  %3515 = vmatprep.mubr.msk.f32.mxu1 %vm260_vm1, %v4495_v5  ;;  %3536 = vmatprep.mubr.msk.f32.mxu0 %vm260_vm1, %v4495_v5  ;;  %v486_v11 = vmul.f32 %v4489_v1, %v4495_v5  ;;  %v717_v12 = vmul.f32 %v4491_v3, %v4495_v5 }
 0x2fc   :  { %v4509_v13 = vadd.f32 %v3499_v8, %v3152_v54  ;;  %v463_v14 = vpop.f32.mrb[3].mxu1 }
 0x2fd   :  { %v4511_v15 = vadd.f32 %v3152_v54, %v463_v14  ;;  %v4011_v16 = vpack.i.bf16 %v487_v6, %v486_v11  ;;  %v4001_v17 = vpack.i.bf16 %v718_v7, %v717_v12  ;;  %v4306_v7 = vmov -1e+30  }
 0x2fe   :  { %v489_v18 = vmul.f32 %v4489_v1, %v4509_v13  ;;  %v720_v20 = vmul.f32 %v4491_v3, %v4509_v13  ;;  %v4590_v8 = vsel %vm183_vm7, 0.0, %v4306_v7 }
 0x2ff   :  { %4012 = vrot.lane.b32.xlu0 %v4011_v16, %s4305_s6  ;;  %v3502_v22 = vpop.f32.mrb[4].mxu1  ;;  %4002 = vrot.lane.b32.xlu1 %v4001_v17, %s4305_s6  ;;  %v488_v23 = vmul.f32 %v4489_v1, %v4511_v15  ;;  %v719_v24 = vmul.f32 %v4491_v3, %v4511_v15 }
 0x300   :  { %v4523_v27 = vadd.f32 %v3502_v22, %v3152_v54  ;;  %v473_v28 = vpop.f32.mrb[5].mxu1 }
 0x301   :  { %v4525_v29 = vadd.f32 %v3152_v54, %v473_v28  ;;  %v4021_v30 = vpack.i.bf16 %v489_v18, %v488_v23  ;;  %v4006_v33 = vpack.i.bf16 %v720_v20, %v719_v24 }
 0x302   :  { %v722_v34 = vmul.f32 %v4491_v3, %v4523_v27  ;;  %v491_v39 = vmul.f32 %v4489_v1, %v4523_v27 }
 0x303   :  { %4022 = vrot.lane.b32.xlu0 %v4021_v30, %s4305_s6  ;;  %4007 = vrot.lane.b32.xlu1 %v4006_v33, %s4305_s6  ;;  %v721_v35 = vmul.f32 %v4491_v3, %v4525_v29  ;;  %v490_v37 = vmul.f32 %v4489_v1, %v4525_v29 }
 0x305   :  { %v4016_v36 = vpack.i.bf16 %v722_v34, %v721_v35  ;;  %v4026_v40 = vpack.i.bf16 %v491_v39, %v490_v37 }
 0x307   :  { %4017 = vrot.lane.b32.xlu1 %v4016_v36, %s4305_s6 }
 0x30b   :  { %4027 = vrot.lane.b32.xlu1 %v4026_v40, %s4305_s6  ;;  %v4608_v40 = vsel %vm225_vm10, 0.0, %v4306_v7  ;;  %v4046_v7 = vpack.i.bf16 %v4493_v4, %v4495_v5 }
 0x371   :  { %v4003_v41 = vpop.permute.xlu1 %4002  ;;  %v4013_v42 = vpop.permute.xlu0 %4012 }
 0x372   :  { %v4005_v43 = vunpack.i.h.bf16 %v4003_v41  ;;  %v4004_v46 = vunpack.i.l.bf16 %v4003_v41  ;;  %v4015_v47 = vunpack.i.h.bf16 %v4013_v42  ;;  %v4014_v48 = vunpack.i.l.bf16 %v4013_v42 }
 0x374   :  { %v3821_v50 = vpack.c.bf16 %v4005_v43, %v4004_v46  ;;  %v3803_v51 = vpack.c.bf16 %v4015_v47, %v4014_v48 }
 0x375   :  { %v4008_v52 = vpop.permute.xlu1 %4007  ;;  %v4023_v55 = vpop.permute.xlu0 %4022 }
 0x376   :  { %v4010_v38 = vunpack.i.h.bf16 %v4008_v52  ;;  %v4009_v56 = vunpack.i.l.bf16 %v4008_v52  ;;  %v4025_v57 = vunpack.i.h.bf16 %v4023_v55  ;;  %v4024_v58 = vunpack.i.l.bf16 %v4023_v55  ;;  %3805 = vmatprep.subr.msk.bf16.mxu1 %vm4541_vm6, %v3803_v51  ;;  %3823 = vmatprep.subr.msk.bf16.mxu0 %vm4541_vm6, %v3821_v50 }
 0x377   :  { %3808 = vmatpush3.bf16.xpose.msk.msra.mxu1 %vm4541_vm6, %v3803_v51  ;;  %3826 = vmatpush3.bf16.xpose.msk.msra.mxu0 %vm4541_vm6, %v3821_v50 }
 0x378   :  { %v3827_v59 = vpack.c.bf16 %v4010_v38, %v4009_v56  ;;  %v3809_v60 = vpack.c.bf16 %v4025_v57, %v4024_v58 }
 0x379   :  { %v4018_v45 = vpop.permute.xlu1 %4017 }
 0x37a   :  { %v4020_v44 = vunpack.i.h.bf16 %v4018_v45  ;;  %v4019_v62 = vunpack.i.l.bf16 %v4018_v45  ;;  %3811 = vmatprep.subr.msk.bf16.mxu1 %vm4541_vm6, %v3809_v60  ;;  %3829 = vmatprep.subr.msk.bf16.mxu0 %vm4541_vm6, %v3827_v59 }
 0x37c   :  { %v3833_v0 = vpack.c.bf16 %v4020_v44, %v4019_v62 }
 0x37d   :  { %v4028_v63 = vpop.permute.xlu1 %4027 }
 0x37e   :  { %v4030_v53 = vunpack.i.h.bf16 %v4028_v63  ;;  %v4029_v54 = vunpack.i.l.bf16 %v4028_v63 }
 0x37f   :  { %3814 = vmatpush3.bf16.xpose.msk.msra.mxu1 %vm4541_vm6, %v3809_v60  ;;  %3832 = vmatpush3.bf16.xpose.msk.msra.mxu0 %vm4541_vm6, %v3827_v59 }
 0x380   :  { %v3815_v2 = vpack.c.bf16 %v4030_v53, %v4029_v54  ;;  %3835 = vmatprep.subr.msk.bf16.mxu0 %vm4541_vm6, %v3833_v0 }
 0x382   :  { %3817 = vmatprep.subr.msk.bf16.mxu1 %vm4541_vm6, %v3815_v2 }
 0x387   :  { %3820 = vmatpush3.bf16.xpose.msk.msra.mxu1 %vm4541_vm6, %v3815_v2  ;;  %3838 = vmatpush3.bf16.xpose.msk.msra.mxu0 %vm4541_vm6, %v3833_v0 }
 0x38e   :  { %3516 = vmatmul.mubr.msk.f32.vlgmr.msra.gmra.mrb[6].mxu1 %vm260_vm1, %v4493_v4  ;;  %3537 = vmatmul.mubr.msk.f32.vlgmr.msra.gmra.mrb[6].mxu0 %vm260_vm1, %v4493_v4 }
 0x38f   :  { %3518 = vmatprep.mubr.msk.f32.mxu1 %vm260_vm1, %v4511_v15  ;;  %3539 = vmatprep.mubr.msk.f32.mxu0 %vm260_vm1, %v4511_v15 }
 0x392   :  { %3519 = vmatmul.mubr.msk.f32.gmra.mrb[8].mxu1 %vm260_vm1, %v4509_v13  ;;  %3540 = vmatmul.mubr.msk.f32.gmra.mrb[8].mxu0 %vm260_vm1, %v4509_v13 }
 0x393   :  { %3521 = vmatprep.mubr.msk.f32.mxu1 %vm260_vm1, %v4525_v29  ;;  %3542 = vmatprep.mubr.msk.f32.mxu0 %vm260_vm1, %v4525_v29 }
 0x396   :  { %3522 = vmatmul.mubr.msk.f32.gmra.mrb[10].mxu1 %vm260_vm1, %v4523_v27  ;;  %3543 = vmatmul.mubr.msk.f32.gmra.mrb[10].mxu0 %vm260_vm1, %v4523_v27 }
 0x461   :  { %v3517_v61 = vpop.f32.mrb[6].mxu1  ;;  %v3538_v6 = vpop.f32.mrb[6].mxu0 }
 0x462   :  { %v636_v11 = vmul.f32 0.25, %v3517_v61  ;;  %v849_v12 = vmul.f32 0.25, %v3538_v6  ;;  %v606_v14 = vpop.f32.mrb[7].mxu1  ;;  %v819_v16 = vpop.f32.mrb[7].mxu0  ;;  %v4641_v6 = vpack.i.bf16 %v4509_v13, %v4511_v15  ;;  %v4656_v13 = vpack.i.bf16 %v4523_v27, %v4525_v29 }
 0x463   :  { %v635_v17 = vmul.f32 0.25, %v606_v14  ;;  %v848_v18 = vmul.f32 0.25, %v819_v16 }
 0x464   :  { %v4595_v20 = vadd.f32 %v849_v12, %v4590_v8  ;;  %v4603_v35 = vadd.f32 %v636_v11, %v4590_v8 }
 0x465   :  { %v3520_v22 = vpop.f32.mrb[8].mxu1  ;;  %v3541_v23 = vpop.f32.mrb[8].mxu0  ;;  %v4598_v24 = vadd.f32 %v848_v18, %v4590_v8  ;;  %v641_v39 = vadd.f32 %v635_v17, %v4590_v8 }
 0x466   :  { %v638_v28 = vmul.f32 0.25, %v3520_v22  ;;  %v616_v30 = vpop.f32.mrb[9].mxu1  ;;  %v829_v33 = vpop.f32.mrb[9].mxu0  ;;  %v863_v34 = vsel %vm32_vm0, %v4595_v20, -inf  ;;  %v851_v36 = vmul.f32 0.25, %v3541_v23  ;;  %v650_v48 = vsel %vm32_vm0, %v4603_v35, -inf }
 0x467   :  { %864 = vmax.xlane.f32.xlu1 %v863_v34  ;;  %v860_v37 = vsel %vm32_vm0, %v4598_v24, -inf  ;;  %v850_v51 = vmul.f32 0.25, %v829_v33  ;;  %v647_v52 = vsel %vm32_vm0, %v641_v39, -inf  ;;  %v637_v58 = vmul.f32 0.25, %v616_v30 }
 0x468   :  { %861 = vmax.xlane.f32.xlu0 %v860_v37  ;;  %v644_v50 = vadd.f32 %v638_v28, %v4608_v40  ;;  %v857_v55 = vadd.f32 %v851_v36, %v4608_v40 }
 0x469   :  { %v3523_v41 = vpop.f32.mrb[10].mxu1  ;;  %v3544_v42 = vpop.f32.mrb[10].mxu0  ;;  %v856_v60 = vadd.f32 %v850_v51, %v4590_v8  ;;  %v4628_v0 = vadd.f32 %v637_v58, %v4590_v8 }
 0x46a   :  { %v853_v43 = vmul.f32 0.25, %v3544_v42  ;;  %v626_v46 = vpop.f32.mrb[11].mxu1  ;;  %v839_v47 = vpop.f32.mrb[11].mxu0  ;;  %v640_v38 = vmul.f32 0.25, %v3523_v41  ;;  %v656_v56 = vsel %vm32_vm0, %v644_v50, -inf  ;;  %v869_v59 = vsel %vm32_vm0, %v857_v55, -inf }
 0x46b   :  { %651 = vmax.xlane.f32.xlu1 %v650_v48  ;;  %v852_v62 = vmul.f32 0.25, %v839_v47  ;;  %v866_v63 = vsel %vm32_vm0, %v856_v60, -inf  ;;  %v653_v54 = vsel %vm32_vm0, %v4628_v0, -inf  ;;  %v639_v11 = vmul.f32 0.25, %v626_v46 }
 0x46c   :  { %648 = vmax.xlane.f32.xlu0 %v647_v52  ;;  %v4617_v57 = vadd.f32 %v853_v43, %v4608_v40  ;;  %v4624_v44 = vadd.f32 %v640_v38, %v4608_v40 }
 0x46d   :  { %v4635_v2 = vadd.f32 %v852_v62, %v4608_v40  ;;  %v4650_v12 = vadd.f32 %v639_v11, %v4608_v40 }
 0x46e   :  { %v875_v45 = vsel %vm32_vm0, %v4617_v57, -inf  ;;  %v662_v53 = vsel %vm32_vm0, %v4624_v44, -inf }
 0x46f   :  { %657 = vmax.xlane.f32.xlu1 %v656_v56  ;;  %v872_v61 = vsel %vm32_vm0, %v4635_v2, -inf  ;;  %v659_v14 = vsel %vm32_vm0, %v4650_v12, -inf }
 0x470   :  { %870 = vmax.xlane.f32.xlu0 %v869_v59 }
 0x473   :  { %876 = vmax.xlane.f32.xlu1 %v875_v45 }
 0x474   :  { %867 = vmax.xlane.f32.xlu0 %v866_v63 }
 0x477   :  { %663 = vmax.xlane.f32.xlu1 %v662_v53 }
 0x478   :  { %654 = vmax.xlane.f32.xlu0 %v653_v54 }
 0x47c   :  { %873 = vmax.xlane.f32.xlu0 %v872_v61 }
 0x488   :  { %4037 = vrot.lane.b32.xlu1 %v4641_v6, %s4304_s25 }
 0x48c   :  { %4047 = vrot.lane.b32.xlu1 %v4046_v7, %s4307_s7 }
 0x492   :  { %4032 = vrot.lane.b32.xlu0 %v4046_v7, %s4304_s25 }
 0x4b1   :  { %660 = vmax.xlane.f32.xlu0 %v659_v14 }
 0x4c7   :  { %4042 = vrot.lane.b32.xlu0 %v4656_v13, %s4304_s25 }
 0x4f4   :  { %v865_v4 = vpop.xlane.xlu1 %864 }
 0x4f5   :  { %v879_v5 = vsub.f32 %v4595_v20, %v865_v4  ;;  %v862_v15 = vpop.xlane.xlu0 %861 }
 0x4f6   :  { %v878_v16 = vsub.f32 %v4598_v24, %v862_v15 }
 0x4f7   :  { %v886_v17 = vmul.f32 1.442695, %v879_v5 }
 0x4f8   :  { %v884_v18 = vmul.f32 1.442695, %v878_v16  ;;  %v652_v22 = vpop.xlane.xlu1 %651 }
 0x4f9   :  { %4135 = vpow2.f32 %v886_v17  ;;  %v666_v23 = vsub.f32 %v4603_v35, %v652_v22  ;;  %v649_v28 = vpop.xlane.xlu0 %648 }
 0x4fa   :  { %4137 = vpow2.f32 %v884_v18  ;;  %v665_v30 = vsub.f32 %v641_v39, %v649_v28 }
 0x4fb   :  { %v673_v27 = vmul.f32 1.442695, %v666_v23 }
 0x4fc   :  { %v671_v29 = vmul.f32 1.442695, %v665_v30  ;;  %v658_v33 = vpop.xlane.xlu1 %657 }
 0x4fd   :  { %4139 = vpow2.f32 %v673_v27  ;;  %v668_v34 = vsub.f32 %v644_v50, %v658_v33  ;;  %v871_v36 = vpop.xlane.xlu0 %870 }
 0x4fe   :  { %4141 = vpow2.f32 %v671_v29  ;;  %v881_v20 = vsub.f32 %v857_v55, %v871_v36 }
 0x4ff   :  { %v677_v37 = vmul.f32 1.442695, %v668_v34 }
 0x500   :  { %v890_v41 = vmul.f32 1.442695, %v881_v20  ;;  %v877_v24 = vpop.xlane.xlu1 %876 }
 0x501   :  { %4143 = vpow2.f32 %v677_v37  ;;  %v868_v42 = vpop.xlane.xlu0 %867  ;;  %v883_v39 = vsub.f32 %v4617_v57, %v877_v24 }
 0x502   :  { %4145 = vpow2.f32 %v890_v41  ;;  %v880_v43 = vsub.f32 %v856_v60, %v868_v42 }
 0x503   :  { %v4663_v46 = vpop.eup %4135  ;;  %v894_v59 = vmul.f32 1.442695, %v883_v39 }
 0x504   :  { %v4665_v35 = vpop.eup %4137  ;;  %v888_v47 = vmul.f32 1.442695, %v880_v43  ;;  %v664_v48 = vpop.xlane.xlu1 %663  ;;  %v899_v50 = vsel %vm32_vm0, %v4663_v46, 0.0 }
 0x505   :  { %v670_v51 = vsub.f32 %v4624_v44, %v664_v48  ;;  %v655_v52 = vpop.xlane.xlu0 %654  ;;  %900 = vadd.xlane.f32.xlu1 %v899_v50  ;;  %v896_v55 = vsel %vm32_vm0, %v4665_v35, 0.0 }
 0x506   :  { %4147 = vpow2.f32 %v888_v47  ;;  %v667_v38 = vsub.f32 %v4628_v0, %v655_v52  ;;  %897 = vadd.xlane.f32.xlu0 %v896_v55 }
 0x507   :  { %v4674_v56 = vpop.eup %4139  ;;  %v681_v58 = vmul.f32 1.442695, %v670_v51 }
 0x508   :  { %v4676_v57 = vpop.eup %4141  ;;  %v675_v60 = vmul.f32 1.442695, %v667_v38  ;;  %v686_v45 = vsel %vm32_vm0, %v4674_v56, 0.0  ;;  %v4038_v63 = vpop.permute.xlu1 %4037 }
 0x509   :  { %4149 = vpow2.f32 %v681_v58  ;;  %v874_v44 = vpop.xlane.xlu0 %873  ;;  %687 = vadd.xlane.f32.xlu1 %v686_v45  ;;  %v683_v62 = vsel %vm32_vm0, %v4676_v57, 0.0  ;;  %v4040_v11 = vunpack.i.h.bf16 %v4038_v63  ;;  %v4039_v5 = vunpack.i.l.bf16 %v4038_v63 }
 0x50a   :  { %4151 = vpow2.f32 %v675_v60  ;;  %v882_v0 = vsub.f32 %v4635_v2, %v874_v44  ;;  %684 = vadd.xlane.f32.xlu0 %v683_v62 }
 0x50b   :  { %v4683_v53 = vpop.eup %4143  ;;  %4153 = vpow2.f32 %v894_v59  ;;  %v3843_v22 = vpack.c.bf16 %v4040_v11, %v4039_v5 }
 0x50c   :  { %v4685_v54 = vpop.eup %4145  ;;  %v892_v61 = vmul.f32 1.442695, %v882_v0  ;;  %v692_v7 = vsel %vm32_vm0, %v4683_v53, 0.0  ;;  %v4048_v37 = vpop.permute.xlu1 %4047 }
 0x50d   :  { %v4033_v14 = vpop.permute.xlu0 %4032  ;;  %v905_v4 = vsel %vm32_vm0, %v4685_v54, 0.0  ;;  %v4050_v42 = vunpack.i.h.bf16 %v4048_v37  ;;  %v4049_v39 = vunpack.i.l.bf16 %v4048_v37 }
 0x50e   :  { %4155 = vpow2.f32 %v892_v61  ;;  %v4035_v15 = vunpack.i.h.bf16 %v4033_v14  ;;  %v4034_v16 = vunpack.i.l.bf16 %v4033_v14  ;;  %906 = vadd.xlane.f32.xlu1 %v905_v4  ;;  %693 = vadd.xlane.f32.xlu0 %v692_v7 }
 0x50f   :  { %v3851_v51 = vpack.c.bf16 %v4050_v42, %v4049_v39 }
 0x510   :  { %v4691_v2 = vpop.eup %4147  ;;  %v3839_v17 = vpack.c.bf16 %v4035_v15, %v4034_v16 }
 0x511   :  { %v902_v18 = vsel %vm32_vm0, %v4691_v2, 0.0 }
 0x512   :  { %3840 = vmatprep.subr.bf16.mxu1 %v3839_v17  ;;  %903 = vadd.xlane.f32.xlu0 %v902_v18 }
 0x513   :  { %v4695_v23 = vpop.eup %4149  ;;  %3842 = vmatpush3.bf16.msra.mxu1 %v3839_v17 }
 0x514   :  { %v4697_v28 = vpop.eup %4151  ;;  %3844 = vmatprep.subr.bf16.mxu1 %v3843_v22  ;;  %v698_v30 = vsel %vm32_vm0, %v4695_v23, 0.0 }
 0x515   :  { %v689_v27 = vsel %vm32_vm0, %v4697_v28, 0.0  ;;  %v4703_v29 = vpop.eup %4153 }
 0x516   :  { %690 = vadd.xlane.f32.xlu1 %v689_v27  ;;  %699 = vadd.xlane.f32.xlu0 %v698_v30  ;;  %v911_v34 = vsel %vm32_vm0, %v4703_v29, 0.0 }
 0x517   :  { %3846 = vmatpush3.bf16.msra.mxu1 %v3843_v22 }
 0x518   :  { %v4705_v33 = vpop.eup %4155 }
 0x519   :  { %v908_v36 = vsel %vm32_vm0, %v4705_v33, 0.0 }
 0x51a   :  { %912 = vadd.xlane.f32.xlu1 %v911_v34  ;;  %909 = vadd.xlane.f32.xlu0 %v908_v36 }
 0x530   :  { %4052 = vrot.lane.b32.xlu0 %v4641_v6, %s4307_s7 }
 0x53e   :  { %v661_v20 = vpop.xlane.xlu0 %660 }
 0x53f   :  { %v669_v41 = vsub.f32 %v4650_v12, %v661_v20 }
 0x541   :  { %v679_v24 = vmul.f32 1.442695, %v669_v41 }
 0x542   :  { %v4043_v43 = vpop.permute.xlu0 %4042 }
 0x543   :  { %4157 = vpow2.f32 %v679_v24  ;;  %v4045_v47 = vunpack.i.h.bf16 %v4043_v43  ;;  %v4044_v48 = vunpack.i.l.bf16 %v4043_v43 }
 0x545   :  { %v3847_v50 = vpack.c.bf16 %v4045_v47, %v4044_v48 }
 0x547   :  { %3848 = vmatprep.subr.bf16.mxu1 %v3847_v50 }
 0x548   :  { %3850 = vmatpush3.bf16.msra.mxu1 %v3847_v50 }
 0x549   :  { %3852 = vmatprep.subr.bf16.mxu1 %v3851_v51 }
 0x54d   :  { %v4714_v52 = vpop.eup %4157 }
 0x54e   :  { %v695_v6 = vsel %vm32_vm0, %v4714_v52, 0.0 }
 0x54f   :  { %696 = vadd.xlane.f32.xlu1 %v695_v6 }
 0x560   :  { %4057 = vrot.lane.b32.xlu1 %v4656_v13, %s4307_s7 }
 0x592   :  { %v901_v12 = vpop.xlane.xlu1 %900 }
 0x593   :  { %4159 = vrcp.f32 %v901_v12  ;;  %v898_v55 = vpop.xlane.xlu0 %897 }
 0x594   :  { %4161 = vrcp.f32 %v898_v55 }
 0x596   :  { %v688_v38 = vpop.xlane.xlu1 %687 }
 0x597   :  { %v685_v58 = vpop.xlane.xlu0 %684 }
 0x59b   :  { %v694_v59 = vpop.xlane.xlu0 %693  ;;  %v907_v60 = vpop.xlane.xlu1 %906 }
 0x59c   :  { %4163 = vrcp.f32 %v907_v60 }
 0x59d   :  { %v4160_v45 = vpop.eup %4159 }
 0x59e   :  { %v4162_v44 = vpop.eup %4161  ;;  %v921_v0 = vmul.f32 %v4160_v45, %v4663_v46 }
 0x59f   :  { %v904_v62 = vpop.xlane.xlu0 %903  ;;  %v920_v63 = vmul.f32 %v4162_v44, %v4665_v35 }
 0x5a0   :  { %4165 = vrcp.f32 %v904_v62 }
 0x5a1   :  { %3557 = vmatprep.mubr.msk.f32.mxu1 %vm32_vm0, %v920_v63  ;;  %4167 = vrcp.f32 %v685_v58 }
 0x5a2   :  { %3558 = vmatmul.mubr.msk.f32.vlgmr.msra.gmra.mrb[12].mxu1 %vm32_vm0, %v921_v0 }
 0x5a3   :  { %3854 = vmatpush3.bf16.msra.mxu1 %v3851_v51  ;;  %v691_v13 = vpop.xlane.xlu1 %690  ;;  %v700_v61 = vpop.xlane.xlu0 %699 }
 0x5a6   :  { %v4164_v14 = vpop.eup %4163 }
 0x5a7   :  { %v913_v7 = vpop.xlane.xlu1 %912  ;;  %v910_v11 = vpop.xlane.xlu0 %909  ;;  %v923_v16 = vmul.f32 %v4164_v14, %v4685_v54 }
 0x5a8   :  { %4169 = vrcp.f32 %v913_v7 }
 0x5a9   :  { %4171 = vrcp.f32 %v910_v11 }
 0x5aa   :  { %v4166_v4 = vpop.eup %4165  ;;  %4173 = vrcp.f32 %v688_v38 }
 0x5ab   :  { %v4053_v5 = vpop.permute.xlu0 %4052  ;;  %v922_v35 = vmul.f32 %v4166_v4, %v4691_v2  ;;  %v4168_v18 = vpop.eup %4167  ;;  %4175 = vrcp.f32 %v691_v13 }
 0x5ac   :  { %v4055_v15 = vunpack.i.h.bf16 %v4053_v5  ;;  %v4054_v46 = vunpack.i.l.bf16 %v4053_v5  ;;  %v707_v2 = vmul.f32 %v4168_v18, %v4676_v57  ;;  %4177 = vrcp.f32 %v694_v59 }
 0x5ad   :  { %3560 = vmatprep.mubr.msk.f32.mxu1 %vm32_vm0, %v922_v35 }
 0x5ae   :  { %v3855_v17 = vpack.c.bf16 %v4055_v15, %v4054_v46  ;;  %3561 = vmatmul.mubr.msk.f32.gmra.mrb[14].mxu1 %vm32_vm0, %v923_v16 }
 0x5b0   :  { %3856 = vmatprep.subr.bf16.mxu1 %v3855_v17 }
 0x5b1   :  { %3858 = vmatpush3.bf16.msra.mxu1 %v3855_v17 }
 0x5b2   :  { %v4170_v22 = vpop.eup %4169 }
 0x5b3   :  { %v4172_v30 = vpop.eup %4171  ;;  %v925_v27 = vmul.f32 %v4170_v22, %v4703_v29 }
 0x5b4   :  { %v924_v34 = vmul.f32 %v4172_v30, %v4705_v33  ;;  %v4174_v41 = vpop.eup %4173 }
 0x5b5   :  { %v4176_v33 = vpop.eup %4175  ;;  %v708_v57 = vmul.f32 %v4174_v41, %v4674_v56 }
 0x5b6   :  { %3563 = vmatprep.mubr.msk.f32.mxu1 %vm32_vm0, %v924_v34  ;;  %v4178_v24 = vpop.eup %4177  ;;  %v709_v42 = vmul.f32 %v4176_v33, %v4697_v28  ;;  %v3195_v28 = vld [vmem:[%s5324_s2 + $0x63] ss:$0 sm:$0xff] }
 0x5b7   :  { %3564 = vmatmul.mubr.msk.f32.gmra.mrb[16].mxu1 %vm32_vm0, %v925_v27  ;;  %v710_v39 = vmul.f32 %v4178_v24, %v4683_v53 }
 0x5b8   :  { %3578 = vmatprep.mubr.msk.f32.mxu1 %vm32_vm0, %v707_v2 }
 0x5dc   :  { %v697_v54 = vpop.xlane.xlu1 %696 }
 0x5dd   :  { %4179 = vrcp.f32 %v697_v54 }
 0x5de   :  { %4181 = vrcp.f32 %v700_v61 }
 0x5e0   :  { %v4058_v36 = vpop.permute.xlu1 %4057 }
 0x5e1   :  { %v4060_v20 = vunpack.i.h.bf16 %v4058_v36  ;;  %v4059_v37 = vunpack.i.l.bf16 %v4058_v36 }
 0x5e3   :  { %v3859_v29 = vpack.c.bf16 %v4060_v20, %v4059_v37 }
 0x5e5   :  { %3860 = vmatprep.subr.bf16.mxu1 %v3859_v29 }
 0x5e6   :  { %3862 = vmatpush3.bf16.msra.mxu1 %v3859_v29 }
 0x5e7   :  { %v4180_v43 = vpop.eup %4179 }
 0x5e8   :  { %v4182_v47 = vpop.eup %4181  ;;  %v711_v48 = vmul.f32 %v4180_v43, %v4714_v52 }
 0x5e9   :  { %3579 = vmatmul.mubr.msk.f32.vlgmr.msra.gmra.mrb[12].mxu1 %vm32_vm0, %v708_v57  ;;  %v712_v50 = vmul.f32 %v4182_v47, %v4695_v23 }
 0x5ea   :  { %3581 = vmatprep.mubr.msk.f32.mxu1 %vm32_vm0, %v709_v42 }
 0x5ed   :  { %3582 = vmatmul.mubr.msk.f32.gmra.mrb[14].mxu1 %vm32_vm0, %v710_v39 }
 0x5ee   :  { %3584 = vmatprep.mubr.msk.f32.mxu1 %vm32_vm0, %v711_v48  ;;  %v1305_v48 = vld [vmem:[%s5324_s2 + $0x20] sm:$0xff] }
 0x5f1   :  { %3585 = vmatmul.mubr.msk.f32.gmra.mrb[16].mxu1 %vm32_vm0, %v712_v50  ;;  %v1306_v50 = vld [vmem:[%s5324_s2 + $0x28] sm:$0xff] }
 0x6bc   :  { %v3580_v56 = vpop.f32.mrb[12].mxu1 }
 0x6bd   :  { %v1189_v51 = vadd.f32 %v3580_v56, %v4389_v21  ;;  %v1159_v6 = vpop.f32.mrb[13].mxu1  ;;  %v3863_v56 = vpack.c.bf16 %v1306_v50, %v1305_v48  ;;  %v1481_v50 = vld [vmem:[%s5324_s2 + $0x40] sm:$0xff] }
 0x6be   :  { %v1188_v53 = vadd.f32 %v1159_v6, %v4384_v19 }
 0x6bf   :  { %v4749_v12 = vadd.f32 %v3195_v28, %v1189_v51  ;;  %3864 = vmatprep.subr.bf16.mxu0 %v3863_v56  ;;  %v1308_v51 = vld [vmem:[%s5324_s2 + $0x38] sm:$0xff] }
 0x6c0   :  { %v4751_v52 = vadd.f32 %v3195_v28, %v1188_v53  ;;  %v3583_v55 = vpop.f32.mrb[14].mxu1  ;;  %3866 = vmatpush3.bf16.msra.mxu0 %v3863_v56  ;;  %v1483_v56 = vld [vmem:[%s5324_s2 + $0x50] sm:$0xff] }
 0x6c1   :  { %v1191_v38 = vadd.f32 %v3583_v55, %v4393_v25  ;;  %v1169_v23 = vpop.f32.mrb[15].mxu1  ;;  %v1210_v58 = vsel %vm260_vm1, %v4749_v12, 0.0 }
 0x6c2   :  { %v1190_v59 = vadd.f32 %v1169_v23, %v4395_v26  ;;  %1211 = vadd.xlane.f32.xlu0 %v1210_v58  ;;  %v1207_v21 = vsel %vm260_vm1, %v4751_v52, 0.0 }
 0x6c3   :  { %v4759_v60 = vadd.f32 %v3195_v28, %v1191_v38  ;;  %1208 = vadd.xlane.f32.xlu1 %v1207_v21 }
 0x6c4   :  { %v4761_v19 = vadd.f32 %v3195_v28, %v1190_v59  ;;  %v3586_v45 = vpop.f32.mrb[16].mxu1 }
 0x6c5   :  { %v1193_v44 = vadd.f32 %v3586_v45, %v4401_v31  ;;  %v1179_v62 = vpop.f32.mrb[17].mxu1  ;;  %v1216_v25 = vsel %vm260_vm1, %v4759_v60, 0.0 }
 0x6c6   :  { %v1192_v63 = vadd.f32 %v1179_v62, %v4403_v32  ;;  %v1213_v26 = vsel %vm260_vm1, %v4761_v19, 0.0 }
 0x6c7   :  { %v4769_v0 = vadd.f32 %v3195_v28, %v1193_v44  ;;  %1217 = vadd.xlane.f32.xlu1 %v1216_v25  ;;  %1214 = vadd.xlane.f32.xlu0 %v1213_v26 }
 0x6c8   :  { %v4771_v13 = vadd.f32 %v3195_v28, %v1192_v63  ;;  %v1307_v28 = vld [vmem:[%s5324_s2 + $0x30] sm:$0xff] }
 0x6c9   :  { %v1222_v61 = vsel %vm260_vm1, %v4769_v0, 0.0  ;;  %v3867_v6 = vpack.c.bf16 %v1308_v51, %v1307_v28  ;;  %v1484_v28 = vld [vmem:[%s5324_s2 + $0x58] sm:$0xff] }
 0x6ca   :  { %v1219_v31 = vsel %vm260_vm1, %v4771_v13, 0.0  ;;  %v3875_v51 = vpack.c.bf16 %v1484_v28, %v1483_v56 }
 0x6cb   :  { %1223 = vadd.xlane.f32.xlu1 %v1222_v61  ;;  %1220 = vadd.xlane.f32.xlu0 %v1219_v31 }
 0x6cc   :  { %3868 = vmatprep.subr.bf16.mxu0 %v3867_v6 }
 0x6cd   :  { %3870 = vmatpush3.bf16.msra.mxu0 %v3867_v6  ;;  %v3198_v6 = vld [vmem:[%s5324_s2 + $0x66] ss:$0 sm:$0xff] }
 0x74f   :  { %v1212_v7 = vpop.xlane.xlu0 %1211 }
 0x750   :  { %v1226_v11 = vmul.f32 0.03125, %v1212_v7  ;;  %v1209_v32 = vpop.xlane.xlu1 %1208 }
 0x751   :  { %v1225_v14 = vmul.f32 0.03125, %v1209_v32 }
 0x752   :  { %v4778_v4 = vsub.f32 %v4749_v12, %v1226_v11 }
 0x753   :  { %v4781_v5 = vsub.f32 %v4751_v52, %v1225_v14 }
 0x754   :  { %v1218_v35 = vpop.xlane.xlu1 %1217  ;;  %v1215_v15 = vpop.xlane.xlu0 %1214  ;;  %v1238_v46 = vmul.f32 %v4778_v4, %v4778_v4 }
 0x755   :  { %v1228_v16 = vmul.f32 0.03125, %v1218_v35  ;;  %v1227_v17 = vmul.f32 0.03125, %v1215_v15  ;;  %v1237_v18 = vmul.f32 %v4781_v5, %v4781_v5  ;;  %v3196_v35 = vld [vmem:[%s5324_s2 + $0x64] ss:$0 sm:$0xff] }
 0x756   :  { %v1246_v22 = vsel %vm260_vm1, %v1238_v46, 0.0 }
 0x757   :  { %v4789_v30 = vsub.f32 %v4759_v60, %v1228_v16  ;;  %v4792_v27 = vsub.f32 %v4761_v19, %v1227_v17  ;;  %1247 = vadd.xlane.f32.xlu1 %v1246_v22  ;;  %v1243_v34 = vsel %vm260_vm1, %v1237_v18, 0.0  ;;  %v3197_v17 = vld [vmem:[%s5324_s2 + $0x65] ss:$0 sm:$0xff] }
 0x758   :  { %v1224_v2 = vpop.xlane.xlu1 %1223  ;;  %1244 = vadd.xlane.f32.xlu0 %v1243_v34  ;;  %v1221_v54 = vpop.xlane.xlu0 %1220 }
 0x759   :  { %v1230_v36 = vmul.f32 0.03125, %v1224_v2  ;;  %v1229_v20 = vmul.f32 0.03125, %v1221_v54  ;;  %v1240_v37 = vmul.f32 %v4789_v30, %v4789_v30  ;;  %v1239_v29 = vmul.f32 %v4792_v27, %v4792_v27 }
 0x75b   :  { %v4800_v41 = vsub.f32 %v4769_v0, %v1230_v36  ;;  %v4803_v33 = vsub.f32 %v4771_v13, %v1229_v20  ;;  %v1252_v57 = vsel %vm260_vm1, %v1240_v37, 0.0  ;;  %v1249_v24 = vsel %vm260_vm1, %v1239_v29, 0.0 }
 0x75c   :  { %1253 = vadd.xlane.f32.xlu1 %v1252_v57  ;;  %1250 = vadd.xlane.f32.xlu0 %v1249_v24 }
 0x75d   :  { %v1242_v42 = vmul.f32 %v4800_v41, %v4800_v41  ;;  %v1241_v43 = vmul.f32 %v4803_v33, %v4803_v33 }
 0x75f   :  { %v1258_v39 = vsel %vm260_vm1, %v1242_v42, 0.0  ;;  %v1255_v47 = vsel %vm260_vm1, %v1241_v43, 0.0 }
 0x760   :  { %1259 = vadd.xlane.f32.xlu1 %v1258_v39  ;;  %1256 = vadd.xlane.f32.xlu0 %v1255_v47 }
 0x7e4   :  { %v1248_v53 = vpop.xlane.xlu1 %1247 }
 0x7e5   :  { %v1262_v55 = vmul.f32 0.03125, %v1248_v53  ;;  %v1245_v38 = vpop.xlane.xlu0 %1244 }
 0x7e6   :  { %v1261_v23 = vmul.f32 0.03125, %v1245_v38 }
 0x7e7   :  { %v1268_v58 = vadd.f32 1e-05, %v1262_v55 }
 0x7e8   :  { %v1267_v59 = vadd.f32 1e-05, %v1261_v23 }
 0x7e9   :  { %4183 = vrsqrt.f32 %v1268_v58  ;;  %v1254_v21 = vpop.xlane.xlu1 %1253  ;;  %v1251_v45 = vpop.xlane.xlu0 %1250 }
 0x7ea   :  { %4185 = vrsqrt.f32 %v1267_v59  ;;  %v1264_v44 = vmul.f32 0.03125, %v1254_v21  ;;  %v1263_v62 = vmul.f32 0.03125, %v1251_v45 }
 0x7ec   :  { %v1270_v25 = vadd.f32 1e-05, %v1264_v44  ;;  %v1269_v63 = vadd.f32 1e-05, %v1263_v62 }
 0x7ed   :  { %v1260_v26 = vpop.xlane.xlu1 %1259  ;;  %v1257_v61 = vpop.xlane.xlu0 %1256 }
 0x7ee   :  { %4187 = vrsqrt.f32 %v1270_v25  ;;  %v1266_v31 = vmul.f32 0.03125, %v1260_v26  ;;  %v1265_v7 = vmul.f32 0.03125, %v1257_v61 }
 0x7ef   :  { %4189 = vrsqrt.f32 %v1269_v63 }
 0x7f0   :  { %v1272_v11 = vadd.f32 1e-05, %v1266_v31  ;;  %v1271_v32 = vadd.f32 1e-05, %v1265_v7 }
 0x7f2   :  { %4191 = vrsqrt.f32 %v1272_v11 }
 0x7f3   :  { %v4184_v14 = vpop.eup %4183  ;;  %4193 = vrsqrt.f32 %v1271_v32 }
 0x7f4   :  { %v4186_v15 = vpop.eup %4185  ;;  %v1280_v46 = vmul.f32 %v4184_v14, %v4778_v4 }
 0x7f5   :  { %v1279_v16 = vmul.f32 %v4186_v15, %v4781_v5 }
 0x7f6   :  { %v1290_v18 = vmul.f32 %v3196_v35, %v1280_v46 }
 0x7f7   :  { %v1289_v22 = vmul.f32 %v3196_v35, %v1279_v16 }
 0x7f8   :  { %v4188_v34 = vpop.eup %4187  ;;  %v1300_v20 = vadd.f32 %v3197_v17, %v1290_v18 }
 0x7f9   :  { %v4190_v2 = vpop.eup %4189  ;;  %v1299_v54 = vadd.f32 %v3197_v17, %v1289_v22  ;;  %v1282_v36 = vmul.f32 %v4188_v34, %v4789_v30 }
 0x7fa   :  { %v1281_v37 = vmul.f32 %v4190_v2, %v4792_v27 }
 0x7fb   :  { %3595 = vmatprep.mubr.msk.f32.mxu0 %vm260_vm1, %v1299_v54  ;;  %v1292_v29 = vmul.f32 %v3196_v35, %v1282_v36 }
 0x7fc   :  { %v4192_v4 = vpop.eup %4191  ;;  %3596 = vmatmul.mubr.msk.f32.vlgmr.msra.gmra.mrb[12].mxu0 %vm260_vm1, %v1300_v20  ;;  %v1291_v5 = vmul.f32 %v3196_v35, %v1281_v37 }
 0x7fd   :  { %v4194_v57 = vpop.eup %4193  ;;  %v1302_v24 = vadd.f32 %v3197_v17, %v1292_v29  ;;  %v1284_v42 = vmul.f32 %v4192_v4, %v4800_v41  ;;  %v1482_v41 = vld [vmem:[%s5324_s2 + $0x48] sm:$0xff] }
 0x7fe   :  { %v1301_v43 = vadd.f32 %v3197_v17, %v1291_v5  ;;  %v1283_v39 = vmul.f32 %v4194_v57, %v4803_v33  ;;  %v3871_v33 = vpack.c.bf16 %v1482_v41, %v1481_v50 }
 0x7ff   :  { %v1294_v47 = vmul.f32 %v3196_v35, %v1284_v42 }
 0x800   :  { %3598 = vmatprep.mubr.msk.f32.mxu0 %vm260_vm1, %v1301_v43  ;;  %v1293_v30 = vmul.f32 %v3196_v35, %v1283_v39  ;;  %3872 = vmatprep.subr.bf16.mxu0 %v3871_v33 }
 0x801   :  { %3599 = vmatmul.mubr.msk.f32.gmra.mrb[14].mxu0 %vm260_vm1, %v1302_v24  ;;  %v1304_v27 = vadd.f32 %v3197_v17, %v1294_v47 }
 0x802   :  { %v1303_v48 = vadd.f32 %v3197_v17, %v1293_v30  ;;  %3874 = vmatpush3.bf16.xpose.msra.mxu0 %v3871_v33 }
 0x803   :  { %3876 = vmatprep.subr.bf16.mxu0 %v3875_v51 }
 0x804   :  { %3601 = vmatprep.mubr.msk.f32.mxu0 %vm260_vm1, %v1303_v48 }
 0x805   :  { %3602 = vmatmul.mubr.msk.f32.gmra.mrb[16].mxu0 %vm260_vm1, %v1304_v27 }
 0x80a   :  { %3878 = vmatpush3.bf16.xpose.msra.mxu0 %v3875_v51 }
 0x8cf   :  { %v3597_v53 = vpop.f32.mrb[12].mxu0 }
 0x8d0   :  { %v1404_v55 = vadd.f32 %v3597_v53, %v3198_v6  ;;  %v1398_v38 = vpop.f32.mrb[13].mxu0 }
 0x8d1   :  { %v1399_v23 = vadd.f32 %v3198_v6, %v1398_v38 }
 0x8d2   :  { %v1428_v58 = vmul.f32 %v1404_v55, %v1404_v55 }
 0x8d3   :  { %v1427_v59 = vmul.f32 %v1399_v23, %v1399_v23 }
 0x8d4   :  { %v1434_v21 = vmul.f32 %v1428_v58, %v1404_v55  ;;  %v3600_v45 = vpop.f32.mrb[14].mxu0 }
 0x8d5   :  { %v1433_v44 = vmul.f32 %v1427_v59, %v1399_v23  ;;  %v1414_v62 = vadd.f32 %v3600_v45, %v3198_v6  ;;  %v1408_v25 = vpop.f32.mrb[15].mxu0 }
 0x8d6   :  { %v1440_v63 = vmul.f32 0.044715, %v1434_v21  ;;  %v1409_v26 = vadd.f32 %v3198_v6, %v1408_v25 }
 0x8d7   :  { %v1439_v61 = vmul.f32 0.044715, %v1433_v44  ;;  %v1430_v31 = vmul.f32 %v1414_v62, %v1414_v62 }
 0x8d8   :  { %v1446_v7 = vadd.f32 %v1440_v63, %v1404_v55  ;;  %v1429_v11 = vmul.f32 %v1409_v26, %v1409_v26  ;;  %v3603_v32 = vpop.f32.mrb[16].mxu0 }
 0x8d9   :  { %v1445_v14 = vadd.f32 %v1439_v61, %v1399_v23  ;;  %v1436_v35 = vmul.f32 %v1430_v31, %v1414_v62  ;;  %v1424_v15 = vadd.f32 %v3603_v32, %v3198_v6  ;;  %v1418_v46 = vpop.f32.mrb[17].mxu0 }
 0x8da   :  { %v1452_v16 = vmul.f32 0.7978846, %v1446_v7  ;;  %v1435_v17 = vmul.f32 %v1429_v11, %v1409_v26  ;;  %v1419_v18 = vadd.f32 %v3198_v6, %v1418_v46 }
 0x8db   :  { %v1451_v22 = vmul.f32 0.7978846, %v1445_v14  ;;  %v1442_v34 = vmul.f32 0.044715, %v1436_v35  ;;  %v1432_v2 = vmul.f32 %v1424_v15, %v1424_v15 }
 0x8dc   :  { %4195 = vtanh.f32 %v1452_v16  ;;  %v1441_v54 = vmul.f32 0.044715, %v1435_v17  ;;  %v1431_v36 = vmul.f32 %v1419_v18, %v1419_v18 }
 0x8dd   :  { %v1448_v20 = vadd.f32 %v1442_v34, %v1414_v62  ;;  %v1438_v37 = vmul.f32 %v1432_v2, %v1424_v15  ;;  %4197 = vtanh.f32 %v1451_v22 }
 0x8de   :  { %v1447_v29 = vadd.f32 %v1441_v54, %v1409_v26  ;;  %v1437_v4 = vmul.f32 %v1431_v36, %v1419_v18 }
 0x8df   :  { %v1454_v5 = vmul.f32 0.7978846, %v1448_v20  ;;  %v1444_v57 = vmul.f32 0.044715, %v1438_v37 }
 0x8e0   :  { %v1453_v24 = vmul.f32 0.7978846, %v1447_v29  ;;  %v1443_v42 = vmul.f32 0.044715, %v1437_v4 }
 0x8e1   :  { %v1450_v43 = vadd.f32 %v1444_v57, %v1424_v15  ;;  %4199 = vtanh.f32 %v1454_v5 }
 0x8e2   :  { %v1449_v39 = vadd.f32 %v1443_v42, %v1419_v18  ;;  %4201 = vtanh.f32 %v1453_v24 }
 0x8e3   :  { %v1456_v47 = vmul.f32 0.7978846, %v1450_v43 }
 0x8e4   :  { %v1455_v30 = vmul.f32 0.7978846, %v1449_v39 }
 0x8e5   :  { %4203 = vtanh.f32 %v1456_v47 }
 0x8e6   :  { %v4196_v27 = vpop.eup %4195  ;;  %4205 = vtanh.f32 %v1455_v30 }
 0x8e7   :  { %v4198_v48 = vpop.eup %4197  ;;  %v1464_v50 = vadd.f32 1.0, %v4196_v27 }
 0x8e8   :  { %v1463_v41 = vadd.f32 1.0, %v4198_v48 }
 0x8e9   :  { %v1470_v33 = vmul.f32 0.5, %v1464_v50 }
 0x8ea   :  { %v1469_v56 = vmul.f32 0.5, %v1463_v41 }
 0x8eb   :  { %v4200_v28 = vpop.eup %4199  ;;  %v1476_v38 = vmul.f32 %v1470_v33, %v1404_v55 }
 0x8ec   :  { %v4202_v51 = vpop.eup %4201  ;;  %v1475_v6 = vmul.f32 %v1469_v56, %v1399_v23  ;;  %v1466_v53 = vadd.f32 1.0, %v4200_v28  ;;  %v3205_v23 = vld [vmem:[%s5324_s2 + $0x67] ss:$0 sm:$0xff] }
 0x8ed   :  { %v1465_v58 = vadd.f32 1.0, %v4202_v51 }
 0x8ee   :  { %3612 = vmatprep.mubr.f32.mxu0 %v1475_v6  ;;  %v1472_v59 = vmul.f32 0.5, %v1466_v53 }
 0x8ef   :  { %v4204_v21 = vpop.eup %4203  ;;  %3613 = vmatmul.mubr.f32.vlgmr.msra.gmra.mrb[18].mxu0 %v1476_v38  ;;  %v1471_v45 = vmul.f32 0.5, %v1465_v58 }
 0x8f0   :  { %v4206_v44 = vpop.eup %4205  ;;  %v1468_v25 = vadd.f32 1.0, %v4204_v21  ;;  %v1478_v31 = vmul.f32 %v1472_v59, %v1414_v62 }
 0x8f1   :  { %v1477_v63 = vmul.f32 %v1471_v45, %v1409_v26  ;;  %v1467_v61 = vadd.f32 1.0, %v4206_v44 }
 0x8f2   :  { %v1474_v7 = vmul.f32 0.5, %v1468_v25 }
 0x8f3   :  { %3615 = vmatprep.mubr.f32.mxu0 %v1477_v63  ;;  %v1473_v11 = vmul.f32 0.5, %v1467_v61 }
 0x8f4   :  { %3616 = vmatmul.mubr.f32.gmra.mrb[20].mxu0 %v1478_v31  ;;  %v1480_v14 = vmul.f32 %v1474_v7, %v1424_v15 }
 0x8f5   :  { %v1479_v32 = vmul.f32 %v1473_v11, %v1419_v18 }
 0x8f7   :  { %3618 = vmatprep.mubr.f32.mxu0 %v1479_v32  ;;  %v3210_v32 = vld [vmem:[%s5324_s2 + $0x68] sm:$0xff] }
 0x8f8   :  { %3619 = vmatmul.mubr.f32.gmra.mrb[22].mxu0 %v1480_v14  ;;  %v3211_v14 = vld [vmem:[%s5324_s2 + $0x70] sm:$0xff] }
 0x9c2   :  { %v3614_v55 = vpop.f32.mrb[18].mxu0 }
 0x9c3   :  { %v1581_v35 = vadd.f32 %v3614_v55, %v4749_v12  ;;  %v1551_v46 = vpop.f32.mrb[19].mxu0  ;;  %v3879_v55 = vpack.c.bf16 %v3211_v14, %v3210_v32 }
 0x9c4   :  { %v1580_v26 = vadd.f32 %v1551_v46, %v4751_v52 }
 0x9c5   :  { %v4863_v16 = vadd.f32 %v3205_v23, %v1581_v35  ;;  %3880 = vmatprep.subr.bf16.mxu1 %v3879_v55  ;;  %v3213_v35 = vld [vmem:[%s5324_s2 + $0x80] sm:$0xff] }
 0x9c6   :  { %v4865_v62 = vadd.f32 %v3205_v23, %v1580_v26  ;;  %3882 = vmatpush3.bf16.msra.mxu1 %v3879_v55 }
 0x9c7   :  { %v3617_v17 = vpop.f32.mrb[20].mxu0  ;;  %v1603_v15 = vsel %vm260_vm1, %v4863_v16, 0.0 }
 0x9c8   :  { %v1583_v18 = vadd.f32 %v3617_v17, %v4759_v60  ;;  %v1561_v22 = vpop.f32.mrb[21].mxu0  ;;  %1604 = vadd.xlane.f32.xlu1 %v1603_v15  ;;  %v1600_v34 = vsel %vm260_vm1, %v4865_v62, 0.0 }
 0x9c9   :  { %v1582_v12 = vadd.f32 %v1561_v22, %v4761_v19  ;;  %1601 = vadd.xlane.f32.xlu0 %v1600_v34 }
 0x9ca   :  { %v4873_v2 = vadd.f32 %v3205_v23, %v1583_v18 }
 0x9cb   :  { %v4875_v52 = vadd.f32 %v3205_v23, %v1582_v12  ;;  %v3620_v54 = vpop.f32.mrb[22].mxu0 }
 0x9cc   :  { %v1585_v36 = vadd.f32 %v3620_v54, %v4769_v0  ;;  %v1571_v20 = vpop.f32.mrb[23].mxu0  ;;  %v1609_v37 = vsel %vm260_vm1, %v4873_v2, 0.0 }
 0x9cd   :  { %v1584_v60 = vadd.f32 %v1571_v20, %v4771_v13  ;;  %1610 = vadd.xlane.f32.xlu1 %v1609_v37  ;;  %v1606_v29 = vsel %vm260_vm1, %v4875_v52, 0.0 }
 0x9ce   :  { %v4883_v4 = vadd.f32 %v3205_v23, %v1585_v36  ;;  %1607 = vadd.xlane.f32.xlu0 %v1606_v29 }
 0x9cf   :  { %v4885_v19 = vadd.f32 %v3205_v23, %v1584_v60  ;;  %v3212_v23 = vld [vmem:[%s5324_s2 + $0x78] sm:$0xff] }
 0x9d0   :  { %v1615_v5 = vsel %vm260_vm1, %v4883_v4, 0.0  ;;  %v3883_v46 = vpack.c.bf16 %v3213_v35, %v3212_v23 }
 0x9d1   :  { %1616 = vadd.xlane.f32.xlu1 %v1615_v5  ;;  %v1612_v0 = vsel %vm260_vm1, %v4885_v19, 0.0 }
 0x9d2   :  { %1613 = vadd.xlane.f32.xlu0 %v1612_v0  ;;  %3884 = vmatprep.subr.bf16.mxu1 %v3883_v46 }
 0x9d3   :  { %3886 = vmatpush3.bf16.msra.mxu1 %v3883_v46 }
 0xa55   :  { %v1605_v57 = vpop.xlane.xlu1 %1604 }
 0xa56   :  { %v1619_v24 = vmul.f32 0.03125, %v1605_v57  ;;  %v1602_v13 = vpop.xlane.xlu0 %1601 }
 0xa57   :  { %v1618_v42 = vmul.f32 0.03125, %v1602_v13 }
 0xa58   :  { %v4892_v43 = vsub.f32 %v4863_v16, %v1619_v24 }
 0xa59   :  { %v4895_v39 = vsub.f32 %v4865_v62, %v1618_v42 }
 0xa5a   :  { %v1611_v47 = vpop.xlane.xlu1 %1610  ;;  %v1631_v30 = vmul.f32 %v4892_v43, %v4892_v43 }
 0xa5b   :  { %v1621_v27 = vmul.f32 0.03125, %v1611_v47  ;;  %v1608_v48 = vpop.xlane.xlu0 %1607  ;;  %v1630_v50 = vmul.f32 %v4895_v39, %v4895_v39  ;;  %v3208_v47 = vld [vmem:[%s5324_s2 + $0xc8] ss:$0 sm:$0xff] }
 0xa5c   :  { %v1620_v41 = vmul.f32 0.03125, %v1608_v48  ;;  %v1639_v33 = vsel %vm260_vm1, %v1631_v30, 0.0 }
 0xa5d   :  { %v4903_v56 = vsub.f32 %v4873_v2, %v1621_v27  ;;  %1640 = vadd.xlane.f32.xlu1 %v1639_v33  ;;  %v1636_v28 = vsel %vm260_vm1, %v1630_v50, 0.0  ;;  %v3209_v50 = vld [vmem:[%s5324_s2 + $0xc9] ss:$0 sm:$0xff] }
 0xa5e   :  { %v4907_v51 = vsub.f32 %v4875_v52, %v1620_v41  ;;  %v1617_v6 = vpop.xlane.xlu1 %1616  ;;  %1637 = vadd.xlane.f32.xlu0 %v1636_v28 }
 0xa5f   :  { %v1623_v53 = vmul.f32 0.03125, %v1617_v6  ;;  %v1614_v38 = vpop.xlane.xlu0 %1613  ;;  %v1633_v58 = vmul.f32 %v4903_v56, %v4903_v56 }
 0xa60   :  { %v1622_v59 = vmul.f32 0.03125, %v1614_v38  ;;  %v1632_v21 = vmul.f32 %v4907_v51, %v4907_v51 }
 0xa61   :  { %v4914_v45 = vsub.f32 %v4883_v4, %v1623_v53  ;;  %v1645_v44 = vsel %vm260_vm1, %v1633_v58, 0.0 }
 0xa62   :  { %v4918_v25 = vsub.f32 %v4885_v19, %v1622_v59  ;;  %1646 = vadd.xlane.f32.xlu1 %v1645_v44  ;;  %v1642_v63 = vsel %vm260_vm1, %v1632_v21, 0.0 }
 0xa63   :  { %1643 = vadd.xlane.f32.xlu0 %v1642_v63  ;;  %v1635_v61 = vmul.f32 %v4914_v45, %v4914_v45 }
 0xa64   :  { %v1634_v31 = vmul.f32 %v4918_v25, %v4918_v25 }
 0xa65   :  { %v1651_v7 = vsel %vm260_vm1, %v1635_v61, 0.0 }
 0xa66   :  { %1652 = vadd.xlane.f32.xlu1 %v1651_v7  ;;  %v1648_v11 = vsel %vm260_vm1, %v1634_v31, 0.0 }
 0xa67   :  { %1649 = vadd.xlane.f32.xlu0 %v1648_v11 }
 0xaea   :  { %v1641_v26 = vpop.xlane.xlu1 %1640 }
 0xaeb   :  { %v1655_v17 = vmul.f32 0.03125, %v1641_v26  ;;  %v1638_v15 = vpop.xlane.xlu0 %1637 }
 0xaec   :  { %v1654_v18 = vmul.f32 0.03125, %v1638_v15 }
 0xaed   :  { %v1661_v22 = vadd.f32 1e-05, %v1655_v17 }
 0xaee   :  { %v1660_v34 = vadd.f32 1e-05, %v1654_v18 }
 0xaef   :  { %4207 = vrsqrt.f32 %v1661_v22  ;;  %v1647_v12 = vpop.xlane.xlu1 %1646 }
 0xaf0   :  { %4209 = vrsqrt.f32 %v1660_v34  ;;  %v1657_v54 = vmul.f32 0.03125, %v1647_v12  ;;  %v1644_v36 = vpop.xlane.xlu0 %1643 }
 0xaf1   :  { %v1656_v20 = vmul.f32 0.03125, %v1644_v36 }
 0xaf2   :  { %v1663_v37 = vadd.f32 1e-05, %v1657_v54 }
 0xaf3   :  { %v1662_v60 = vadd.f32 1e-05, %v1656_v20  ;;  %v1653_v29 = vpop.xlane.xlu1 %1652 }
 0xaf4   :  { %4211 = vrsqrt.f32 %v1663_v37  ;;  %v1659_v5 = vmul.f32 0.03125, %v1653_v29  ;;  %v1650_v0 = vpop.xlane.xlu0 %1649 }
 0xaf5   :  { %4213 = vrsqrt.f32 %v1662_v60  ;;  %v1658_v57 = vmul.f32 0.03125, %v1650_v0 }
 0xaf6   :  { %v1665_v24 = vadd.f32 1e-05, %v1659_v5 }
 0xaf7   :  { %v1664_v13 = vadd.f32 1e-05, %v1658_v57 }
 0xaf8   :  { %4215 = vrsqrt.f32 %v1665_v24 }
 0xaf9   :  { %v4208_v42 = vpop.eup %4207  ;;  %4217 = vrsqrt.f32 %v1664_v13 }
 0xafa   :  { %v4210_v30 = vpop.eup %4209  ;;  %v1673_v27 = vmul.f32 %v4208_v42, %v4892_v43 }
 0xafb   :  { %v1672_v48 = vmul.f32 %v4210_v30, %v4895_v39 }
 0xafc   :  { %v1683_v41 = vmul.f32 %v3208_v47, %v1673_v27 }
 0xafd   :  { %v1682_v33 = vmul.f32 %v3208_v47, %v1672_v48 }
 0xafe   :  { %v4212_v28 = vpop.eup %4211  ;;  %v1693_v58 = vadd.f32 %v3209_v50, %v1683_v41 }
 0xaff   :  { %v4214_v6 = vpop.eup %4213  ;;  %v1692_v53 = vadd.f32 %v3209_v50, %v1682_v33  ;;  %v1675_v38 = vmul.f32 %v4212_v28, %v4903_v56 }
 0xb00   :  { %v1674_v59 = vmul.f32 %v4214_v6, %v4907_v51 }
 0xb01   :  { %3629 = vmatprep.mubr.msk.f32.mxu1 %vm260_vm1, %v1692_v53  ;;  %v1685_v21 = vmul.f32 %v3208_v47, %v1675_v38 }
 0xb02   :  { %v4216_v43 = vpop.eup %4215  ;;  %3630 = vmatmul.mubr.msk.f32.vlgmr.msra.gmra.mrb[18].mxu1 %vm260_vm1, %v1693_v58  ;;  %v1684_v39 = vmul.f32 %v3208_v47, %v1674_v59 }
 0xb03   :  { %v4218_v44 = vpop.eup %4217  ;;  %v1677_v63 = vmul.f32 %v4216_v43, %v4914_v45  ;;  %v1695_v7 = vadd.f32 %v3209_v50, %v1685_v21  ;;  %v3215_v45 = vld [vmem:[%s5324_s2 + $0xca] ss:$0 sm:$0xff] }
 0xb04   :  { %v1694_v61 = vadd.f32 %v3209_v50, %v1684_v39  ;;  %v1676_v31 = vmul.f32 %v4218_v44, %v4918_v25 }
 0xb05   :  { %v1687_v11 = vmul.f32 %v3208_v47, %v1677_v63 }
 0xb06   :  { %3632 = vmatprep.mubr.msk.f32.mxu1 %vm260_vm1, %v1694_v61  ;;  %v1686_v56 = vmul.f32 %v3208_v47, %v1676_v31 }
 0xb07   :  { %3633 = vmatmul.mubr.msk.f32.gmra.mrb[20].mxu1 %vm260_vm1, %v1695_v7  ;;  %v1697_v32 = vadd.f32 %v3209_v50, %v1687_v11 }
 0xb08   :  { %v1696_v51 = vadd.f32 %v3209_v50, %v1686_v56 }
 0xb0a   :  { %3635 = vmatprep.mubr.msk.f32.mxu1 %vm260_vm1, %v1696_v51 }
 0xb0b   :  { %3636 = vmatmul.mubr.msk.f32.gmra.mrb[22].mxu1 %vm260_vm1, %v1697_v32 }
 0xbd5   :  { %v3631_v14 = vpop.f32.mrb[18].mxu1 }
 0xbd6   :  { %v4960_v55 = vadd.f32 %v3631_v14, %v3215_v45  ;;  %v1791_v25 = vpop.f32.mrb[19].mxu1 }
 0xbd7   :  { %v4962_v23 = vadd.f32 %v3215_v45, %v1791_v25 }
 0xbd8   :  { %v2048_v35 = vmul.f32 %v4960_v55, %v4491_v3  ;;  %v1821_v29 = vmul.f32 %v4960_v55, %v4489_v1 }
 0xbd9   :  { %3650 = vmatprep.mubr.msk.f32.mxu0 %vm260_vm1, %v4962_v23  ;;  %3671 = vmatprep.mubr.msk.f32.mxu1 %vm260_vm1, %v4962_v23  ;;  %v2047_v46 = vmul.f32 %v4962_v23, %v4491_v3  ;;  %v1820_v60 = vmul.f32 %v4962_v23, %v4489_v1 }
 0xbda   :  { %v3634_v26 = vpop.f32.mrb[20].mxu1 }
 0xbdb   :  { %v4972_v17 = vadd.f32 %v3634_v26, %v3215_v45  ;;  %v1801_v15 = vpop.f32.mrb[21].mxu1  ;;  %v4061_v18 = vpack.i.bf16 %v2048_v35, %v2047_v46  ;;  %v4071_v13 = vpack.i.bf16 %v1821_v29, %v1820_v60 }
 0xbdc   :  { %v4974_v22 = vadd.f32 %v3215_v45, %v1801_v15 }
 0xbdd   :  { %4062 = vrot.lane.b32.xlu0 %v4061_v18, %s4305_s6  ;;  %v2050_v34 = vmul.f32 %v4972_v17, %v4491_v3  ;;  %v1823_v12 = vmul.f32 %v4972_v17, %v4489_v1 }
 0xbde   :  { %v3637_v54 = vpop.f32.mrb[22].mxu1  ;;  %v2049_v36 = vmul.f32 %v4974_v22, %v4491_v3  ;;  %v1822_v20 = vmul.f32 %v4974_v22, %v4489_v1 }
 0xbdf   :  { %v1811_v37 = vpop.f32.mrb[23].mxu1  ;;  %v4989_v5 = vadd.f32 %v3637_v54, %v3215_v45 }
 0xbe0   :  { %v4991_v0 = vadd.f32 %v3215_v45, %v1811_v37  ;;  %v4066_v57 = vpack.i.bf16 %v2050_v34, %v2049_v36  ;;  %v4081_v24 = vpack.i.bf16 %v1823_v12, %v1822_v20 }
 0xbe1   :  { %v2052_v47 = vmul.f32 %v4989_v5, %v4491_v3  ;;  %v1825_v48 = vmul.f32 %v4989_v5, %v4489_v1 }
 0xbe2   :  { %4067 = vrot.lane.b32.xlu1 %v4066_v57, %s4305_s6  ;;  %4082 = vrot.lane.b32.xlu0 %v4081_v24, %s4305_s6  ;;  %v2051_v42 = vmul.f32 %v4991_v0, %v4491_v3  ;;  %v1824_v27 = vmul.f32 %v4991_v0, %v4489_v1 }
 0xbe4   :  { %v4076_v30 = vpack.i.bf16 %v2052_v47, %v2051_v42  ;;  %v4086_v50 = vpack.i.bf16 %v1825_v48, %v1824_v27 }
 0xbe6   :  { %4072 = vrot.lane.b32.xlu1 %v4071_v13, %s4305_s6 }
 0xbea   :  { %4077 = vrot.lane.b32.xlu1 %v4076_v30, %s4305_s6 }
 0xbee   :  { %4087 = vrot.lane.b32.xlu1 %v4086_v50, %s4305_s6 }
 0xc4f   :  { %v4063_v41 = vpop.permute.xlu0 %4062 }
 0xc50   :  { %v4065_v33 = vunpack.i.h.bf16 %v4063_v41  ;;  %v4064_v28 = vunpack.i.l.bf16 %v4063_v41 }
 0xc52   :  { %v3905_v6 = vpack.c.bf16 %v4065_v33, %v4064_v28 }
 0xc54   :  { %v4068_v53 = vpop.permute.xlu1 %4067  ;;  %3907 = vmatprep.subr.msk.bf16.mxu1 %vm4541_vm6, %v3905_v6  ;;  %v4083_v58 = vpop.permute.xlu0 %4082 }
 0xc55   :  { %v4070_v3 = vunpack.i.h.bf16 %v4068_v53  ;;  %v4069_v38 = vunpack.i.l.bf16 %v4068_v53  ;;  %3910 = vmatpush3.bf16.xpose.msk.msra.mxu1 %vm4541_vm6, %v3905_v6  ;;  %v4085_v21 = vunpack.i.h.bf16 %v4083_v58  ;;  %v4084_v43 = vunpack.i.l.bf16 %v4083_v58 }
 0xc57   :  { %v3911_v1 = vpack.c.bf16 %v4070_v3, %v4069_v38  ;;  %v3893_v31 = vpack.c.bf16 %v4085_v21, %v4084_v43 }
 0xc58   :  { %v4073_v59 = vpop.permute.xlu1 %4072 }
 0xc59   :  { %v4075_v39 = vunpack.i.h.bf16 %v4073_v59  ;;  %v4074_v44 = vunpack.i.l.bf16 %v4073_v59  ;;  %3913 = vmatprep.subr.msk.bf16.mxu1 %vm4541_vm6, %v3911_v1 }
 0xc5b   :  { %v3887_v63 = vpack.c.bf16 %v4075_v39, %v4074_v44 }
 0xc5c   :  { %v4078_v61 = vpop.permute.xlu1 %4077 }
 0xc5d   :  { %v4080_v7 = vunpack.i.h.bf16 %v4078_v61  ;;  %v4079_v11 = vunpack.i.l.bf16 %v4078_v61  ;;  %3889 = vmatprep.subr.msk.bf16.mxu0 %vm4541_vm6, %v3887_v63  ;;  %3916 = vmatpush3.bf16.xpose.msk.msra.mxu1 %vm4541_vm6, %v3911_v1 }
 0xc5e   :  { %3892 = vmatpush3.bf16.xpose.msk.msra.mxu0 %vm4541_vm6, %v3887_v63 }
 0xc5f   :  { %v3917_v56 = vpack.c.bf16 %v4080_v7, %v4079_v11  ;;  %3895 = vmatprep.subr.msk.bf16.mxu0 %vm4541_vm6, %v3893_v31  ;;  %v5085_v11 = vpack.i.bf16 %v4972_v17, %v4974_v22 }
 0xc60   :  { %v4088_v51 = vpop.permute.xlu1 %4087 }
 0xc61   :  { %v4090_v32 = vunpack.i.h.bf16 %v4088_v51  ;;  %v4089_v45 = vunpack.i.l.bf16 %v4088_v51  ;;  %3919 = vmatprep.subr.msk.bf16.mxu1 %vm4541_vm6, %v3917_v56 }
 0xc63   :  { %v3899_v14 = vpack.c.bf16 %v4090_v32, %v4089_v45 }
 0xc65   :  { %3922 = vmatpush3.bf16.xpose.msk.msra.mxu1 %vm4541_vm6, %v3917_v56  ;;  %v4106_v56 = vpack.i.bf16 %v4960_v55, %v4962_v23 }
 0xc66   :  { %3898 = vmatpush3.bf16.xpose.msk.msra.mxu0 %vm4541_vm6, %v3893_v31 }
 0xc67   :  { %3901 = vmatprep.subr.msk.bf16.mxu0 %vm4541_vm6, %v3899_v14 }
 0xc6c   :  { %3672 = vmatmul.mubr.msk.f32.vlgmr.msra.gmra.mrb[24].mxu1 %vm260_vm1, %v4960_v55 }
 0xc6d   :  { %3674 = vmatprep.mubr.msk.f32.mxu1 %vm260_vm1, %v4974_v22 }
 0xc6e   :  { %3904 = vmatpush3.bf16.xpose.msk.msra.mxu0 %vm4541_vm6, %v3899_v14 }
 0xc70   :  { %3675 = vmatmul.mubr.msk.f32.gmra.mrb[26].mxu1 %vm260_vm1, %v4972_v17 }
 0xc71   :  { %3677 = vmatprep.mubr.msk.f32.mxu1 %vm260_vm1, %v4991_v0 }
 0xc74   :  { %3678 = vmatmul.mubr.msk.f32.gmra.mrb[28].mxu1 %vm260_vm1, %v4989_v5 }
 0xc75   :  { %3651 = vmatmul.mubr.msk.f32.vlgmr.msra.gmra.mrb[24].mxu0 %vm260_vm1, %v4960_v55 }
 0xc76   :  { %3653 = vmatprep.mubr.msk.f32.mxu0 %vm260_vm1, %v4974_v22 }
 0xc79   :  { %3654 = vmatmul.mubr.msk.f32.gmra.mrb[26].mxu0 %vm260_vm1, %v4972_v17 }
 0xc7a   :  { %3656 = vmatprep.mubr.msk.f32.mxu0 %vm260_vm1, %v4991_v0 }
 0xc7d   :  { %3657 = vmatmul.mubr.msk.f32.gmra.mrb[28].mxu0 %vm260_vm1, %v4989_v5 }
 0xd3f   :  { %v3673_v49 = vpop.f32.mrb[24].mxu1 }
 0xd40   :  { %v2179_v25 = vmul.f32 0.25, %v3673_v49  ;;  %v2149_v35 = vpop.f32.mrb[25].mxu1 }
 0xd41   :  { %v2178_v46 = vmul.f32 0.25, %v2149_v35 }
 0xd42   :  { %v2185_v26 = vadd.f32 %v2179_v25, %v4590_v8 }
 0xd43   :  { %v3676_v15 = vpop.f32.mrb[26].mxu1  ;;  %v2184_v18 = vadd.f32 %v2178_v46, %v4590_v8 }
 0xd44   :  { %v2181_v34 = vmul.f32 0.25, %v3676_v15  ;;  %v2159_v12 = vpop.f32.mrb[27].mxu1  ;;  %v2193_v54 = vsel %vm32_vm0, %v2185_v26, -inf }
 0xd45   :  { %v2180_v36 = vmul.f32 0.25, %v2159_v12  ;;  %2194 = vmax.xlane.f32.xlu1 %v2193_v54  ;;  %v2190_v20 = vsel %vm32_vm0, %v2184_v18, -inf }
 0xd46   :  { %2191 = vmax.xlane.f32.xlu0 %v2190_v20  ;;  %v2187_v37 = vadd.f32 %v2181_v34, %v4608_v40 }
 0xd47   :  { %v3679_v60 = vpop.f32.mrb[28].mxu1  ;;  %v5057_v27 = vadd.f32 %v2180_v36, %v4590_v8 }
 0xd48   :  { %v3652_v29 = vpop.f32.mrb[24].mxu0  ;;  %v2183_v57 = vmul.f32 0.25, %v3679_v60  ;;  %v2169_v24 = vpop.f32.mrb[29].mxu1  ;;  %v2199_v13 = vsel %vm32_vm0, %v2187_v37, -inf }
 0xd49   :  { %v1970_v42 = vmul.f32 0.25, %v3652_v29  ;;  %v1940_v47 = vpop.f32.mrb[25].mxu0  ;;  %v2182_v30 = vmul.f32 0.25, %v2169_v24  ;;  %v2196_v3 = vsel %vm32_vm0, %v5057_v27, -inf }
 0xd4a   :  { %2200 = vmax.xlane.f32.xlu0 %v2199_v13  ;;  %v5060_v48 = vadd.f32 %v2183_v57, %v4608_v40  ;;  %v1969_v28 = vmul.f32 0.25, %v1940_v47 }
 0xd4b   :  { %v1976_v33 = vadd.f32 %v1970_v42, %v4590_v8  ;;  %v5068_v38 = vadd.f32 %v2182_v30, %v4608_v40 }
 0xd4c   :  { %v3655_v50 = vpop.f32.mrb[26].mxu0  ;;  %v2205_v41 = vsel %vm32_vm0, %v5060_v48, -inf  ;;  %v1975_v44 = vadd.f32 %v1969_v28, %v4590_v8 }
 0xd4d   :  { %v1972_v6 = vmul.f32 0.25, %v3655_v50  ;;  %v1950_v53 = vpop.f32.mrb[27].mxu0  ;;  %2206 = vmax.xlane.f32.xlu1 %v2205_v41  ;;  %v1984_v1 = vsel %vm32_vm0, %v1976_v33, -inf  ;;  %v2202_v39 = vsel %vm32_vm0, %v5068_v38, -inf }
 0xd4e   :  { %2197 = vmax.xlane.f32.xlu0 %v2196_v3  ;;  %v1971_v21 = vmul.f32 0.25, %v1950_v53  ;;  %v1981_v61 = vsel %vm32_vm0, %v1975_v44, -inf }
 0xd4f   :  { %v1978_v59 = vadd.f32 %v1972_v6, %v4608_v40 }
 0xd50   :  { %v5070_v58 = vpop.f32.mrb[28].mxu0  ;;  %v1977_v31 = vadd.f32 %v1971_v21, %v4590_v8  ;;  %v5095_v8 = vpack.i.bf16 %v4989_v5, %v4991_v0 }
 0xd51   :  { %v5074_v43 = vpop.f32.mrb[29].mxu0  ;;  %1985 = vmax.xlane.f32.xlu1 %v1984_v1  ;;  %v1990_v63 = vsel %vm32_vm0, %v1978_v59, -inf }
 0xd52   :  { %2203 = vmax.xlane.f32.xlu0 %v2202_v39  ;;  %v1987_v7 = vsel %vm32_vm0, %v1977_v31, -inf }
 0xd55   :  { %1991 = vmax.xlane.f32.xlu1 %v1990_v63 }
 0xd56   :  { %1982 = vmax.xlane.f32.xlu0 %v1981_v61 }
 0xd5a   :  { %1988 = vmax.xlane.f32.xlu0 %v1987_v7 }
 0xd66   :  { %4097 = vrot.lane.b32.xlu1 %v5085_v11, %s4304_s25 }
 0xd6a   :  { %4107 = vrot.lane.b32.xlu1 %v4106_v56, %s4307_s7 }
 0xd70   :  { %4092 = vrot.lane.b32.xlu0 %v4106_v56, %s4304_s25 }
 0xd74   :  { %4102 = vrot.lane.b32.xlu0 %v5095_v8, %s4304_s25 }
 0xdd2   :  { %v2195_v51 = vpop.xlane.xlu1 %2194 }
 0xdd3   :  { %v2209_v17 = vsub.f32 %v2185_v26, %v2195_v51  ;;  %v2192_v22 = vpop.xlane.xlu0 %2191 }
 0xdd4   :  { %v2208_v32 = vsub.f32 %v2184_v18, %v2192_v22 }
 0xdd5   :  { %v2216_v45 = vmul.f32 1.442695, %v2209_v17 }
 0xdd6   :  { %v2214_v14 = vmul.f32 1.442695, %v2208_v32 }
 0xdd7   :  { %4219 = vpow2.f32 %v2216_v45  ;;  %v2201_v49 = vpop.xlane.xlu0 %2200 }
 0xdd8   :  { %4221 = vpow2.f32 %v2214_v14  ;;  %v2211_v25 = vsub.f32 %v2187_v37, %v2201_v49 }
 0xdda   :  { %v2207_v55 = vpop.xlane.xlu1 %2206  ;;  %v2220_v0 = vmul.f32 1.442695, %v2211_v25 }
 0xddb   :  { %v2198_v23 = vpop.xlane.xlu0 %2197  ;;  %v2213_v30 = vsub.f32 %v5060_v48, %v2207_v55 }
 0xddc   :  { %v2210_v26 = vsub.f32 %v5057_v27, %v2198_v23 }
 0xdde   :  { %v1986_v35 = vpop.xlane.xlu1 %1985  ;;  %v2218_v57 = vmul.f32 1.442695, %v2210_v26  ;;  %v1973_v26 = vmul.f32 0.25, %v5074_v43 }
 0xddf   :  { %v2000_v46 = vsub.f32 %v1976_v33, %v1986_v35  ;;  %v2204_v15 = vpop.xlane.xlu0 %2203 }
 0xde0   :  { %v2212_v24 = vsub.f32 %v5068_v38, %v2204_v15 }
 0xde1   :  { %v5099_v5 = vpop.eup %4219  ;;  %v2007_v34 = vmul.f32 1.442695, %v2000_v46 }
 0xde2   :  { %v5101_v12 = vpop.eup %4221  ;;  %v1992_v18 = vpop.xlane.xlu1 %1991  ;;  %v2229_v54 = vsel %vm32_vm0, %v5099_v5, 0.0  ;;  %v2222_v50 = vmul.f32 1.442695, %v2212_v24 }
 0xde3   :  { %4223 = vpow2.f32 %v2007_v34  ;;  %v2002_v36 = vsub.f32 %v1978_v59, %v1992_v18  ;;  %2230 = vadd.xlane.f32.xlu1 %v2229_v54  ;;  %v1983_v20 = vpop.xlane.xlu0 %1982  ;;  %v2226_v37 = vsel %vm32_vm0, %v5101_v12, 0.0  ;;  %v2224_v59 = vmul.f32 1.442695, %v2213_v30 }
 0xde4   :  { %v1999_v60 = vsub.f32 %v1975_v44, %v1983_v20  ;;  %2227 = vadd.xlane.f32.xlu0 %v2226_v37  ;;  %4225 = vpow2.f32 %v2220_v0  ;;  %v1974_v18 = vmul.f32 0.25, %v5070_v58  ;;  %v5149_v54 = vadd.f32 %v1973_v26, %v4608_v40 }
 0xde5   :  { %v2011_v29 = vmul.f32 1.442695, %v2002_v36 }
 0xde6   :  { %v2005_v13 = vmul.f32 1.442695, %v1999_v60  ;;  %v4098_v27 = vpop.permute.xlu1 %4097  ;;  %v5152_v36 = vadd.f32 %v1974_v18, %v4608_v40  ;;  %v1993_v20 = vsel %vm32_vm0, %v5149_v54, -inf }
 0xde7   :  { %v1989_v42 = vpop.xlane.xlu0 %1988  ;;  %v4100_v28 = vunpack.i.h.bf16 %v4098_v27  ;;  %v4099_v6 = vunpack.i.l.bf16 %v4098_v27 }
 0xde8   :  { %4227 = vpow2.f32 %v2005_v13  ;;  %v2001_v47 = vsub.f32 %v1977_v31, %v1989_v42 }
 0xde9   :  { %4229 = vpow2.f32 %v2011_v29  ;;  %v3927_v44 = vpack.c.bf16 %v4100_v28, %v4099_v6 }
 0xdea   :  { %4231 = vpow2.f32 %v2218_v57  ;;  %v2009_v41 = vmul.f32 1.442695, %v2001_v47  ;;  %v4108_v31 = vpop.permute.xlu1 %4107 }
 0xdeb   :  { %v4093_v33 = vpop.permute.xlu0 %4092  ;;  %v4110_v32 = vunpack.i.h.bf16 %v4108_v31  ;;  %v4109_v45 = vunpack.i.l.bf16 %v4108_v31 }
 0xdec   :  { %v4095_v53 = vunpack.i.h.bf16 %v4093_v33  ;;  %v4094_v3 = vunpack.i.l.bf16 %v4093_v33  ;;  %4233 = vpow2.f32 %v2009_v41 }
 0xded   :  { %v5110_v1 = vpop.eup %4223  ;;  %4235 = vpow2.f32 %v2222_v50  ;;  %v3935_v35 = vpack.c.bf16 %v4110_v32, %v4109_v45 }
 0xdee   :  { %v3923_v38 = vpack.c.bf16 %v4095_v53, %v4094_v3  ;;  %v2020_v21 = vsel %vm32_vm0, %v5110_v1, 0.0  ;;  %v5114_v48 = vpop.eup %4225  ;;  %4237 = vpow2.f32 %v2224_v59 }
 0xdef   :  { %2021 = vadd.xlane.f32.xlu1 %v2020_v21  ;;  %v4103_v39 = vpop.permute.xlu0 %4102  ;;  %v2235_v56 = vsel %vm32_vm0, %v5114_v48, 0.0 }
 0xdf0   :  { %v4105_v63 = vunpack.i.h.bf16 %v4103_v39  ;;  %v4104_v61 = vunpack.i.l.bf16 %v4103_v39  ;;  %3924 = vmatprep.subr.bf16.mxu0 %v3923_v38 }
 0xdf1   :  { %3926 = vmatpush3.bf16.msra.mxu0 %v3923_v38 }
 0xdf2   :  { %v5116_v7 = vpop.eup %4227  ;;  %3928 = vmatprep.subr.bf16.mxu0 %v3927_v44  ;;  %v3931_v14 = vpack.c.bf16 %v4105_v63, %v4104_v61 }
 0xdf3   :  { %v5120_v51 = vpop.eup %4229  ;;  %2236 = vadd.xlane.f32.xlu1 %v2235_v56  ;;  %v2017_v17 = vsel %vm32_vm0, %v5116_v7, 0.0 }
 0xdf4   :  { %v5124_v22 = vpop.eup %4231  ;;  %2018 = vadd.xlane.f32.xlu0 %v2017_v17  ;;  %v2026_v49 = vsel %vm32_vm0, %v5120_v51, 0.0 }
 0xdf5   :  { %3930 = vmatpush3.bf16.msra.mxu0 %v3927_v44  ;;  %v2232_v23 = vsel %vm32_vm0, %v5124_v22, 0.0 }
 0xdf6   :  { %3932 = vmatprep.subr.bf16.mxu0 %v3931_v14  ;;  %v5128_v55 = vpop.eup %4233 }
 0xdf7   :  { %2027 = vadd.xlane.f32.xlu1 %v2026_v49  ;;  %v5132_v25 = vpop.eup %4235  ;;  %v2023_v46 = vsel %vm32_vm0, %v5128_v55, 0.0 }
 0xdf8   :  { %2233 = vadd.xlane.f32.xlu0 %v2232_v23  ;;  %v5136_v15 = vpop.eup %4237  ;;  %v2238_v0 = vsel %vm32_vm0, %v5132_v25, 0.0 }
 0xdf9   :  { %3934 = vmatpush3.bf16.msra.mxu0 %v3931_v14  ;;  %v2241_v34 = vsel %vm32_vm0, %v5136_v15, 0.0 }
 0xdfa   :  { %3936 = vmatprep.subr.bf16.mxu0 %v3935_v35 }
 0xdfb   :  { %2024 = vadd.xlane.f32.xlu1 %v2023_v46 }
 0xdfc   :  { %2239 = vadd.xlane.f32.xlu0 %v2238_v0 }
 0xdff   :  { %2242 = vadd.xlane.f32.xlu1 %v2241_v34 }
 0xe10   :  { %4117 = vrot.lane.b32.xlu1 %v5095_v8, %s4307_s7  ;;  %v1996_v8 = vsel %vm32_vm0, %v5152_v36, -inf }
 0xe12   :  { %4112 = vrot.lane.b32.xlu0 %v5085_v11, %s4307_s7 }
 0xe31   :  { %1994 = vmax.xlane.f32.xlu0 %v1993_v20 }
 0xe34   :  { %1997 = vmax.xlane.f32.xlu1 %v1996_v8  ;;  %v3259_v8 = vld [vmem:[%s5324_s2 + $0xcb] ss:$0 sm:$0xff] }
 0xe70   :  { %v2231_v37 = vpop.xlane.xlu1 %2230 }
 0xe71   :  { %4239 = vrcp.f32 %v2231_v37  ;;  %v2228_v11 = vpop.xlane.xlu0 %2227 }
 0xe72   :  { %4241 = vrcp.f32 %v2228_v11 }
 0xe7b   :  { %v4240_v43 = vpop.eup %4239 }
 0xe7c   :  { %v4242_v58 = vpop.eup %4241  ;;  %v2022_v60 = vpop.xlane.xlu1 %2021  ;;  %v2251_v40 = vmul.f32 %v4240_v43, %v5099_v5 }
 0xe7d   :  { %v2250_v29 = vmul.f32 %v4242_v58, %v5101_v12 }
 0xe7f   :  { %3692 = vmatprep.mubr.msk.f32.mxu0 %vm32_vm0, %v2250_v29 }
 0xe80   :  { %v2237_v57 = vpop.xlane.xlu1 %2236  ;;  %3693 = vmatmul.mubr.msk.f32.vlgmr.msra.gmra.mrb[30].mxu0 %vm32_vm0, %v2251_v40 }
 0xe81   :  { %3938 = vmatpush3.bf16.msra.mxu0 %v3935_v35  ;;  %v2019_v24 = vpop.xlane.xlu0 %2018  ;;  %4243 = vrcp.f32 %v2237_v57 }
 0xe84   :  { %v2028_v13 = vpop.xlane.xlu1 %2027 }
 0xe85   :  { %v2234_v42 = vpop.xlane.xlu0 %2233 }
 0xe86   :  { %4245 = vrcp.f32 %v2234_v42 }
 0xe88   :  { %v2025_v47 = vpop.xlane.xlu1 %2024 }
 0xe89   :  { %v2240_v30 = vpop.xlane.xlu0 %2239 }
 0xe8a   :  { %4247 = vrcp.f32 %v2240_v30 }
 0xe8b   :  { %4249 = vrcp.f32 %v2019_v24  ;;  %v4244_v41 = vpop.eup %4243 }
 0xe8c   :  { %v2243_v27 = vpop.xlane.xlu1 %2242  ;;  %v2253_v38 = vmul.f32 %v4244_v41, %v5114_v48 }
 0xe8d   :  { %4251 = vrcp.f32 %v2243_v27  ;;  %v4113_v12 = vpop.permute.xlu0 %4112 }
 0xe8e   :  { %v4115_v50 = vunpack.i.h.bf16 %v4113_v12  ;;  %v4114_v5 = vunpack.i.l.bf16 %v4113_v12  ;;  %4253 = vrcp.f32 %v2022_v60 }
 0xe8f   :  { %4255 = vrcp.f32 %v2025_v47 }
 0xe90   :  { %v4246_v33 = vpop.eup %4245  ;;  %v3939_v28 = vpack.c.bf16 %v4115_v50, %v4114_v5  ;;  %v4118_v6 = vpop.permute.xlu1 %4117  ;;  %4257 = vrcp.f32 %v2028_v13 }
 0xe91   :  { %v4120_v53 = vunpack.i.h.bf16 %v4118_v6  ;;  %v4119_v3 = vunpack.i.l.bf16 %v4118_v6  ;;  %v2252_v59 = vmul.f32 %v4246_v33, %v5124_v22 }
 0xe92   :  { %3940 = vmatprep.subr.bf16.mxu0 %v3939_v28 }
 0xe93   :  { %v3943_v21 = vpack.c.bf16 %v4120_v53, %v4119_v3  ;;  %3695 = vmatprep.mubr.msk.f32.mxu0 %vm32_vm0, %v2252_v59  ;;  %3942 = vmatpush3.bf16.msra.mxu0 %v3939_v28 }
 0xe94   :  { %v4248_v39 = vpop.eup %4247  ;;  %3696 = vmatmul.mubr.msk.f32.gmra.mrb[32].mxu0 %vm32_vm0, %v2253_v38 }
 0xe95   :  { %3944 = vmatprep.subr.bf16.mxu0 %v3943_v21  ;;  %v2254_v44 = vmul.f32 %v4248_v39, %v5132_v25  ;;  %v4250_v63 = vpop.eup %4249 }
 0xe96   :  { %v2041_v48 = vmul.f32 %v4250_v63, %v5116_v7 }
 0xe97   :  { %v4252_v61 = vpop.eup %4251  ;;  %3698 = vmatprep.mubr.msk.f32.mxu0 %vm32_vm0, %v2254_v44  ;;  %3946 = vmatpush3.bf16.msra.mxu0 %v3943_v21 }
 0xe98   :  { %v2255_v31 = vmul.f32 %v4252_v61, %v5136_v15  ;;  %v4254_v56 = vpop.eup %4253 }
 0xe99   :  { %v4256_v17 = vpop.eup %4255  ;;  %v2042_v22 = vmul.f32 %v4254_v56, %v5110_v1  ;;  %v3264_v56 = vld [vmem:[%s5324_s2 + $0x88] sm:$0xff] }
 0xe9a   :  { %3699 = vmatmul.mubr.msk.f32.gmra.mrb[34].mxu0 %vm32_vm0, %v2255_v31  ;;  %v4258_v32 = vpop.eup %4257  ;;  %v2043_v45 = vmul.f32 %v4256_v17, %v5128_v55 }
 0xe9b   :  { %3713 = vmatprep.mubr.msk.f32.mxu0 %vm32_vm0, %v2041_v48  ;;  %v2044_v14 = vmul.f32 %v4258_v32, %v5120_v51  ;;  %v3265_v48 = vld [vmem:[%s5324_s2 + $0x90] sm:$0xff]  ;;  %v3267_v32 = vld [vmem:[%s5324_s2 + $0xa0] sm:$0xff] }
 0xe9c   :  { %v3947_v17 = vpack.c.bf16 %v3265_v48, %v3264_v56 }
 0xe9e   :  { %3714 = vmatmul.mubr.msk.f32.vlgmr.msra.gmra.mrb[30].mxu0 %vm32_vm0, %v2042_v22  ;;  %3948 = vmatprep.subr.bf16.mxu1 %v3947_v17  ;;  %v3266_v22 = vld [vmem:[%s5324_s2 + $0x98] sm:$0xff] }
 0xe9f   :  { %3716 = vmatprep.mubr.msk.f32.mxu0 %vm32_vm0, %v2043_v45  ;;  %3950 = vmatpush3.bf16.msra.mxu1 %v3947_v17  ;;  %v3951_v45 = vpack.c.bf16 %v3267_v32, %v3266_v22 }
 0xea1   :  { %3952 = vmatprep.subr.bf16.mxu1 %v3951_v45 }
 0xea2   :  { %3717 = vmatmul.mubr.msk.f32.gmra.mrb[32].mxu0 %vm32_vm0, %v2044_v14 }
 0xea3   :  { %3954 = vmatpush3.bf16.msra.mxu1 %v3951_v45 }
 0xebe   :  { %v1995_v49 = vpop.xlane.xlu0 %1994 }
 0xebf   :  { %v2003_v7 = vsub.f32 %v5149_v54, %v1995_v49 }
 0xec1   :  { %v2013_v23 = vmul.f32 1.442695, %v2003_v7  ;;  %v1998_v25 = vpop.xlane.xlu1 %1997 }
 0xec2   :  { %v2004_v35 = vsub.f32 %v5152_v36, %v1998_v25 }
 0xec3   :  { %4259 = vpow2.f32 %v2013_v23 }
 0xec4   :  { %v2015_v1 = vmul.f32 1.442695, %v2004_v35 }
 0xec6   :  { %4261 = vpow2.f32 %v2015_v1 }
 0xecd   :  { %v4260_v46 = vpop.eup %4259 }
 0xece   :  { %v2029_v55 = vsel %vm32_vm0, %v4260_v46, 0.0 }
 0xecf   :  { %2030 = vadd.xlane.f32.xlu0 %v2029_v55 }
 0xed0   :  { %v4262_v15 = vpop.eup %4261 }
 0xed1   :  { %v2032_v0 = vsel %vm32_vm0, %v4262_v15, 0.0 }
 0xed3   :  { %2033 = vadd.xlane.f32.xlu0 %v2032_v0 }
 0xf5c   :  { %v2031_v51 = vpop.xlane.xlu0 %2030 }
 0xf5d   :  { %4263 = vrcp.f32 %v2031_v51 }
 0xf60   :  { %v2034_v34 = vpop.xlane.xlu0 %2033 }
 0xf61   :  { %4265 = vrcp.f32 %v2034_v34 }
 0xf67   :  { %v4264_v26 = vpop.eup %4263 }
 0xf68   :  { %v2045_v18 = vmul.f32 %v4264_v26, %v4260_v46 }
 0xf6a   :  { %3719 = vmatprep.mubr.msk.f32.mxu0 %vm32_vm0, %v2045_v18 }
 0xf6b   :  { %v4266_v54 = vpop.eup %4265 }
 0xf6c   :  { %v2046_v36 = vmul.f32 %v4266_v54, %v4262_v15 }
 0xf6e   :  { %3720 = vmatmul.mubr.msk.f32.gmra.mrb[34].mxu0 %vm32_vm0, %v2046_v36  ;;  %vm3020_vm0 = vcmask 1040384  }
 0xf6f   :  { %3780 = vmatprep.mubr.msk.f32.mxu0 %vm4309_vm11, %v4303_v10 }
 0xf71   :  { %v3715_v20 = vpop.f32.mrb[30].mxu0 }
 0xf72   :  { %v2519_v37 = vadd.f32 %v3715_v20, %v4863_v16  ;;  %v2489_v11 = vpop.f32.mrb[31].mxu0 }
 0xf73   :  { %v2518_v43 = vadd.f32 %v2489_v11, %v4865_v62 }
 0xf74   :  { %v2530_v58 = vadd.f32 %v3259_v8, %v2519_v37  ;;  %v3262_v37 = vld [vmem:[%s5324_s2 + $0xcc] ss:$0 sm:$0xff] }
 0xf75   :  { %v5189_v60 = vadd.f32 %v3259_v8, %v2518_v43  ;;  %v3718_v29 = vpop.f32.mrb[32].mxu0 }
 0xf76   :  { %v2521_v40 = vadd.f32 %v3718_v29, %v4873_v2  ;;  %v2499_v57 = vpop.f32.mrb[33].mxu0  ;;  %v2540_v24 = vsel %vm260_vm1, %v2530_v58, 0.0  ;;  %v3263_v29 = vld [vmem:[%s5324_s2 + $0xcd] ss:$0 sm:$0xff] }
 0xf77   :  { %v2520_v13 = vadd.f32 %v2499_v57, %v4875_v52  ;;  %2541 = vadd.xlane.f32.xlu1 %v2540_v24  ;;  %v2537_v42 = vsel %vm260_vm1, %v5189_v60, 0.0 }
 0xf78   :  { %v5196_v47 = vadd.f32 %v3259_v8, %v2521_v40  ;;  %2538 = vadd.xlane.f32.xlu0 %v2537_v42 }
 0xf79   :  { %v2531_v16 = vadd.f32 %v3259_v8, %v2520_v13 }
 0xf7a   :  { %v2546_v62 = vsel %vm260_vm1, %v5196_v47, 0.0 }
 0xf7b   :  { %2547 = vadd.xlane.f32.xlu1 %v2546_v62  ;;  %v2543_v30 = vsel %vm260_vm1, %v2531_v16, 0.0 }
 0xf7c   :  { %2544 = vadd.xlane.f32.xlu0 %v2543_v30 }
0x1004   :  { %v2542_v2 = vpop.xlane.xlu1 %2541 }
0x1005   :  { %v2556_v27 = vmul.f32 0.03125, %v2542_v2  ;;  %v2539_v12 = vpop.xlane.xlu0 %2538 }
0x1006   :  { %v2555_v50 = vmul.f32 0.03125, %v2539_v12 }
0x1007   :  { %v2562_v52 = vsub.f32 %v2530_v58, %v2556_v27 }
0x1008   :  { %v2561_v5 = vsub.f32 %v5189_v60, %v2555_v50  ;;  %v2548_v41 = vpop.xlane.xlu1 %2547 }
0x1009   :  { %v2558_v33 = vmul.f32 0.03125, %v2548_v41  ;;  %v2545_v28 = vpop.xlane.xlu0 %2544  ;;  %v2568_v6 = vmul.f32 %v2562_v52, %v2562_v52 }
0x100a   :  { %v2557_v53 = vmul.f32 0.03125, %v2545_v28  ;;  %v2567_v3 = vmul.f32 %v2561_v5, %v2561_v5 }
0x100b   :  { %v2564_v59 = vsub.f32 %v5196_v47, %v2558_v33  ;;  %v2576_v38 = vsel %vm260_vm1, %v2568_v6, 0.0 }
0x100c   :  { %v2563_v21 = vsub.f32 %v2531_v16, %v2557_v53  ;;  %2577 = vadd.xlane.f32.xlu1 %v2576_v38  ;;  %v2573_v39 = vsel %vm260_vm1, %v2567_v3, 0.0 }
0x100d   :  { %2574 = vadd.xlane.f32.xlu0 %v2573_v39  ;;  %v2570_v44 = vmul.f32 %v2564_v59, %v2564_v59  ;;  %v3277_v39 = vld [vmem:[%s5324_s2 + $0xb0] sm:$0xff] }
0x100e   :  { %v2569_v63 = vmul.f32 %v2563_v21, %v2563_v21 }
0x100f   :  { %v2582_v61 = vsel %vm260_vm1, %v2570_v44, 0.0 }
0x1010   :  { %2583 = vadd.xlane.f32.xlu1 %v2582_v61  ;;  %v2579_v31 = vsel %vm260_vm1, %v2569_v63, 0.0  ;;  %v3278_v63 = vld [vmem:[%s5324_s2 + $0xb8] sm:$0xff]  ;;  %v3279_v61 = vld [vmem:[%s5324_s2 + $0xc0] sm:$0xff] }
0x1011   :  { %2580 = vadd.xlane.f32.xlu0 %v2579_v31  ;;  %v3959_v31 = vpack.c.bf16 %v3279_v61, %v3278_v63 }
0x1041   :  { %v3721_v14 = vpop.f32.mrb[34].mxu0 }
0x1042   :  { %v2523_v49 = vadd.f32 %v3721_v14, %v4883_v4  ;;  %v2509_v7 = vpop.f32.mrb[35].mxu0 }
0x1043   :  { %v2522_v23 = vadd.f32 %v2509_v7, %v4885_v19 }
0x1044   :  { %v2534_v25 = vadd.f32 %v3259_v8, %v2523_v49 }
0x1045   :  { %v2533_v35 = vadd.f32 %v3259_v8, %v2522_v23 }
0x1046   :  { %v2552_v1 = vsel %vm260_vm1, %v2534_v25, 0.0 }
0x1047   :  { %2553 = vadd.xlane.f32.xlu1 %v2552_v1  ;;  %v2549_v46 = vsel %vm260_vm1, %v2533_v35, 0.0 }
0x1048   :  { %2550 = vadd.xlane.f32.xlu0 %v2549_v46 }
0x1099   :  { %v2578_v55 = vpop.xlane.xlu1 %2577 }
0x109a   :  { %v2592_v15 = vmul.f32 0.03125, %v2578_v55  ;;  %v2575_v0 = vpop.xlane.xlu0 %2574  ;;  %v5252_v55 = vld [vmem:[%s5324_s2 + $0xce] ss:$0 sm:$0xff] }
0x109b   :  { %v2591_v51 = vmul.f32 0.03125, %v2575_v0 }
0x109c   :  { %v2598_v34 = vadd.f32 1e-05, %v2592_v15 }
0x109d   :  { %v2597_v26 = vadd.f32 1e-05, %v2591_v51  ;;  %v2584_v18 = vpop.xlane.xlu1 %2583 }
0x109e   :  { %4267 = vrsqrt.f32 %v2598_v34  ;;  %v2594_v4 = vmul.f32 0.03125, %v2584_v18  ;;  %v2581_v54 = vpop.xlane.xlu0 %2580 }
0x109f   :  { %4269 = vrsqrt.f32 %v2597_v26  ;;  %v2593_v19 = vmul.f32 0.03125, %v2581_v54 }
0x10a0   :  { %v2600_v36 = vadd.f32 1e-05, %v2594_v4 }
0x10a1   :  { %v2599_v20 = vadd.f32 1e-05, %v2593_v19 }
0x10a2   :  { %4271 = vrsqrt.f32 %v2600_v36 }
0x10a3   :  { %4273 = vrsqrt.f32 %v2599_v20 }
0x10a8   :  { %v4268_v8 = vpop.eup %4267 }
0x10a9   :  { %v4270_v11 = vpop.eup %4269  ;;  %v2610_v43 = vmul.f32 %v4268_v8, %v2562_v52 }
0x10aa   :  { %v2609_v58 = vmul.f32 %v4270_v11, %v2561_v5 }
0x10ab   :  { %v2620_v40 = vmul.f32 %v3262_v37, %v2610_v43 }
0x10ac   :  { %v4272_v57 = vpop.eup %4271  ;;  %v2619_v24 = vmul.f32 %v3262_v37, %v2609_v58 }
0x10ad   :  { %v4274_v13 = vpop.eup %4273  ;;  %v2612_v42 = vmul.f32 %v4272_v57, %v2564_v59  ;;  %v2630_v30 = vadd.f32 %v3263_v29, %v2620_v40 }
0x10ae   :  { %v2629_v16 = vadd.f32 %v3263_v29, %v2619_v24  ;;  %v2611_v62 = vmul.f32 %v4274_v13, %v2563_v21  ;;  %v3276_v21 = vld [vmem:[%s5324_s2 + $0xa8] sm:$0xff] }
0x10af   :  { %v2622_v2 = vmul.f32 %v3262_v37, %v2612_v42  ;;  %v3955_v44 = vpack.c.bf16 %v3277_v39, %v3276_v21 }
0x10b0   :  { %3730 = vmatprep.mubr.msk.f32.mxu1 %vm260_vm1, %v2629_v16  ;;  %v2621_v27 = vmul.f32 %v3262_v37, %v2611_v62 }
0x10b1   :  { %3731 = vmatmul.mubr.msk.f32.vlgmr.msra.gmra.mrb[30].mxu1 %vm260_vm1, %v2630_v30  ;;  %v2632_v50 = vadd.f32 %v3263_v29, %v2622_v2  ;;  %3956 = vmatprep.subr.bf16.mxu1 %v3955_v44 }
0x10b2   :  { %v2631_v12 = vadd.f32 %v3263_v29, %v2621_v27  ;;  %3958 = vmatpush3.bf16.xpose.msra.mxu1 %v3955_v44 }
0x10b3   :  { %3960 = vmatprep.subr.bf16.mxu1 %v3959_v31 }
0x10b4   :  { %3733 = vmatprep.mubr.msk.f32.mxu1 %vm260_vm1, %v2631_v12 }
0x10b5   :  { %3734 = vmatmul.mubr.msk.f32.gmra.mrb[32].mxu1 %vm260_vm1, %v2632_v50 }
0x10ba   :  { %3962 = vmatpush3.bf16.xpose.msra.mxu1 %v3959_v31  ;;  %v4308_v31 = vmov 0.0|0.0  }
0x10bb   :  { %3963 = vmatprep.subr.bf16.mxu0 %v4308_v31 }
0x10d4   :  { %v2554_v52 = vpop.xlane.xlu1 %2553 }
0x10d5   :  { %v2560_v5 = vmul.f32 0.03125, %v2554_v52  ;;  %v2551_v41 = vpop.xlane.xlu0 %2550 }
0x10d6   :  { %v2559_v33 = vmul.f32 0.03125, %v2551_v41 }
0x10d7   :  { %v2566_v28 = vsub.f32 %v2534_v25, %v2560_v5 }
0x10d8   :  { %v2565_v6 = vsub.f32 %v2533_v35, %v2559_v33 }
0x10d9   :  { %v2572_v53 = vmul.f32 %v2566_v28, %v2566_v28 }
0x10da   :  { %v2571_v3 = vmul.f32 %v2565_v6, %v2565_v6 }
0x10db   :  { %v2588_v59 = vsel %vm260_vm1, %v2572_v53, 0.0 }
0x10dc   :  { %2589 = vadd.xlane.f32.xlu1 %v2588_v59  ;;  %v2585_v38 = vsel %vm260_vm1, %v2571_v3, 0.0 }
0x10dd   :  { %2586 = vadd.xlane.f32.xlu0 %v2585_v38 }
0x1169   :  { %v2590_v56 = vpop.xlane.xlu1 %2589 }
0x116a   :  { %v2596_v48 = vmul.f32 0.03125, %v2590_v56  ;;  %v2587_v17 = vpop.xlane.xlu0 %2586  ;;  %v3024_v56 = vld [vmem:[%s5325_s3] sm:$0xff] }
0x116b   :  { %v2595_v22 = vmul.f32 0.03125, %v2587_v17  ;;  %v3026_v17 = vld [vmem:[%s5325_s3 + $0x10] sm:$0xff] }
0x116c   :  { %v2602_v32 = vadd.f32 1e-05, %v2596_v48  ;;  %v3025_v48 = vld [vmem:[%s5325_s3 + $0x8] sm:$0xff] }
0x116d   :  { %v2601_v45 = vadd.f32 1e-05, %v2595_v22  ;;  %v3964_v22 = vpack.c.bf16 %v3025_v48, %v3024_v56 }
0x116e   :  { %4275 = vrsqrt.f32 %v2602_v32  ;;  %v3027_v32 = vld [vmem:[%s5325_s3 + $0x18] sm:$0xff] }
0x116f   :  { %4277 = vrsqrt.f32 %v2601_v45  ;;  %3965 = vmatpush3.bf16.msra.mxu0 %v3964_v22  ;;  %v3967_v45 = vpack.c.bf16 %v3027_v32, %v3026_v17 }
0x1170   :  { %3966 = vmatprep.subr.bf16.mxu0 %v4308_v31 }
0x1173   :  { %3968 = vmatpush3.bf16.msra.mxu0 %v3967_v45 }
0x1174   :  { %3969 = vmatprep.subr.bf16.mxu0 %v4308_v31 }
0x1178   :  { %v4276_v14 = vpop.eup %4275 }
0x1179   :  { %v4278_v49 = vpop.eup %4277  ;;  %v2614_v7 = vmul.f32 %v4276_v14, %v2566_v28  ;;  %v3028_v14 = vld [vmem:[%s5325_s3 + $0x20] sm:$0xff] }
0x117a   :  { %v2613_v23 = vmul.f32 %v4278_v49, %v2565_v6  ;;  %v3029_v49 = vld [vmem:[%s5325_s3 + $0x28] sm:$0xff] }
0x117b   :  { %v2624_v25 = vmul.f32 %v3262_v37, %v2614_v7  ;;  %v3970_v7 = vpack.c.bf16 %v3029_v49, %v3028_v14  ;;  %v4310_v14 = vmov 0  }
0x117c   :  { %v2623_v35 = vmul.f32 %v3262_v37, %v2613_v23  ;;  %v3030_v23 = vld [vmem:[%s5325_s3 + $0x30] sm:$0xff]  ;;  %4121 = vset.pattern.permute.xlu0 %v4310_v14  ;;  %4122 = vset.pattern.permute.xlu1 %v4310_v14 }
0x117d   :  { %v2634_v46 = vadd.f32 %v3263_v29, %v2624_v25  ;;  %v3031_v25 = vld [vmem:[%s5325_s3 + $0x38] sm:$0xff]  ;;  %3971 = vmatpush3.bf16.msra.mxu0 %v3970_v7 }
0x117e   :  { %v2633_v1 = vadd.f32 %v3263_v29, %v2623_v35  ;;  %v3973_v35 = vpack.c.bf16 %v3031_v25, %v3030_v23  ;;  %3972 = vmatprep.subr.bf16.mxu0 %v4308_v31 }
0x1180   :  { %3736 = vmatprep.mubr.msk.f32.mxu1 %vm260_vm1, %v2633_v1 }
0x1181   :  { %3737 = vmatmul.mubr.msk.f32.gmra.mrb[34].mxu1 %vm260_vm1, %v2634_v46  ;;  %3974 = vmatpush3.bf16.msra.mxu0 %v3973_v35 }
0x1182   :  { %3975 = vmatprep.subr.bf16.mxu0 %v4308_v31 }
0x1184   :  { %v3732_v15 = vpop.f32.mrb[30].mxu1 }
0x1185   :  { %v2734_v0 = vadd.f32 %v3732_v15, %v5252_v55  ;;  %v2728_v51 = vpop.f32.mrb[31].mxu1 }
0x1186   :  { %v2729_v34 = vadd.f32 %v5252_v55, %v2728_v51 }
0x1187   :  { %v2758_v26 = vmul.f32 %v2734_v0, %v2734_v0 }
0x1188   :  { %v2757_v18 = vmul.f32 %v2729_v34, %v2729_v34  ;;  %v3735_v4 = vpop.f32.mrb[32].mxu1 }
0x1189   :  { %v2764_v54 = vmul.f32 %v2758_v26, %v2734_v0  ;;  %v2744_v19 = vadd.f32 %v3735_v4, %v5252_v55  ;;  %v2738_v36 = vpop.f32.mrb[33].mxu1 }
0x118a   :  { %v2763_v20 = vmul.f32 %v2757_v18, %v2729_v34  ;;  %v2739_v8 = vadd.f32 %v5252_v55, %v2738_v36 }
0x118b   :  { %v2770_v37 = vmul.f32 0.044715, %v2764_v54  ;;  %v2760_v11 = vmul.f32 %v2744_v19, %v2744_v19 }
0x118c   :  { %v2769_v43 = vmul.f32 0.044715, %v2763_v20  ;;  %v2759_v58 = vmul.f32 %v2739_v8, %v2739_v8 }
0x118d   :  { %v2776_v29 = vadd.f32 %v2770_v37, %v2734_v0  ;;  %v2766_v40 = vmul.f32 %v2760_v11, %v2744_v19 }
0x118e   :  { %v2775_v57 = vadd.f32 %v2769_v43, %v2729_v34  ;;  %v2765_v24 = vmul.f32 %v2759_v58, %v2739_v8 }
0x118f   :  { %v2782_v13 = vmul.f32 0.7978846, %v2776_v29  ;;  %v2772_v42 = vmul.f32 0.044715, %v2766_v40 }
0x1190   :  { %v2781_v16 = vmul.f32 0.7978846, %v2775_v57  ;;  %v2771_v62 = vmul.f32 0.044715, %v2765_v24  ;;  %v3032_v24 = vld [vmem:[%s5325_s3 + $0x40] sm:$0xff] }
0x1191   :  { %4279 = vtanh.f32 %v2782_v13  ;;  %v2778_v30 = vadd.f32 %v2772_v42, %v2744_v19  ;;  %v3033_v13 = vld [vmem:[%s5325_s3 + $0x48] sm:$0xff] }
0x1192   :  { %v2777_v2 = vadd.f32 %v2771_v62, %v2739_v8  ;;  %4281 = vtanh.f32 %v2781_v16  ;;  %v3976_v42 = vpack.c.bf16 %v3033_v13, %v3032_v24  ;;  %v3034_v62 = vld [vmem:[%s5325_s3 + $0x50] sm:$0xff] }
0x1193   :  { %v2784_v27 = vmul.f32 0.7978846, %v2778_v30  ;;  %v3035_v30 = vld [vmem:[%s5325_s3 + $0x58] sm:$0xff] }
0x1194   :  { %v2783_v12 = vmul.f32 0.7978846, %v2777_v2  ;;  %3977 = vmatpush3.bf16.msra.mxu0 %v3976_v42 }
0x1195   :  { %4283 = vtanh.f32 %v2784_v27  ;;  %v3281_v27 = vld [vmem:[%s5324_s2 + $0xcf] ss:$0 sm:$0xff]  ;;  %3978 = vmatprep.subr.bf16.mxu0 %v4308_v31 }
0x1196   :  { %4285 = vtanh.f32 %v2783_v12  ;;  %v3979_v12 = vpack.c.bf16 %v3035_v30, %v3034_v62 }
0x1198   :  { %3980 = vmatpush3.bf16.msra.mxu0 %v3979_v12 }
0x119b   :  { %v4280_v50 = vpop.eup %4279 }
0x119c   :  { %v4282_v52 = vpop.eup %4281  ;;  %v2794_v5 = vadd.f32 1.0, %v4280_v50 }
0x119d   :  { %v2793_v41 = vadd.f32 1.0, %v4282_v52 }
0x119e   :  { %v2800_v33 = vmul.f32 0.5, %v2794_v5 }
0x119f   :  { %v4284_v28 = vpop.eup %4283  ;;  %v2799_v6 = vmul.f32 0.5, %v2793_v41 }
0x11a0   :  { %v4286_v53 = vpop.eup %4285  ;;  %v2796_v3 = vadd.f32 1.0, %v4284_v28  ;;  %v2806_v21 = vmul.f32 %v2800_v33, %v2734_v0 }
0x11a1   :  { %v2805_v59 = vmul.f32 %v2799_v6, %v2729_v34  ;;  %v2795_v38 = vadd.f32 1.0, %v4286_v53 }
0x11a2   :  { %v2802_v39 = vmul.f32 0.5, %v2796_v3 }
0x11a3   :  { %3747 = vmatprep.mubr.f32.mxu1 %v2805_v59  ;;  %v2801_v44 = vmul.f32 0.5, %v2795_v38 }
0x11a4   :  { %3748 = vmatmul.mubr.f32.vlgmr.msra.gmra.mrb[36].mxu1 %v2806_v21  ;;  %v2808_v61 = vmul.f32 %v2802_v39, %v2744_v19 }
0x11a5   :  { %v2807_v63 = vmul.f32 %v2801_v44, %v2739_v8 }
0x11a7   :  { %3750 = vmatprep.mubr.f32.mxu1 %v2807_v63 }
0x11a8   :  { %3751 = vmatmul.mubr.f32.gmra.mrb[38].mxu1 %v2808_v61 }
0x1254   :  { %v3738_v1 = vpop.f32.mrb[34].mxu1 }
0x1255   :  { %v2754_v46 = vadd.f32 %v3738_v1, %v5252_v55  ;;  %v2748_v15 = vpop.f32.mrb[35].mxu1 }
0x1256   :  { %v2749_v0 = vadd.f32 %v5252_v55, %v2748_v15 }
0x1257   :  { %v2762_v51 = vmul.f32 %v2754_v46, %v2754_v46 }
0x1258   :  { %v2761_v34 = vmul.f32 %v2749_v0, %v2749_v0 }
0x1259   :  { %v2768_v26 = vmul.f32 %v2762_v51, %v2754_v46 }
0x125a   :  { %v2767_v18 = vmul.f32 %v2761_v34, %v2749_v0 }
0x125b   :  { %v2774_v4 = vmul.f32 0.044715, %v2768_v26 }
0x125c   :  { %v2773_v54 = vmul.f32 0.044715, %v2767_v18 }
0x125d   :  { %v2780_v19 = vadd.f32 %v2774_v4, %v2754_v46 }
0x125e   :  { %v2779_v36 = vadd.f32 %v2773_v54, %v2749_v0 }
0x125f   :  { %v2786_v20 = vmul.f32 0.7978846, %v2780_v19 }
0x1260   :  { %v2785_v8 = vmul.f32 0.7978846, %v2779_v36 }
0x1261   :  { %4287 = vtanh.f32 %v2786_v20 }
0x1262   :  { %4289 = vtanh.f32 %v2785_v8 }
0x126b   :  { %v4288_v37 = vpop.eup %4287 }
0x126c   :  { %v4290_v11 = vpop.eup %4289  ;;  %v2798_v43 = vadd.f32 1.0, %v4288_v37 }
0x126d   :  { %v2797_v58 = vadd.f32 1.0, %v4290_v11 }
0x126e   :  { %v2804_v29 = vmul.f32 0.5, %v2798_v43 }
0x126f   :  { %v2803_v40 = vmul.f32 0.5, %v2797_v58 }
0x1270   :  { %v2810_v55 = vmul.f32 %v2804_v29, %v2754_v46 }
0x1271   :  { %v2809_v57 = vmul.f32 %v2803_v40, %v2749_v0 }
0x1273   :  { %3753 = vmatprep.mubr.f32.mxu1 %v2809_v57 }
0x1274   :  { %3754 = vmatmul.mubr.f32.gmra.mrb[40].mxu1 %v2810_v55 }
0x1277   :  { %v3749_v16 = vpop.f32.mrb[36].mxu1 }
0x1278   :  { %v2881_v2 = vpop.f32.mrb[37].mxu1 }
0x1279   :  { %v2906_v50 = vadd.f32 %v2881_v2, %v5189_v60 }
0x127b   :  { %v2913_v52 = vadd.f32 %v3281_v27, %v2906_v50  ;;  %v3752_v5 = vpop.f32.mrb[38].mxu1 }
0x127c   :  { %v2907_v41 = vadd.f32 %v3752_v5, %v5196_v47  ;;  %v2890_v33 = vpop.f32.mrb[39].mxu1 }
0x127d   :  { %v2916_v28 = vrot.slane %v2913_v52, 1  ;;  %v2941_v60 = vrot.slane %v2913_v52, 2  ;;  %v2923_v59 = vmul.f32 %v2913_v52, %v2913_v52 }
0x127e   :  { %v2914_v6 = vadd.f32 %v3281_v27, %v2907_v41 }
0x127f   :  { %2959 = vrot.lane.b32.xlu1 %v2916_v28, %s4304_s25  ;;  %v2924_v47 = vsel %vm2919_vm12, %v2923_v59, 0.0  ;;  %v2948_v10 = vsel %vm2947_vm13, %v2923_v59, 0.0  ;;  %v2928_v39 = vsel %vm2927_vm14, %v2923_v59, 0.0  ;;  %v2918_v63 = vmul.f32 %v2916_v28, %v2913_v52 }
0x1280   :  { %v2969_v53 = vrot.slane %v2914_v6, 1  ;;  %v2992_v3 = vrot.slane %v2914_v6, 2  ;;  %v2975_v38 = vmul.f32 %v2914_v6, %v2914_v6  ;;  %v2943_v31 = vmul.f32 %v2941_v60, %v2913_v52 }
0x1281   :  { %v2920_v56 = vsel %vm2919_vm12, %v2918_v63, 0.0 }
0x1282   :  { %3009 = vrot.lane.b32.xlu0 %v2969_v53, %s4304_s25  ;;  %v2976_v21 = vsel %vm2919_vm12, %v2975_v38, 0.0  ;;  %v2979_v44 = vsel %vm2927_vm14, %v2975_v38, 0.0  ;;  %v2998_v61 = vsel %vm2947_vm13, %v2975_v38, 0.0  ;;  %v2971_v48 = vmul.f32 %v2969_v53, %v2914_v6 }
0x1283   :  { %3012 = vrot.lane.b32.xlu1 %v2992_v3, %s4307_s7  ;;  %v2944_v17 = vsel %vm2919_vm12, %v2943_v31, 0.0  ;;  %v2994_v22 = vmul.f32 %v2992_v3, %v2914_v6 }
0x1284   :  { %v2972_v32 = vsel %vm2919_vm12, %v2971_v48, 0.0 }
0x1285   :  { %v2995_v45 = vsel %vm2919_vm12, %v2994_v22, 0.0 }
0x1287   :  { %2962 = vrot.lane.b32.xlu1 %v2941_v60, %s4307_s7 }
0x12a1   :  { %2925 = vadd.xlane.f32.xlu0 %v2924_v47 }
0x12a5   :  { %2949 = vadd.xlane.f32.xlu0 %v2948_v10 }
0x12a9   :  { %2977 = vadd.xlane.f32.xlu0 %v2976_v21 }
0x12ab   :  { %2929 = vadd.xlane.f32.xlu1 %v2928_v39 }
0x12ad   :  { %2980 = vadd.xlane.f32.xlu0 %v2979_v44 }
0x12af   :  { %2999 = vadd.xlane.f32.xlu1 %v2998_v61  ;;  %v3282_v61 = vld [vmem:[%s5325_s3 + $0x60] ss:$0 sm:$0xff] }
0x12b1   :  { %2921 = vadd.xlane.f32.xlu0 %v2920_v56 }
0x12b3   :  { %2945 = vadd.xlane.f32.xlu1 %v2944_v17 }
0x12b5   :  { %2973 = vadd.xlane.f32.xlu0 %v2972_v32 }
0x12b7   :  { %2996 = vadd.xlane.f32.xlu1 %v2995_v45 }
0x12f1   :  { %v2960_v49 = vpop.permute.xlu1 %2959 }
0x12f2   :  { %v2965_v1 = vsel %vm260_vm1, %v2913_v52, %v2960_v49 }
0x12f4   :  { %v3010_v7 = vpop.permute.xlu0 %3009 }
0x12f5   :  { %v3015_v23 = vsel %vm260_vm1, %v2914_v6, %v3010_v7  ;;  %v3013_v25 = vpop.permute.xlu1 %3012  ;;  %vm3115_vm1 = vcmp.eq.s32.totalorder %v4459_v9, 0 }
0x12f6   :  { %v3016_v35 = vsel %vm2966_vm15, %v3015_v23, %v3013_v25 }
0x12f7   :  { %v3018_v46 = vrot.slane %v3016_v35, 7 }
0x12f9   :  { %v2963_v15 = vpop.permute.xlu1 %2962 }
0x12fa   :  { %v2967_v0 = vsel %vm2966_vm15, %v2965_v1, %v2963_v15 }
0x12fb   :  { %v3021_v51 = vsel %vm3020_vm0, %v2967_v0, %v3018_v46 }
0x12fc   :  { %3781 = vmatmul.mubr.msk.f32.vlgmr.msra.gmra.mrb[36].mxu0 %vm3041_vm2, %v3021_v51 }
0x132e   :  { %v2926_v34 = vpop.xlane.xlu0 %2925 }
0x132f   :  { %v2931_v19 = vmax.f32 %v2926_v34, 1e-16 }
0x1332   :  { %v2950_v26 = vpop.xlane.xlu0 %2949 }
0x1333   :  { %v2952_v18 = vmax.f32 %v2950_v26, 1e-16 }
0x1335   :  { %4291 = vrsqrt.f32 %v2952_v18 }
0x1336   :  { %v2978_v4 = vpop.xlane.xlu0 %2977 }
0x1337   :  { %v2982_v54 = vmax.f32 %v2978_v4, 1e-16 }
0x1338   :  { %v2930_v36 = vpop.xlane.xlu1 %2929 }
0x1339   :  { %v2934_v20 = vmax.f32 %v2930_v36, 1e-16  ;;  %4293 = vrsqrt.f32 %v2982_v54 }
0x133a   :  { %v2981_v8 = vpop.xlane.xlu0 %2980 }
0x133b   :  { %4295 = vrsqrt.f32 %v2934_v20  ;;  %v2985_v37 = vmax.f32 %v2981_v8, 1e-16 }
0x133c   :  { %4297 = vrsqrt.f32 %v2931_v19  ;;  %v3000_v11 = vpop.xlane.xlu1 %2999 }
0x133d   :  { %4299 = vrsqrt.f32 %v2985_v37  ;;  %v3002_v43 = vmax.f32 %v3000_v11, 1e-16 }
0x133e   :  { %v2922_v58 = vpop.xlane.xlu0 %2921 }
0x133f   :  { %4301 = vrsqrt.f32 %v3002_v43  ;;  %v4292_v40 = vpop.eup %4291 }
0x1340   :  { %v2946_v29 = vpop.xlane.xlu1 %2945  ;;  %v2955_v27 = vrot.slane %v4292_v40, 2 }
0x1342   :  { %v2974_v24 = vpop.xlane.xlu0 %2973 }
0x1343   :  { %v4294_v57 = vpop.eup %4293 }
0x1344   :  { %v2997_v30 = vpop.xlane.xlu1 %2996  ;;  %v2984_v52 = vmul.f32 %v4294_v57, %v2974_v24 }
0x1345   :  { %v4296_v55 = vpop.eup %4295  ;;  %v3001_v53 = vmul.f32 %v4294_v57, %v2997_v30 }
0x1346   :  { %v4298_v13 = vpop.eup %4297  ;;  %v2937_v42 = vrot.slane %v4296_v55, 1 }
0x1347   :  { %v4300_v16 = vpop.eup %4299  ;;  %v2933_v62 = vmul.f32 %v4298_v13, %v2922_v58  ;;  %v3755_v2 = vpop.f32.mrb[40].mxu1  ;;  %v2951_v50 = vmul.f32 %v4298_v13, %v2946_v29 }
0x1348   :  { %v2988_v12 = vrot.slane %v4300_v16, 1  ;;  %v2899_v5 = vpop.f32.mrb[41].mxu1 }
0x1349   :  { %v4302_v41 = vpop.eup %4301  ;;  %v2939_v28 = vmul.f32 %v2937_v42, %v2933_v62  ;;  %v2957_v3 = vmul.f32 %v2955_v27, %v2951_v50 }
0x134a   :  { %v3005_v33 = vrot.slane %v4302_v41, 2  ;;  %v2990_v6 = vmul.f32 %v2988_v12, %v2984_v52 }
0x134c   :  { %v2991_v60 = vadd.f32 %v2990_v6, %v2939_v28  ;;  %v3007_v59 = vmul.f32 %v3005_v33, %v3001_v53 }
0x134e   :  { %v3022_v47 = vmul.f32 0.5, %v2991_v60  ;;  %v3008_v10 = vadd.f32 %v3007_v59, %v2957_v3 }
0x1350   :  { %v3023_v38 = vmul.f32 0.5, %v3008_v10  ;;  %3118 = vperm.xlu0 %4121, %v3022_v47  }
0x1352   :  { %3125 = vperm.xlu1 %4122, %v3023_v38  }
0x13cf   :  { %v3111_v21 = vpop.f32.mrb[36].mxu0  ;;  %v3119_v39 = vpop.permute.xlu0 %3118 }
0x13d0   :  { %v3782_v44 = vpop.f32.mrb[37].mxu0  ;;  %v3121_v31 = vsel %vm3115_vm1, %v3119_v39, 0.0  ;;  %v3112_v17 = vadd.f32 %v3282_v61, %v3111_v21 }
0x13d1   :  { %v3126_v63 = vpop.permute.xlu1 %3125 }
0x13d2   :  { %v3128_v56 = vsel %vm3122_vm3, %v3126_v63, 0.0 }
0x13d3   :  { %v3129_v48 = vadd.f32 %v3128_v56, %v3121_v31 }
0x13d5   :  { %v3131_v22 = vrot.slane %v3129_v48, 6 }
0x13d7   :  { %v3134_v32 = vsel %vm3133_vm4, %v3112_v17, %v3131_v22 }
0x13d8   :  { %v3136_v45 = vsel %vm3135_vm5, %v3134_v32, 0.0 }
0x13d9   :  { %3137 = vst [vmem:[%s5326_s4] sm:$0xff] %v3136_v45 }

</bundles_post_ra>
